<compile_context>
chip_gen: v5e
topology: v5e:2x2
jax: 0.10.0
libtpu: 0.0.40
codegen_flags: <defaults>
</compile_context>

<pallas_src>
import functools
import math

import jax
import jax.numpy as jnp
from jax.experimental import pallas as pl
from jax.experimental.pallas import tpu as pltpu

COMPUTE_DTYPE = jnp.bfloat16   # MXU input dtype; accumulation stays float32
LN_EPS = 1e-5                  # nn.LayerNorm default


# ---------------------------------------------------------------------------
# Kernel 1: fused window attention (norm1 + qkv + attn + proj + residual)
# ---------------------------------------------------------------------------
def _window_attn_kernel(x_ref, g1_ref, b1_ref, wqkv_ref, bqkv_ref,
                        wproj_ref, bproj_ref, bias_ref, o_ref,
                        *, num_windows, win_tokens, num_heads, scale,
                        compute_dtype):
    C = x_ref.shape[-1]
    hd = C // num_heads
    x = x_ref[0]                                     # (nW*N, C) float32

    # LayerNorm (norm1) in f32 on the VPU
    mu = jnp.mean(x, axis=-1, keepdims=True)
    xc = x - mu
    var = jnp.mean(xc * xc, axis=-1, keepdims=True)
    xn = xc * jax.lax.rsqrt(var + LN_EPS) * g1_ref[...] + b1_ref[...]

    # QKV projection on the MXU (bf16 inputs, f32 accumulate)
    qkv = jnp.dot(xn.astype(compute_dtype), wqkv_ref[...],
                  preferred_element_type=jnp.float32) + bqkv_ref[...]
    qkv = qkv.reshape(num_windows, win_tokens, 3 * C)

    wproj = wproj_ref[...]                           # (C, C) bf16, loaded once
    y = None
    for h in range(num_heads):                       # static unroll over heads
        q = qkv[:, :, h * hd:(h + 1) * hd] * scale
        k = qkv[:, :, C + h * hd:C + (h + 1) * hd]
        v = qkv[:, :, 2 * C + h * hd:2 * C + (h + 1) * hd]
        att = jnp.einsum('wqd,wkd->wqk',
                         q.astype(compute_dtype), k.astype(compute_dtype),
                         preferred_element_type=jnp.float32)
        att = att + bias_ref[h]                      # rel-pos bias + shift mask
        att = att - jnp.max(att, axis=-1, keepdims=True)
        p = jnp.exp(att)
        p = p / jnp.sum(p, axis=-1, keepdims=True)   # softmax
        oh = jnp.einsum('wqk,wkd->wqd',
                        p.astype(compute_dtype), v.astype(compute_dtype),
                        preferred_element_type=jnp.float32)
        oh = oh.reshape(num_windows * win_tokens, hd)
        # Project this head through its own wproj row-slice and accumulate
        # (identical to concat(heads) @ wproj, without the lane concat).
        part = jnp.dot(oh.astype(compute_dtype), wproj[h * hd:(h + 1) * hd, :],
                       preferred_element_type=jnp.float32)
        y = part if y is None else y + part

    y = y + bproj_ref[...]
    o_ref[0] = (x + y).astype(o_ref.dtype)           # residual add


def _window_attention(xw, blk, bias_mask, *, num_heads,
                      compute_dtype=COMPUTE_DTYPE):
    B, T, C = xw.shape                               # T = nW * N
    nh, nW, N, _ = bias_mask.shape
    scale = (C // num_heads) ** (-0.5)
    kernel = functools.partial(
        _window_attn_kernel, num_windows=nW, win_tokens=N,
        num_heads=num_heads, scale=scale, compute_dtype=compute_dtype)
    res2 = lambda b: (0, 0)
    return pl.pallas_call(
        kernel,
        out_shape=jax.ShapeDtypeStruct((B, T, C), xw.dtype),
        grid=(B,),
        in_specs=[
            pl.BlockSpec((1, T, C), lambda b: (b, 0, 0)),
            pl.BlockSpec((1, C), res2),
            pl.BlockSpec((1, C), res2),
            pl.BlockSpec((C, 3 * C), res2),
            pl.BlockSpec((1, 3 * C), res2),
            pl.BlockSpec((C, C), res2),
            pl.BlockSpec((1, C), res2),
            pl.BlockSpec((nh, nW, N, N), lambda b: (0, 0, 0, 0)),
        ],
        out_specs=pl.BlockSpec((1, T, C), lambda b: (b, 0, 0)),
        compiler_params=pltpu.CompilerParams(
            dimension_semantics=("parallel",)),
    )(
        xw,
        blk["ln1_g"].reshape(1, C), blk["ln1_b"].reshape(1, C),
        blk["wqkv"].astype(compute_dtype), blk["bqkv"].reshape(1, 3 * C),
        blk["wproj"].astype(compute_dtype), blk["bproj"].reshape(1, C),
        bias_mask,
    )


# ---------------------------------------------------------------------------
# Kernel 2: fused MLP (norm2 + Mlp.norm + fc1 + GELU + fc2 + residual)
# ---------------------------------------------------------------------------
def _mlp_kernel(x_ref, g2_ref, b2_ref, gm_ref, bm_ref,
                w1_ref, bb1_ref, w2_ref, bb2_ref, o_ref, *, compute_dtype):
    x = x_ref[...]                                   # (TM, C) float32

    def _ln(v, g, b):
        mu = jnp.mean(v, axis=-1, keepdims=True)
        vc = v - mu
        var = jnp.mean(vc * vc, axis=-1, keepdims=True)
        return vc * jax.lax.rsqrt(var + LN_EPS) * g + b

    h = _ln(x, g2_ref[...], b2_ref[...])             # block norm2
    h = _ln(h, gm_ref[...], bm_ref[...])             # Mlp's own LayerNorm
    h = jnp.dot(h.astype(compute_dtype), w1_ref[...],
                preferred_element_type=jnp.float32) + bb1_ref[...]
    h = 0.5 * h * (1.0 + jax.lax.erf(h * (1.0 / math.sqrt(2.0))))  # exact GELU
    h = jnp.dot(h.astype(compute_dtype), w2_ref[...],
                preferred_element_type=jnp.float32) + bb2_ref[...]
    o_ref[...] = (x + h).astype(o_ref.dtype)         # residual add


def _choose_tile_m(m, cap=512):
    for t in (cap, 256, 128, 64, 32, 16, 8):
        if t <= m and m % t == 0:
            return t
    return m


def _mlp(x2, blk, *, compute_dtype=COMPUTE_DTYPE):
    M, C = x2.shape
    Hd = blk["w1"].shape[1]
    TM = _choose_tile_m(M)
    kernel = functools.partial(_mlp_kernel, compute_dtype=compute_dtype)
    res2 = lambda i: (0, 0)
    return pl.pallas_call(
        kernel,
        out_shape=jax.ShapeDtypeStruct((M, C), x2.dtype),
        grid=(M // TM,),
        in_specs=[
            pl.BlockSpec((TM, C), lambda i: (i, 0)),
            pl.BlockSpec((1, C), res2), pl.BlockSpec((1, C), res2),
            pl.BlockSpec((1, C), res2), pl.BlockSpec((1, C), res2),
            pl.BlockSpec((C, Hd), res2), pl.BlockSpec((1, Hd), res2),
            pl.BlockSpec((Hd, C), res2), pl.BlockSpec((1, C), res2),
        ],
        out_specs=pl.BlockSpec((TM, C), lambda i: (i, 0)),
        compiler_params=pltpu.CompilerParams(
            dimension_semantics=("parallel",)),
    )(x2,
      blk["ln2_g"].reshape(1, C), blk["ln2_b"].reshape(1, C),
      blk["lnm_g"].reshape(1, C), blk["lnm_b"].reshape(1, C),
      blk["w1"].astype(compute_dtype), blk["b1"].reshape(1, Hd),
      blk["w2"].astype(compute_dtype), blk["b2"].reshape(1, C))


# ---------------------------------------------------------------------------
# JAX glue: relative-position bias, shift mask, window partition / reverse
# ---------------------------------------------------------------------------
def _relative_position_bias(rpb_table, ws, num_heads):
    coords = jnp.stack(jnp.meshgrid(jnp.arange(ws), jnp.arange(ws),
                                    indexing="ij"))          # (2, ws, ws)
    cf = coords.reshape(2, -1)                                # (2, N)
    rel = cf[:, :, None] - cf[:, None, :]                     # (2, N, N)
    rel = jnp.transpose(rel, (1, 2, 0)) + jnp.array([ws - 1, ws - 1])
    idx = rel[..., 0] * (2 * ws - 1) + rel[..., 1]            # (N, N)
    N = ws * ws
    rpb = rpb_table[idx.reshape(-1)].reshape(N, N, num_heads)
    return jnp.transpose(rpb, (2, 0, 1)).astype(jnp.float32)  # (nh, N, N)


def _shift_mask(H, W, ws, shift):
    nWh, nWw = H // ws, W // ws
    nW, N = nWh * nWw, ws * ws
    if shift == 0:
        return jnp.zeros((nW, N, N), jnp.float32)
    img = jnp.zeros((H, W), jnp.float32)
    cnt = 0
    for hs in (slice(0, H - ws), slice(H - ws, H - shift), slice(H - shift, H)):
        for wsl in (slice(0, W - ws), slice(W - ws, W - shift), slice(W - shift, W)):
            img = img.at[hs, wsl].set(float(cnt))
            cnt += 1
    mw = img.reshape(nWh, ws, nWw, ws).transpose(0, 2, 1, 3).reshape(nW, N)
    am = mw[:, None, :] - mw[:, :, None]
    return jnp.where(am != 0, -100.0, 0.0).astype(jnp.float32)


def _swin_block_forward(x, blk, cfg, num_heads):
    B, L, C = x.shape
    H, W = cfg["input_resolution"]
    ws, ss = cfg["window_size"], cfg["shift_size"]
    nWh, nWw = H // ws, W // ws
    nW, N = nWh * nWw, ws * ws

    rpb = _relative_position_bias(blk["rpb_table"], ws, num_heads)  # (nh,N,N)
    mask = _shift_mask(H, W, ws, ss)                                # (nW,N,N)
    bias_mask = rpb[:, None] + mask[None]                           # (nh,nW,N,N)

    # window partition (+ cyclic shift) -- pure layout, no data expansion
    xr = x.reshape(B, H, W, C)
    if ss > 0:
        xr = jnp.roll(xr, shift=(-ss, -ss), axis=(1, 2))
    xw = (xr.reshape(B, nWh, ws, nWw, ws, C)
            .transpose(0, 1, 3, 2, 4, 5)
            .reshape(B, nW * N, C))

    # Residual is added inside the kernel in the windowed (permuted) layout;
    # since partition+shift is a token permutation and norm1 is per-token,
    # this matches shortcut + window_reverse(attn(window_partition(norm1(x)))).
    yw = _window_attention(xw, blk, bias_mask, num_heads=num_heads)

    # window reverse (+ shift back)
    yr = (yw.reshape(B, nWh, nWw, ws, ws, C)
            .transpose(0, 1, 3, 2, 4, 5)
            .reshape(B, H, W, C))
    if ss > 0:
        yr = jnp.roll(yr, shift=(ss, ss), axis=(1, 2))
    x = yr.reshape(B, L, C)

    # fused MLP path (+ residual)
    y = _mlp(x.reshape(B * L, C), blk)
    return y.reshape(B, L, C)


def swin_layer_forward(x, params, block_cfgs, num_heads):
    for blk, cfg in zip(params, block_cfgs):
        x = _swin_block_forward(x, blk, cfg, num_heads)
    # downsample=None in this configuration (module default)
    return x


# ---------------------------------------------------------------------------
# Parameter init (matches module defaults: LN weight=1/bias=0, biases=0,
# trunc-normal-ish rel-pos table, random linear weights)
# ---------------------------------------------------------------------------
def init_swin_layer_params(key, dim, input_resolution, depth, num_heads,
                           window_size, mlp_ratio=4.0):
    H, W = input_resolution
    hidden = int(dim * mlp_ratio)
    params, cfgs = [], []
    keys = jax.random.split(key, depth)
    for i in range(depth):
        ws = window_size
        ss = 0 if i % 2 == 0 else window_size // 2
        if min(H, W) <= ws:
            ss, ws = 0, min(H, W)
        k = jax.random.split(keys[i], 5)
        table = (2 * ws - 1) ** 2
        blk = dict(
            ln1_g=jnp.ones((dim,), jnp.float32),
            ln1_b=jnp.zeros((dim,), jnp.float32),
            wqkv=jax.random.normal(k[0], (dim, 3 * dim), jnp.float32) * (dim ** -0.5),
            bqkv=jnp.zeros((3 * dim,), jnp.float32),
            wproj=jax.random.normal(k[1], (dim, dim), jnp.float32) * (dim ** -0.5),
            bproj=jnp.zeros((dim,), jnp.float32),
            rpb_table=jax.random.normal(k[2], (table, num_heads), jnp.float32) * 0.02,
            ln2_g=jnp.ones((dim,), jnp.float32),
            ln2_b=jnp.zeros((dim,), jnp.float32),
            lnm_g=jnp.ones((dim,), jnp.float32),
            lnm_b=jnp.zeros((dim,), jnp.float32),
            w1=jax.random.normal(k[3], (dim, hidden), jnp.float32) * (dim ** -0.5),
            b1=jnp.zeros((hidden,), jnp.float32),
            w2=jax.random.normal(k[4], (hidden, dim), jnp.float32) * (hidden ** -0.5),
            b2=jnp.zeros((dim,), jnp.float32),
        )
        params.append(blk)
        cfgs.append(dict(input_resolution=(H, W), window_size=ws, shift_size=ss))
    return params, cfgs


if __name__ == "__main__":
    key = jax.random.PRNGKey(0)
    kp, kx = jax.random.split(key)

    B, dim = 2, 32
    H = W = 8                      # L = 64
    depth, num_heads, window_size = 2, 2, 4   # block 1 uses shift=2

    params, cfgs = init_swin_layer_params(kp, dim, (H, W), depth,
                                          num_heads, window_size)
    x = jax.random.normal(kx, (B, H * W, dim), jnp.float32)

    fwd = jax.jit(lambda xx, pp: swin_layer_forward(xx, pp, cfgs, num_heads))
    out = jax.block_until_ready(fwd(x, params))

    assert out.shape == (B, H * W, dim), out.shape
    assert out.dtype == jnp.float32
    assert bool(jnp.all(jnp.isfinite(out)))
    print("KERNEL_OK")
</pallas_src>

<mosaic_0001>
module attributes {stable_mosaic.version = 11 : i64} {
  func.func @_window_attn_kernel(%arg0: i32, %arg1: memref<1x64x32xf32, #tpu.memory_space<vmem>>, %arg2: memref<1x32xf32, #tpu.memory_space<vmem>>, %arg3: memref<1x32xf32, #tpu.memory_space<vmem>>, %arg4: memref<32x96xbf16, #tpu.memory_space<vmem>>, %arg5: memref<1x96xf32, #tpu.memory_space<vmem>>, %arg6: memref<32x32xbf16, #tpu.memory_space<vmem>>, %arg7: memref<1x32xf32, #tpu.memory_space<vmem>>, %arg8: memref<2x4x16x16xf32, #tpu.memory_space<vmem>>, %arg9: memref<1x64x32xf32, #tpu.memory_space<vmem>>) attributes {dimension_semantics = [#tpu.dimension_semantics<parallel>], iteration_bounds = array<i64: 2>, scalar_prefetch = 0 : i64, scratch_operands = 0 : i64, tpu.core_type = #tpu.core_type<tc>, window_params = [{transform_indices = @transform_0, window_bounds = array<i64: 1, 64, 32>}, {pipeline_mode = #tpu.pipeline_mode<synchronous>, transform_indices = @transform_1, window_bounds = array<i64: 1, 32>}, {pipeline_mode = #tpu.pipeline_mode<synchronous>, transform_indices = @transform_2, window_bounds = array<i64: 1, 32>}, {pipeline_mode = #tpu.pipeline_mode<synchronous>, transform_indices = @transform_3, window_bounds = array<i64: 32, 96>}, {pipeline_mode = #tpu.pipeline_mode<synchronous>, transform_indices = @transform_4, window_bounds = array<i64: 1, 96>}, {pipeline_mode = #tpu.pipeline_mode<synchronous>, transform_indices = @transform_5, window_bounds = array<i64: 32, 32>}, {pipeline_mode = #tpu.pipeline_mode<synchronous>, transform_indices = @transform_6, window_bounds = array<i64: 1, 32>}, {pipeline_mode = #tpu.pipeline_mode<synchronous>, transform_indices = @transform_7, window_bounds = array<i64: 2, 4, 16, 16>}, {transform_indices = @transform_8, window_bounds = array<i64: 1, 64, 32>}]} {
    %c0 = arith.constant 0 : index
    %c0_0 = arith.constant 0 : index
    %c0_1 = arith.constant 0 : index
    %0 = vector.load %arg1[%c0, %c0_0, %c0_1] : memref<1x64x32xf32, #tpu.memory_space<vmem>>, vector<1x64x32xf32>
    %1 = vector.shape_cast %0 : vector<1x64x32xf32> to vector<64x32xf32>
    %cst = arith.constant dense<0.000000e+00> : vector<64xf32>
    %2 = vector.multi_reduction <add>, %1, %cst [1] : vector<64x32xf32> to vector<64xf32>
    %3 = vector.shape_cast %2 : vector<64xf32> to vector<64x1xf32>
    %cst_2 = arith.constant 3.200000e+01 : f32
    %4 = vector.broadcast %cst_2 : f32 to vector<64x1xf32>
    %5 = arith.divf %3, %4 : vector<64x1xf32>
    %6 = vector.broadcast %5 : vector<64x1xf32> to vector<64x32xf32>
    %7 = arith.subf %1, %6 : vector<64x32xf32>
    %8 = arith.mulf %7, %7 : vector<64x32xf32>
    %cst_3 = arith.constant dense<0.000000e+00> : vector<64xf32>
    %9 = vector.multi_reduction <add>, %8, %cst_3 [1] : vector<64x32xf32> to vector<64xf32>
    %10 = vector.shape_cast %9 : vector<64xf32> to vector<64x1xf32>
    %cst_4 = arith.constant 3.200000e+01 : f32
    %11 = vector.broadcast %cst_4 : f32 to vector<64x1xf32>
    %12 = arith.divf %10, %11 : vector<64x1xf32>
    %cst_5 = arith.constant 9.99999974E-6 : f32
    %13 = vector.broadcast %cst_5 : f32 to vector<64x1xf32>
    %14 = arith.addf %12, %13 : vector<64x1xf32>
    %15 = math.rsqrt %14 : vector<64x1xf32>
    %16 = vector.broadcast %15 : vector<64x1xf32> to vector<64x32xf32>
    %17 = arith.mulf %7, %16 : vector<64x32xf32>
    %c0_6 = arith.constant 0 : index
    %c0_7 = arith.constant 0 : index
    %18 = vector.load %arg2[%c0_6, %c0_7] : memref<1x32xf32, #tpu.memory_space<vmem>>, vector<1x32xf32>
    %19 = vector.broadcast %18 : vector<1x32xf32> to vector<64x32xf32>
    %20 = arith.mulf %17, %19 : vector<64x32xf32>
    %c0_8 = arith.constant 0 : index
    %c0_9 = arith.constant 0 : index
    %21 = vector.load %arg3[%c0_8, %c0_9] : memref<1x32xf32, #tpu.memory_space<vmem>>, vector<1x32xf32>
    %22 = vector.broadcast %21 : vector<1x32xf32> to vector<64x32xf32>
    %23 = arith.addf %20, %22 : vector<64x32xf32>
    %24 = arith.truncf %23 : vector<64x32xf32> to vector<64x32xbf16>
    %c0_10 = arith.constant 0 : index
    %c0_11 = arith.constant 0 : index
    %25 = vector.load %arg4[%c0_10, %c0_11] : memref<32x96xbf16, #tpu.memory_space<vmem>>, vector<32x96xbf16>
    %cst_12 = arith.constant dense<0.000000e+00> : vector<64x96xf32>
    %26 = tpu.matmul %24, %25, %cst_12 {dimension_numbers = #tpu.dot_dimension_numbers<[1], [0], [0], [1], [0, 0, 1, 1], [], []>} : vector<64x32xbf16>, vector<32x96xbf16>, vector<64x96xf32> -> vector<64x96xf32>
    %c0_13 = arith.constant 0 : index
    %c0_14 = arith.constant 0 : index
    %27 = vector.load %arg5[%c0_13, %c0_14] : memref<1x96xf32, #tpu.memory_space<vmem>>, vector<1x96xf32>
    %28 = vector.broadcast %27 : vector<1x96xf32> to vector<64x96xf32>
    %29 = arith.addf %26, %28 : vector<64x96xf32>
    %30 = vector.shape_cast %29 : vector<64x96xf32> to vector<4x16x96xf32>
    %c0_15 = arith.constant 0 : index
    %c0_16 = arith.constant 0 : index
    %31 = vector.load %arg6[%c0_15, %c0_16] : memref<32x32xbf16, #tpu.memory_space<vmem>>, vector<32x32xbf16>
    %32 = vector.extract_strided_slice %30 {offsets = [0, 0, 0], sizes = [4, 16, 16], strides = [1, 1, 1]} : vector<4x16x96xf32> to vector<4x16x16xf32>
    %cst_17 = arith.constant 2.500000e-01 : f32
    %33 = vector.broadcast %cst_17 : f32 to vector<4x16x16xf32>
    %34 = arith.mulf %32, %33 : vector<4x16x16xf32>
    %35 = vector.extract_strided_slice %30 {offsets = [0, 0, 32], sizes = [4, 16, 16], strides = [1, 1, 1]} : vector<4x16x96xf32> to vector<4x16x16xf32>
    %36 = vector.extract_strided_slice %30 {offsets = [0, 0, 64], sizes = [4, 16, 16], strides = [1, 1, 1]} : vector<4x16x96xf32> to vector<4x16x16xf32>
    %37 = arith.truncf %34 : vector<4x16x16xf32> to vector<4x16x16xbf16>
    %38 = arith.truncf %35 : vector<4x16x16xf32> to vector<4x16x16xbf16>
    "tpu.trace_start"() <{level = 10 : i32, message = "wqd,wkd->wqk"}> : () -> ()
    %cst_18 = arith.constant dense<0.000000e+00> : vector<4x16x16xf32>
    %39 = tpu.matmul %37, %38, %cst_18 {dimension_numbers = #tpu.dot_dimension_numbers<[2], [2], [1], [1], [0, 0, 0, 1, 1, 1], [0], [0]>} : vector<4x16x16xbf16>, vector<4x16x16xbf16>, vector<4x16x16xf32> -> vector<4x16x16xf32>
    "tpu.trace_stop"() : () -> ()
    %c0_19 = arith.constant 0 : index
    %c0_20 = arith.constant 0 : index
    %c0_21 = arith.constant 0 : index
    %c0_22 = arith.constant 0 : index
    %40 = vector.load %arg8[%c0_19, %c0_20, %c0_21, %c0_22] : memref<2x4x16x16xf32, #tpu.memory_space<vmem>>, vector<1x4x16x16xf32>
    %41 = vector.shape_cast %40 : vector<1x4x16x16xf32> to vector<4x16x16xf32>
    %42 = arith.addf %39, %41 : vector<4x16x16xf32>
    %cst_23 = arith.constant dense<0xFF800000> : vector<4x16xf32>
    %43 = vector.multi_reduction <maximumf>, %42, %cst_23 [2] : vector<4x16x16xf32> to vector<4x16xf32>
    %44 = vector.shape_cast %43 : vector<4x16xf32> to vector<4x16x1xf32>
    %45 = vector.broadcast %44 : vector<4x16x1xf32> to vector<4x16x16xf32>
    %46 = arith.subf %42, %45 : vector<4x16x16xf32>
    %47 = math.exp %46 : vector<4x16x16xf32>
    %cst_24 = arith.constant dense<0.000000e+00> : vector<4x16xf32>
    %48 = vector.multi_reduction <add>, %47, %cst_24 [2] : vector<4x16x16xf32> to vector<4x16xf32>
    %49 = vector.shape_cast %48 : vector<4x16xf32> to vector<4x16x1xf32>
    %50 = vector.broadcast %49 : vector<4x16x1xf32> to vector<4x16x16xf32>
    %51 = arith.divf %47, %50 : vector<4x16x16xf32>
    %52 = arith.truncf %51 : vector<4x16x16xf32> to vector<4x16x16xbf16>
    %53 = arith.truncf %36 : vector<4x16x16xf32> to vector<4x16x16xbf16>
    "tpu.trace_start"() <{level = 10 : i32, message = "wqk,wkd->wqd"}> : () -> ()
    %cst_25 = arith.constant dense<0.000000e+00> : vector<4x16x16xf32>
    %54 = tpu.matmul %52, %53, %cst_25 {dimension_numbers = #tpu.dot_dimension_numbers<[2], [1], [1], [2], [0, 0, 0, 1, 1, 2], [0], [0]>} : vector<4x16x16xbf16>, vector<4x16x16xbf16>, vector<4x16x16xf32> -> vector<4x16x16xf32>
    "tpu.trace_stop"() : () -> ()
    %55 = vector.shape_cast %54 : vector<4x16x16xf32> to vector<64x16xf32>
    %56 = arith.truncf %55 : vector<64x16xf32> to vector<64x16xbf16>
    %57 = vector.extract_strided_slice %31 {offsets = [0, 0], sizes = [16, 32], strides = [1, 1]} : vector<32x32xbf16> to vector<16x32xbf16>
    %cst_26 = arith.constant dense<0.000000e+00> : vector<64x32xf32>
    %58 = tpu.matmul %56, %57, %cst_26 {dimension_numbers = #tpu.dot_dimension_numbers<[1], [0], [0], [1], [0, 0, 1, 1], [], []>} : vector<64x16xbf16>, vector<16x32xbf16>, vector<64x32xf32> -> vector<64x32xf32>
    %59 = vector.extract_strided_slice %30 {offsets = [0, 0, 16], sizes = [4, 16, 16], strides = [1, 1, 1]} : vector<4x16x96xf32> to vector<4x16x16xf32>
    %cst_27 = arith.constant 2.500000e-01 : f32
    %60 = vector.broadcast %cst_27 : f32 to vector<4x16x16xf32>
    %61 = arith.mulf %59, %60 : vector<4x16x16xf32>
    %62 = vector.extract_strided_slice %30 {offsets = [0, 0, 48], sizes = [4, 16, 16], strides = [1, 1, 1]} : vector<4x16x96xf32> to vector<4x16x16xf32>
    %63 = vector.extract_strided_slice %30 {offsets = [0, 0, 80], sizes = [4, 16, 16], strides = [1, 1, 1]} : vector<4x16x96xf32> to vector<4x16x16xf32>
    %64 = arith.truncf %61 : vector<4x16x16xf32> to vector<4x16x16xbf16>
    %65 = arith.truncf %62 : vector<4x16x16xf32> to vector<4x16x16xbf16>
    "tpu.trace_start"() <{level = 10 : i32, message = "wqd,wkd->wqk"}> : () -> ()
    %cst_28 = arith.constant dense<0.000000e+00> : vector<4x16x16xf32>
    %66 = tpu.matmul %64, %65, %cst_28 {dimension_numbers = #tpu.dot_dimension_numbers<[2], [2], [1], [1], [0, 0, 0, 1, 1, 1], [0], [0]>} : vector<4x16x16xbf16>, vector<4x16x16xbf16>, vector<4x16x16xf32> -> vector<4x16x16xf32>
    "tpu.trace_stop"() : () -> ()
    %c1 = arith.constant 1 : index
    %c0_29 = arith.constant 0 : index
    %c0_30 = arith.constant 0 : index
    %c0_31 = arith.constant 0 : index
    %67 = vector.load %arg8[%c1, %c0_29, %c0_30, %c0_31] : memref<2x4x16x16xf32, #tpu.memory_space<vmem>>, vector<1x4x16x16xf32>
    %68 = vector.shape_cast %67 : vector<1x4x16x16xf32> to vector<4x16x16xf32>
    %69 = arith.addf %66, %68 : vector<4x16x16xf32>
    %cst_32 = arith.constant dense<0xFF800000> : vector<4x16xf32>
    %70 = vector.multi_reduction <maximumf>, %69, %cst_32 [2] : vector<4x16x16xf32> to vector<4x16xf32>
    %71 = vector.shape_cast %70 : vector<4x16xf32> to vector<4x16x1xf32>
    %72 = vector.broadcast %71 : vector<4x16x1xf32> to vector<4x16x16xf32>
    %73 = arith.subf %69, %72 : vector<4x16x16xf32>
    %74 = math.exp %73 : vector<4x16x16xf32>
    %cst_33 = arith.constant dense<0.000000e+00> : vector<4x16xf32>
    %75 = vector.multi_reduction <add>, %74, %cst_33 [2] : vector<4x16x16xf32> to vector<4x16xf32>
    %76 = vector.shape_cast %75 : vector<4x16xf32> to vector<4x16x1xf32>
    %77 = vector.broadcast %76 : vector<4x16x1xf32> to vector<4x16x16xf32>
    %78 = arith.divf %74, %77 : vector<4x16x16xf32>
    %79 = arith.truncf %78 : vector<4x16x16xf32> to vector<4x16x16xbf16>
    %80 = arith.truncf %63 : vector<4x16x16xf32> to vector<4x16x16xbf16>
    "tpu.trace_start"() <{level = 10 : i32, message = "wqk,wkd->wqd"}> : () -> ()
    %cst_34 = arith.constant dense<0.000000e+00> : vector<4x16x16xf32>
    %81 = tpu.matmul %79, %80, %cst_34 {dimension_numbers = #tpu.dot_dimension_numbers<[2], [1], [1], [2], [0, 0, 0, 1, 1, 2], [0], [0]>} : vector<4x16x16xbf16>, vector<4x16x16xbf16>, vector<4x16x16xf32> -> vector<4x16x16xf32>
    "tpu.trace_stop"() : () -> ()
    %82 = vector.shape_cast %81 : vector<4x16x16xf32> to vector<64x16xf32>
    %83 = arith.truncf %82 : vector<64x16xf32> to vector<64x16xbf16>
    %84 = vector.extract_strided_slice %31 {offsets = [16, 0], sizes = [16, 32], strides = [1, 1]} : vector<32x32xbf16> to vector<16x32xbf16>
    %cst_35 = arith.constant dense<0.000000e+00> : vector<64x32xf32>
    %85 = tpu.matmul %83, %84, %cst_35 {dimension_numbers = #tpu.dot_dimension_numbers<[1], [0], [0], [1], [0, 0, 1, 1], [], []>} : vector<64x16xbf16>, vector<16x32xbf16>, vector<64x32xf32> -> vector<64x32xf32>
    %86 = arith.addf %58, %85 : vector<64x32xf32>
    %c0_36 = arith.constant 0 : index
    %c0_37 = arith.constant 0 : index
    %87 = vector.load %arg7[%c0_36, %c0_37] : memref<1x32xf32, #tpu.memory_space<vmem>>, vector<1x32xf32>
    %88 = vector.broadcast %87 : vector<1x32xf32> to vector<64x32xf32>
    %89 = arith.addf %86, %88 : vector<64x32xf32>
    %90 = arith.addf %1, %89 : vector<64x32xf32>
    %c0_38 = arith.constant 0 : index
    %c0_39 = arith.constant 0 : index
    %c0_40 = arith.constant 0 : index
    %91 = vector.load %arg9[%c0_38, %c0_39, %c0_40] : memref<1x64x32xf32, #tpu.memory_space<vmem>>, vector<1x64x32xf32>
    %92 = vector.shape_cast %91 : vector<1x64x32xf32> to vector<64x32xf32>
    %93 = vector.shape_cast %90 : vector<64x32xf32> to vector<1x64x32xf32>
    tpu.vector_store %arg9[%c0_38, %c0_39, %c0_40], %93 {strides = array<i32>} : memref<1x64x32xf32, #tpu.memory_space<vmem>>, vector<1x64x32xf32>,
    return
  }
  func.func @transform_0(%arg0: i32) -> (i32, i32, i32) {
    %c0_i32 = arith.constant 0 : i32
    %c0_i32_0 = arith.constant 0 : i32
    %c0_i32_1 = arith.constant 0 : i32
    return %arg0, %c0_i32, %c0_i32_0 : i32, i32, i32
  }
  func.func @transform_1(%arg0: i32) -> (i32, i32) {
    %c0_i32 = arith.constant 0 : i32
    %c0_i32_0 = arith.constant 0 : i32
    %c0_i32_1 = arith.constant 0 : i32
    return %c0_i32, %c0_i32_0 : i32, i32
  }
  func.func @transform_2(%arg0: i32) -> (i32, i32) {
    %c0_i32 = arith.constant 0 : i32
    %c0_i32_0 = arith.constant 0 : i32
    %c0_i32_1 = arith.constant 0 : i32
    return %c0_i32, %c0_i32_0 : i32, i32
  }
  func.func @transform_3(%arg0: i32) -> (i32, i32) {
    %c0_i32 = arith.constant 0 : i32
    %c0_i32_0 = arith.constant 0 : i32
    %c0_i32_1 = arith.constant 0 : i32
    return %c0_i32, %c0_i32_0 : i32, i32
  }
  func.func @transform_4(%arg0: i32) -> (i32, i32) {
    %c0_i32 = arith.constant 0 : i32
    %c0_i32_0 = arith.constant 0 : i32
    %c0_i32_1 = arith.constant 0 : i32
    return %c0_i32, %c0_i32_0 : i32, i32
  }
  func.func @transform_5(%arg0: i32) -> (i32, i32) {
    %c0_i32 = arith.constant 0 : i32
    %c0_i32_0 = arith.constant 0 : i32
    %c0_i32_1 = arith.constant 0 : i32
    return %c0_i32, %c0_i32_0 : i32, i32
  }
  func.func @transform_6(%arg0: i32) -> (i32, i32) {
    %c0_i32 = arith.constant 0 : i32
    %c0_i32_0 = arith.constant 0 : i32
    %c0_i32_1 = arith.constant 0 : i32
    return %c0_i32, %c0_i32_0 : i32, i32
  }
  func.func @transform_7(%arg0: i32) -> (i32, i32, i32, i32) {
    %c0_i32 = arith.constant 0 : i32
    %c0_i32_0 = arith.constant 0 : i32
    %c0_i32_1 = arith.constant 0 : i32
    %c0_i32_2 = arith.constant 0 : i32
    %c0_i32_3 = arith.constant 0 : i32
    return %c0_i32, %c0_i32_0, %c0_i32_1, %c0_i32_2 : i32, i32, i32, i32
  }
  func.func @transform_8(%arg0: i32) -> (i32, i32, i32) {
    %c0_i32 = arith.constant 0 : i32
    %c0_i32_0 = arith.constant 0 : i32
    %c0_i32_1 = arith.constant 0 : i32
    return %arg0, %c0_i32, %c0_i32_0 : i32, i32, i32
  }
}

module attributes {stable_mosaic.version = 11 : i64} {
  func.func @_mlp_kernel(%arg0: i32, %arg1: memref<128x32xf32, #tpu.memory_space<vmem>>, %arg2: memref<1x32xf32, #tpu.memory_space<vmem>>, %arg3: memref<1x32xf32, #tpu.memory_space<vmem>>, %arg4: memref<1x32xf32, #tpu.memory_space<vmem>>, %arg5: memref<1x32xf32, #tpu.memory_space<vmem>>, %arg6: memref<32x128xbf16, #tpu.memory_space<vmem>>, %arg7: memref<1x128xf32, #tpu.memory_space<vmem>>, %arg8: memref<128x32xbf16, #tpu.memory_space<vmem>>, %arg9: memref<1x32xf32, #tpu.memory_space<vmem>>, %arg10: memref<128x32xf32, #tpu.memory_space<vmem>>) attributes {dimension_semantics = [#tpu.dimension_semantics<parallel>], iteration_bounds = array<i64: 1>, scalar_prefetch = 0 : i64, scratch_operands = 0 : i64, tpu.core_type = #tpu.core_type<tc>, window_params = [{transform_indices = @transform_0, window_bounds = array<i64: 128, 32>}, {pipeline_mode = #tpu.pipeline_mode<synchronous>, transform_indices = @transform_1, window_bounds = array<i64: 1, 32>}, {pipeline_mode = #tpu.pipeline_mode<synchronous>, transform_indices = @transform_2, window_bounds = array<i64: 1, 32>}, {pipeline_mode = #tpu.pipeline_mode<synchronous>, transform_indices = @transform_3, window_bounds = array<i64: 1, 32>}, {pipeline_mode = #tpu.pipeline_mode<synchronous>, transform_indices = @transform_4, window_bounds = array<i64: 1, 32>}, {pipeline_mode = #tpu.pipeline_mode<synchronous>, transform_indices = @transform_5, window_bounds = array<i64: 32, 128>}, {pipeline_mode = #tpu.pipeline_mode<synchronous>, transform_indices = @transform_6, window_bounds = array<i64: 1, 128>}, {pipeline_mode = #tpu.pipeline_mode<synchronous>, transform_indices = @transform_7, window_bounds = array<i64: 128, 32>}, {pipeline_mode = #tpu.pipeline_mode<synchronous>, transform_indices = @transform_8, window_bounds = array<i64: 1, 32>}, {transform_indices = @transform_9, window_bounds = array<i64: 128, 32>}]} {
    %c0 = arith.constant 0 : index
    %c0_0 = arith.constant 0 : index
    %0 = vector.load %arg1[%c0, %c0_0] : memref<128x32xf32, #tpu.memory_space<vmem>>, vector<128x32xf32>
    %c0_1 = arith.constant 0 : index
    %c0_2 = arith.constant 0 : index
    %1 = vector.load %arg2[%c0_1, %c0_2] : memref<1x32xf32, #tpu.memory_space<vmem>>, vector<1x32xf32>
    %c0_3 = arith.constant 0 : index
    %c0_4 = arith.constant 0 : index
    %2 = vector.load %arg3[%c0_3, %c0_4] : memref<1x32xf32, #tpu.memory_space<vmem>>, vector<1x32xf32>
    %cst = arith.constant dense<0.000000e+00> : vector<128xf32>
    %3 = vector.multi_reduction <add>, %0, %cst [1] : vector<128x32xf32> to vector<128xf32>
    %4 = vector.shape_cast %3 : vector<128xf32> to vector<128x1xf32>
    %cst_5 = arith.constant 3.200000e+01 : f32
    %5 = vector.broadcast %cst_5 : f32 to vector<128x1xf32>
    %6 = arith.divf %4, %5 : vector<128x1xf32>
    %7 = vector.broadcast %6 : vector<128x1xf32> to vector<128x32xf32>
    %8 = arith.subf %0, %7 : vector<128x32xf32>
    %9 = arith.mulf %8, %8 : vector<128x32xf32>
    %cst_6 = arith.constant dense<0.000000e+00> : vector<128xf32>
    %10 = vector.multi_reduction <add>, %9, %cst_6 [1] : vector<128x32xf32> to vector<128xf32>
    %11 = vector.shape_cast %10 : vector<128xf32> to vector<128x1xf32>
    %cst_7 = arith.constant 3.200000e+01 : f32
    %12 = vector.broadcast %cst_7 : f32 to vector<128x1xf32>
    %13 = arith.divf %11, %12 : vector<128x1xf32>
    %cst_8 = arith.constant 9.99999974E-6 : f32
    %14 = vector.broadcast %cst_8 : f32 to vector<128x1xf32>
    %15 = arith.addf %13, %14 : vector<128x1xf32>
    %16 = math.rsqrt %15 : vector<128x1xf32>
    %17 = vector.broadcast %16 : vector<128x1xf32> to vector<128x32xf32>
    %18 = arith.mulf %8, %17 : vector<128x32xf32>
    %19 = vector.broadcast %1 : vector<1x32xf32> to vector<128x32xf32>
    %20 = arith.mulf %18, %19 : vector<128x32xf32>
    %21 = vector.broadcast %2 : vector<1x32xf32> to vector<128x32xf32>
    %22 = arith.addf %20, %21 : vector<128x32xf32>
    %c0_9 = arith.constant 0 : index
    %c0_10 = arith.constant 0 : index
    %23 = vector.load %arg4[%c0_9, %c0_10] : memref<1x32xf32, #tpu.memory_space<vmem>>, vector<1x32xf32>
    %c0_11 = arith.constant 0 : index
    %c0_12 = arith.constant 0 : index
    %24 = vector.load %arg5[%c0_11, %c0_12] : memref<1x32xf32, #tpu.memory_space<vmem>>, vector<1x32xf32>
    %cst_13 = arith.constant dense<0.000000e+00> : vector<128xf32>
    %25 = vector.multi_reduction <add>, %22, %cst_13 [1] : vector<128x32xf32> to vector<128xf32>
    %26 = vector.shape_cast %25 : vector<128xf32> to vector<128x1xf32>
    %cst_14 = arith.constant 3.200000e+01 : f32
    %27 = vector.broadcast %cst_14 : f32 to vector<128x1xf32>
    %28 = arith.divf %26, %27 : vector<128x1xf32>
    %29 = vector.broadcast %28 : vector<128x1xf32> to vector<128x32xf32>
    %30 = arith.subf %22, %29 : vector<128x32xf32>
    %31 = arith.mulf %30, %30 : vector<128x32xf32>
    %cst_15 = arith.constant dense<0.000000e+00> : vector<128xf32>
    %32 = vector.multi_reduction <add>, %31, %cst_15 [1] : vector<128x32xf32> to vector<128xf32>
    %33 = vector.shape_cast %32 : vector<128xf32> to vector<128x1xf32>
    %cst_16 = arith.constant 3.200000e+01 : f32
    %34 = vector.broadcast %cst_16 : f32 to vector<128x1xf32>
    %35 = arith.divf %33, %34 : vector<128x1xf32>
    %cst_17 = arith.constant 9.99999974E-6 : f32
    %36 = vector.broadcast %cst_17 : f32 to vector<128x1xf32>
    %37 = arith.addf %35, %36 : vector<128x1xf32>
    %38 = math.rsqrt %37 : vector<128x1xf32>
    %39 = vector.broadcast %38 : vector<128x1xf32> to vector<128x32xf32>
    %40 = arith.mulf %30, %39 : vector<128x32xf32>
    %41 = vector.broadcast %23 : vector<1x32xf32> to vector<128x32xf32>
    %42 = arith.mulf %40, %41 : vector<128x32xf32>
    %43 = vector.broadcast %24 : vector<1x32xf32> to vector<128x32xf32>
    %44 = arith.addf %42, %43 : vector<128x32xf32>
    %45 = arith.truncf %44 : vector<128x32xf32> to vector<128x32xbf16>
    %c0_18 = arith.constant 0 : index
    %c0_19 = arith.constant 0 : index
    %46 = vector.load %arg6[%c0_18, %c0_19] : memref<32x128xbf16, #tpu.memory_space<vmem>>, vector<32x128xbf16>
    %cst_20 = arith.constant dense<0.000000e+00> : vector<128x128xf32>
    %47 = tpu.matmul %45, %46, %cst_20 {dimension_numbers = #tpu.dot_dimension_numbers<[1], [0], [0], [1], [0, 0, 1, 1], [], []>} : vector<128x32xbf16>, vector<32x128xbf16>, vector<128x128xf32> -> vector<128x128xf32>
    %c0_21 = arith.constant 0 : index
    %c0_22 = arith.constant 0 : index
    %48 = vector.load %arg7[%c0_21, %c0_22] : memref<1x128xf32, #tpu.memory_space<vmem>>, vector<1x128xf32>
    %49 = vector.broadcast %48 : vector<1x128xf32> to vector<128x128xf32>
    %50 = arith.addf %47, %49 : vector<128x128xf32>
    %cst_23 = arith.constant 5.000000e-01 : f32
    %51 = vector.broadcast %cst_23 : f32 to vector<128x128xf32>
    %52 = arith.mulf %51, %50 : vector<128x128xf32>
    %cst_24 = arith.constant 0.707106769 : f32
    %53 = vector.broadcast %cst_24 : f32 to vector<128x128xf32>
    %54 = arith.mulf %50, %53 : vector<128x128xf32>
    %55 = math.erf %54 : vector<128x128xf32>
    %cst_25 = arith.constant 1.000000e+00 : f32
    %56 = vector.broadcast %cst_25 : f32 to vector<128x128xf32>
    %57 = arith.addf %56, %55 : vector<128x128xf32>
    %58 = arith.mulf %52, %57 : vector<128x128xf32>
    %59 = arith.truncf %58 : vector<128x128xf32> to vector<128x128xbf16>
    %c0_26 = arith.constant 0 : index
    %c0_27 = arith.constant 0 : index
    %60 = vector.load %arg8[%c0_26, %c0_27] : memref<128x32xbf16, #tpu.memory_space<vmem>>, vector<128x32xbf16>
    %cst_28 = arith.constant dense<0.000000e+00> : vector<128x32xf32>
    %61 = tpu.matmul %59, %60, %cst_28 {dimension_numbers = #tpu.dot_dimension_numbers<[1], [0], [0], [1], [0, 0, 1, 1], [], []>} : vector<128x128xbf16>, vector<128x32xbf16>, vector<128x32xf32> -> vector<128x32xf32>
    %c0_29 = arith.constant 0 : index
    %c0_30 = arith.constant 0 : index
    %62 = vector.load %arg9[%c0_29, %c0_30] : memref<1x32xf32, #tpu.memory_space<vmem>>, vector<1x32xf32>
    %63 = vector.broadcast %62 : vector<1x32xf32> to vector<128x32xf32>
    %64 = arith.addf %61, %63 : vector<128x32xf32>
    %65 = arith.addf %0, %64 : vector<128x32xf32>
    %c0_31 = arith.constant 0 : index
    %c0_32 = arith.constant 0 : index
    %66 = vector.load %arg10[%c0_31, %c0_32] : memref<128x32xf32, #tpu.memory_space<vmem>>, vector<128x32xf32>
    tpu.vector_store %arg10[%c0_31, %c0_32], %65 {strides = array<i32>} : memref<128x32xf32, #tpu.memory_space<vmem>>, vector<128x32xf32>,
    return
  }
  func.func @transform_0(%arg0: i32) -> (i32, i32) {
    %c0_i32 = arith.constant 0 : i32
    %c0_i32_0 = arith.constant 0 : i32
    return %arg0, %c0_i32 : i32, i32
  }
  func.func @transform_1(%arg0: i32) -> (i32, i32) {
    %c0_i32 = arith.constant 0 : i32
    %c0_i32_0 = arith.constant 0 : i32
    %c0_i32_1 = arith.constant 0 : i32
    return %c0_i32, %c0_i32_0 : i32, i32
  }
  func.func @transform_2(%arg0: i32) -> (i32, i32) {
    %c0_i32 = arith.constant 0 : i32
    %c0_i32_0 = arith.constant 0 : i32
    %c0_i32_1 = arith.constant 0 : i32
    return %c0_i32, %c0_i32_0 : i32, i32
  }
  func.func @transform_3(%arg0: i32) -> (i32, i32) {
    %c0_i32 = arith.constant 0 : i32
    %c0_i32_0 = arith.constant 0 : i32
    %c0_i32_1 = arith.constant 0 : i32
    return %c0_i32, %c0_i32_0 : i32, i32
  }
  func.func @transform_4(%arg0: i32) -> (i32, i32) {
    %c0_i32 = arith.constant 0 : i32
    %c0_i32_0 = arith.constant 0 : i32
    %c0_i32_1 = arith.constant 0 : i32
    return %c0_i32, %c0_i32_0 : i32, i32
  }
  func.func @transform_5(%arg0: i32) -> (i32, i32) {
    %c0_i32 = arith.constant 0 : i32
    %c0_i32_0 = arith.constant 0 : i32
    %c0_i32_1 = arith.constant 0 : i32
    return %c0_i32, %c0_i32_0 : i32, i32
  }
  func.func @transform_6(%arg0: i32) -> (i32, i32) {
    %c0_i32 = arith.constant 0 : i32
    %c0_i32_0 = arith.constant 0 : i32
    %c0_i32_1 = arith.constant 0 : i32
    return %c0_i32, %c0_i32_0 : i32, i32
  }
  func.func @transform_7(%arg0: i32) -> (i32, i32) {
    %c0_i32 = arith.constant 0 : i32
    %c0_i32_0 = arith.constant 0 : i32
    %c0_i32_1 = arith.constant 0 : i32
    return %c0_i32, %c0_i32_0 : i32, i32
  }
  func.func @transform_8(%arg0: i32) -> (i32, i32) {
    %c0_i32 = arith.constant 0 : i32
    %c0_i32_0 = arith.constant 0 : i32
    %c0_i32_1 = arith.constant 0 : i32
    return %c0_i32, %c0_i32_0 : i32, i32
  }
  func.func @transform_9(%arg0: i32) -> (i32, i32) {
    %c0_i32 = arith.constant 0 : i32
    %c0_i32_0 = arith.constant 0 : i32
    return %arg0, %c0_i32 : i32, i32
  }
}

</mosaic_0001>

<bundles_post_ra>
// kernel: sub.22
= control target key start
LH: loop header
LB: loop body
LE: loop exit
PB: predicated region body
PF: predicated region fallthrough
CT: control target
= control target key end

     0   :  { %s29_s10 = smov 3  ;;  %s45_s11 = smov 12   ;;  %vm12_vm0 = vcmask 31744   ;;  %vm19_vm1 = vcmask 130144   ;;  %vm26_vm2 = vcmask 97344   ;;  %vm33_vm3 = vcmask 64544   ;;  %s67_s0 = inlined_call_operand.vmem [shape: s32[2,4,4], index: 0, kind: input, shape index: {}]   ;;  %s68_s1 = inlined_call_operand.vmem [shape: s32[2,16], index: 1, kind: output, shape index: {}]  }
   0x1   :  { %v41_v0 = vld [vmem:[%s67_s0 + $0x4] sm:$0xf]  ;;  %v8_v1 = vld [vmem:[%s67_s0] sm:$0xf]  ;;  %s15_s0 = smov 3  ;;  %s46_s12 = smov 4  }
   0x2   :  { %7 = vst [vmem:[#allocation1 + $0x8] sm:$0xf] %v41_v0  ;;  %s22_s13 = smov 3  ;;  %s47_s14 = smov 8  }
   0x3   :  { %9 = vst [vmem:[#allocation1] sm:$0xf] %v8_v1  ;;  %s10_s15 = smov 3 }
   0xa   :  { %v16_v2 = vld [vmem:[#allocation1 + $0x3] ss:$8 sm:%s15_s0]   ;;  %v30_v3 = vld [vmem:[#allocation1 + $0x1] ss:$8 sm:%s29_s10]   ;;  %v23_v4 = vld [vmem:[#allocation1 + $0x2] ss:$8 sm:%s22_s13]  }
   0xb   :  { %17 = vrot.lane.b32.xlu0 %v16_v2, %s45_s11  ;;  %31 = vrot.lane.b32.xlu1 %v30_v3, %s46_s12  ;;  %v11_v5 = vld [vmem:[#allocation1] ss:$8 sm:%s10_s15]  }
   0xc   :  { %13 = vst.msk [vmem:[#allocation0] sm:$0x3] %vm12_vm0, %v11_v5  }
  0x13   :  { %24 = vrot.lane.b32.xlu0 %v23_v4, %s47_s14 }
  0x7d   :  { %v18_v6 = vpop.permute.xlu0 %17   ;;  %v32_v7 = vpop.permute.xlu1 %31  }
  0x7e   :  { %20 = vst.msk [vmem:[#allocation0] sm:$0x3] %vm19_vm1, %v18_v6  }
  0x85   :  { %v25_v8 = vpop.permute.xlu0 %24  }
  0x86   :  { %27 = vst.msk [vmem:[#allocation0] sm:$0x3] %vm26_vm2, %v25_v8  }
  0x87   :  { %34 = vst.msk [vmem:[#allocation0] sm:$0x3] %vm33_vm3, %v32_v7  }
  0x8e   :  { %v37_v9 = vld [vmem:[#allocation0] sm:$0x3] }
  0x8f   :  { %40 = vst [vmem:[%s68_s1] sm:$0x3] %v37_v9 }

// kernel: _lambda_.5
= control target key start
LH: loop header
LB: loop body
LE: loop exit
PB: predicated region body
PF: predicated region fallthrough
CT: control target
= control target key end

     0   :  { %vm51_vm0 = vcmask 261120   ;;  %v2013_v14 = vmov 32.0   ;;  %s3358_s0 = inlined_call_operand.vmem [shape: f32[128,32], index: 0, kind: input, shape index: {}]   ;;  %s3359_s1 = inlined_call_operand.vmem [shape: f32[1,32], index: 1, kind: input, shape index: {}]   ;;  %s3360_s2 = inlined_call_operand.vmem [shape: f32[1,32], index: 2, kind: input, shape index: {}]   ;;  %s3361_s3 = inlined_call_operand.vmem [shape: f32[1,32], index: 3, kind: input, shape index: {}]   ;;  %s3362_s4 = inlined_call_operand.vmem [shape: f32[1,32], index: 4, kind: input, shape index: {}]   ;;  %s3363_s5 = inlined_call_operand.vmem [shape: bf16[32,128], index: 5, kind: input, shape index: {}]   ;;  %s3364_s6 = inlined_call_operand.vmem [shape: f32[1,128], index: 6, kind: input, shape index: {}]   ;;  %s3365_s7 = inlined_call_operand.vmem [shape: bf16[128,32], index: 7, kind: input, shape index: {}]   ;;  %s3366_s8 = inlined_call_operand.vmem [shape: f32[1,32], index: 8, kind: input, shape index: {}]   ;;  %s3367_s9 = inlined_call_operand.vmem [shape: f32[128,32], index: 9, kind: output, shape index: {}]  }
   0x1   :  { %v35_v0 = vld [vmem:[%s3358_s0 + $0x10] sm:$0xff]  ;;  %v33_v1 = vld [vmem:[%s3358_s0] sm:$0xff]  ;;  %v36_v6 = vld [vmem:[%s3358_s0 + $0x18] sm:$0xff]  ;;  %1898 = vrcp.f32 %v2013_v14 }
   0x2   :  { %v58_v2 = vsel %vm51_vm0, %v35_v0, 0.0  ;;  %v52_v3 = vsel %vm51_vm0, %v33_v1, 0.0  ;;  %v2075_v4 = vld [vmem:[%s3358_s0 + $0x20] sm:$0xff]  ;;  %v34_v7 = vld [vmem:[%s3358_s0 + $0x8] sm:$0xff]  ;;  %v61_v9 = vsel %vm51_vm0, %v36_v6, 0.0  ;;  %v39_v12 = vld [vmem:[%s3358_s0 + $0x30] sm:$0xff] }
   0x3   :  { %59 = vadd.xlane.f32.xlu1 %v58_v2  ;;  %53 = vadd.xlane.f32.xlu0 %v52_v3  ;;  %v64_v5 = vsel %vm51_vm0, %v2075_v4, 0.0  ;;  %v38_v8 = vld [vmem:[%s3358_s0 + $0x28] sm:$0xff]  ;;  %v55_v10 = vsel %vm51_vm0, %v34_v7, 0.0  ;;  %v70_v13 = vsel %vm51_vm0, %v39_v12, 0.0  ;;  %v2109_v33 = vld [vmem:[%s3358_s0 + $0x38] sm:$0xff]  ;;  %v2129_v44 = vld [vmem:[%s3358_s0 + $0x50] sm:$0xff] }
   0x4   :  { %65 = vadd.xlane.f32.xlu2 %v64_v5  ;;  %v67_v11 = vsel %vm51_vm0, %v38_v8, 0.0  ;;  %v73_v38 = vsel %vm51_vm0, %v2109_v33, 0.0  ;;  %v2134_v45 = vld [vmem:[%s3358_s0 + $0x40] sm:$0xff]  ;;  %v82_v48 = vsel %vm51_vm0, %v2129_v44, 0.0  ;;  %v2152_v55 = vld [vmem:[%s3358_s0 + $0x58] sm:$0xff]  ;;  %v2157_v56 = vld [vmem:[%s3358_s0 + $0x48] sm:$0xff] }
   0x5   :  { %v76_v49 = vsel %vm51_vm0, %v2134_v45, 0.0  ;;  %v85_v59 = vsel %vm51_vm0, %v2152_v55, 0.0  ;;  %v79_v61 = vsel %vm51_vm0, %v2157_v56, 0.0  ;;  %v2190_v5 = vld [vmem:[%s3358_s0 + $0x68] sm:$0xff] }
   0x7   :  { %v1899_v15 = vpop.eup %1898 }
   0x8   :  { %v101_v16 = vmul.f32 32.0, %v1899_v15  ;;  %vm105_vm1 = vweird.f32 %v1899_v15 }
   0xa   :  { %v102_v17 = vsub.f32 1.0, %v101_v16 }
   0xb   :  { %62 = vadd.xlane.f32.xlu1 %v61_v9  ;;  %56 = vadd.xlane.f32.xlu0 %v55_v10 }
   0xc   :  { %68 = vadd.xlane.f32.xlu2 %v67_v11  ;;  %v103_v18 = vmul.f32 %v1899_v15, %v102_v17 }
   0xe   :  { %v104_v19 = vadd.f32 %v1899_v15, %v103_v18 }
  0x10   :  { %v2095_v20 = vsel %vm105_vm1, %v1899_v15, %v104_v19 }
  0x14   :  { %71 = vadd.xlane.f32.xlu2 %v70_v13 }
  0x76   :  { %v60_v21 = vpop.xlane.xlu1 %59  ;;  %v54_v22 = vpop.xlane.xlu0 %53 }
  0x77   :  { %v107_v23 = vmul.f32 %v2095_v20, %v54_v22  ;;  %v66_v24 = vpop.xlane.xlu2 %65  ;;  %v109_v32 = vmul.f32 %v2095_v20, %v60_v21 }
  0x78   :  { %v111_v54 = vmul.f32 %v2095_v20, %v66_v24 }
  0x79   :  { %v2098_v25 = vsub.f32 %v33_v1, %v107_v23  ;;  %v2121_v40 = vsub.f32 %v35_v0, %v109_v32  ;;  %v2176_v0 = vld [vmem:[%s3358_s0 + $0x60] sm:$0xff] }
  0x7a   :  { %v2165_v60 = vsub.f32 %v2075_v4, %v111_v54  ;;  %v88_v2 = vsel %vm51_vm0, %v2176_v0, 0.0  ;;  %v2185_v4 = vld [vmem:[%s3358_s0 + $0x78] sm:$0xff] }
  0x7b   :  { %v139_v26 = vmul.f32 %v2098_v25, %v2098_v25  ;;  %v141_v46 = vmul.f32 %v2121_v40, %v2121_v40 }
  0x7c   :  { %v143_v63 = vmul.f32 %v2165_v60, %v2165_v60 }
  0x7d   :  { %v155_v27 = vsel %vm51_vm0, %v139_v26, 0.0  ;;  %v161_v50 = vsel %vm51_vm0, %v141_v46, 0.0 }
  0x7e   :  { %v63_v28 = vpop.xlane.xlu1 %62  ;;  %156 = vadd.xlane.f32.xlu0 %v155_v27  ;;  %v57_v29 = vpop.xlane.xlu0 %56  ;;  %v167_v3 = vsel %vm51_vm0, %v143_v63, 0.0 }
  0x7f   :  { %v110_v30 = vmul.f32 %v2095_v20, %v63_v28  ;;  %v108_v31 = vmul.f32 %v2095_v20, %v57_v29  ;;  %v69_v36 = vpop.xlane.xlu2 %68 }
  0x80   :  { %v112_v43 = vmul.f32 %v2095_v20, %v69_v36 }
  0x81   :  { %v2111_v34 = vsub.f32 %v36_v6, %v110_v30  ;;  %v2113_v35 = vsub.f32 %v34_v7, %v108_v31  ;;  %v97_v6 = vsel %vm51_vm0, %v2185_v4, 0.0  ;;  %v91_v7 = vsel %vm51_vm0, %v2190_v5, 0.0 }
  0x82   :  { %v2138_v47 = vsub.f32 %v38_v8, %v112_v43  ;;  %v2199_v8 = vld [vmem:[%s3358_s0 + $0x70] sm:$0xff] }
  0x83   :  { %v142_v37 = vmul.f32 %v2111_v34, %v2111_v34  ;;  %v140_v39 = vmul.f32 %v2113_v35, %v2113_v35  ;;  %v94_v9 = vsel %vm51_vm0, %v2199_v8, 0.0 }
  0x84   :  { %v144_v53 = vmul.f32 %v2138_v47, %v2138_v47 }
  0x85   :  { %v164_v41 = vsel %vm51_vm0, %v142_v37, 0.0  ;;  %v158_v42 = vsel %vm51_vm0, %v140_v39, 0.0 }
  0x86   :  { %165 = vadd.xlane.f32.xlu2 %v164_v41  ;;  %74 = vadd.xlane.f32.xlu0 %v73_v38  ;;  %v170_v58 = vsel %vm51_vm0, %v144_v53, 0.0 }
  0x87   :  { %159 = vadd.xlane.f32.xlu1 %v158_v42  ;;  %v72_v51 = vpop.xlane.xlu2 %71 }
  0x88   :  { %v113_v52 = vmul.f32 %v2095_v20, %v72_v51 }
  0x8a   :  { %v2159_v57 = vsub.f32 %v39_v12, %v113_v52 }
  0x8c   :  { %v145_v62 = vmul.f32 %v2159_v57, %v2159_v57 }
  0x8e   :  { %83 = vadd.xlane.f32.xlu2 %v82_v48  ;;  %77 = vadd.xlane.f32.xlu0 %v76_v49  ;;  %v173_v1 = vsel %vm51_vm0, %v145_v62, 0.0 }
  0x8f   :  { %162 = vadd.xlane.f32.xlu1 %v161_v50  ;;  %v2228_v50 = vld [vmem:[%s3359_s1] ss:$0 sm:$0xff] }
  0x96   :  { %171 = vadd.xlane.f32.xlu2 %v170_v58  ;;  %86 = vadd.xlane.f32.xlu0 %v85_v59  ;;  %v2237_v58 = vld [vmem:[%s3360_s2] ss:$0 sm:$0xff] }
  0x97   :  { %80 = vadd.xlane.f32.xlu1 %v79_v61 }
  0x9e   :  { %174 = vadd.xlane.f32.xlu2 %v173_v1  ;;  %89 = vadd.xlane.f32.xlu0 %v88_v2 }
  0x9f   :  { %168 = vadd.xlane.f32.xlu1 %v167_v3 }
  0xa6   :  { %98 = vadd.xlane.f32.xlu2 %v97_v6 }
  0xa7   :  { %92 = vadd.xlane.f32.xlu1 %v91_v7 }
  0xaf   :  { %95 = vadd.xlane.f32.xlu1 %v94_v9 }
  0xf1   :  { %v157_v10 = vpop.xlane.xlu0 %156 }
  0xf2   :  { %v203_v11 = vmul.f32 %v157_v10, %v2095_v20 }
  0xf4   :  { %v219_v12 = vadd.f32 1e-05, %v203_v11 }
  0xf6   :  { %1900 = vrsqrt.f32 %v219_v12  ;;  %vm241_vm3 = vweird.f32 %v219_v12 }
  0xf9   :  { %v166_v13 = vpop.xlane.xlu2 %165  ;;  %v75_v14 = vpop.xlane.xlu0 %74 }
  0xfa   :  { %v206_v15 = vmul.f32 %v166_v13, %v2095_v20  ;;  %v160_v16 = vpop.xlane.xlu1 %159  ;;  %v114_v17 = vmul.f32 %v2095_v20, %v75_v14 }
  0xfb   :  { %v204_v18 = vmul.f32 %v160_v16, %v2095_v20 }
  0xfc   :  { %v1901_v19 = vpop.eup %1900  ;;  %v222_v21 = vadd.f32 1e-05, %v206_v15  ;;  %v2208_v22 = vsub.f32 %v2109_v33, %v114_v17 }
  0xfd   :  { %v236_v23 = vmul.f32 %v1901_v19, %v219_v12  ;;  %v220_v24 = vadd.f32 1e-05, %v204_v18  ;;  %vm242_vm2 = vweird.f32 %v1901_v19 }
  0xfe   :  { %1902 = vrsqrt.f32 %v222_v21  ;;  %v146_v26 = vmul.f32 %v2208_v22, %v2208_v22  ;;  %vm243_vm4 = vmor %vm241_vm3, %vm242_vm2  ;;  %vm271_vm5 = vweird.f32 %v222_v21 }
  0xff   :  { %v237_v27 = vmul.f32 %v1901_v19, %v236_v23  ;;  %1904 = vrsqrt.f32 %v220_v24  ;;  %vm251_vm9 = vweird.f32 %v220_v24 }
 0x100   :  { %v176_v28 = vsel %vm51_vm0, %v146_v26, 0.0 }
 0x101   :  { %v238_v29 = vmul.f32 0.5, %v237_v27  ;;  %v84_v30 = vpop.xlane.xlu2 %83  ;;  %177 = vadd.xlane.f32.xlu0 %v176_v28  ;;  %v78_v31 = vpop.xlane.xlu0 %77 }
 0x102   :  { %v163_v32 = vpop.xlane.xlu1 %162  ;;  %v115_v36 = vmul.f32 %v2095_v20, %v78_v31  ;;  %v117_v61 = vmul.f32 %v2095_v20, %v84_v30 }
 0x103   :  { %v239_v37 = vsub.f32 1.5, %v238_v29  ;;  %v205_v33 = vmul.f32 %v163_v32, %v2095_v20 }
 0x104   :  { %v2215_v38 = vpop.eup %1902  ;;  %v2218_v39 = vsub.f32 %v2134_v45, %v115_v36 }
 0x105   :  { %v1905_v41 = vpop.eup %1904  ;;  %v240_v42 = vmul.f32 %v1901_v19, %v239_v37  ;;  %v266_v43 = vmul.f32 %v2215_v38, %v222_v21  ;;  %v2221_v46 = vadd.f32 1e-05, %v205_v33  ;;  %vm272_vm6 = vweird.f32 %v2215_v38 }
 0x106   :  { %v246_v48 = vmul.f32 %v1905_v41, %v220_v24  ;;  %v147_v49 = vmul.f32 %v2218_v39, %v2218_v39  ;;  %vm252_vm7 = vweird.f32 %v1905_v41  ;;  %vm2258_vm8 = vmor %vm271_vm5, %vm272_vm6 }
 0x107   :  { %v267_v45 = vmul.f32 %v2215_v38, %v266_v43  ;;  %1906 = vrsqrt.f32 %v2221_v46  ;;  %v244_v51 = vsel %vm243_vm4, %v1901_v19, %v240_v42  ;;  %vm253_vm10 = vmor %vm251_vm9, %vm252_vm7  ;;  %vm261_vm12 = vweird.f32 %v2221_v46 }
 0x108   :  { %v247_v52 = vmul.f32 %v1905_v41, %v246_v48  ;;  %v179_v53 = vsel %vm51_vm0, %v147_v49, 0.0  ;;  %v395_v54 = vmul.f32 %v244_v51, %v2098_v25 }
 0x109   :  { %v268_v59 = vmul.f32 0.5, %v267_v45  ;;  %v172_v62 = vpop.xlane.xlu2 %171  ;;  %180 = vadd.xlane.f32.xlu0 %v179_v53  ;;  %v87_v63 = vpop.xlane.xlu0 %86 }
 0x10a   :  { %v248_v1 = vmul.f32 0.5, %v247_v52  ;;  %v208_v2 = vmul.f32 %v172_v62, %v2095_v20  ;;  %v81_v3 = vpop.xlane.xlu1 %80  ;;  %v414_v6 = vmul.f32 %v2228_v50, %v395_v54  ;;  %v118_v25 = vmul.f32 %v2095_v20, %v87_v63 }
 0x10b   :  { %v269_v7 = vsub.f32 1.5, %v268_v59  ;;  %v116_v9 = vmul.f32 %v2095_v20, %v81_v3 }
 0x10c   :  { %v249_v10 = vsub.f32 1.5, %v248_v1  ;;  %v2245_v11 = vadd.f32 1e-05, %v208_v2  ;;  %v2248_v12 = vadd.f32 %v2237_v58, %v414_v6  ;;  %v2251_v13 = vsub.f32 %v2152_v55, %v118_v25 }
 0x10d   :  { %v1907_v14 = vpop.eup %1906  ;;  %v270_v15 = vmul.f32 %v2215_v38, %v269_v7  ;;  %v2255_v16 = vsub.f32 %v2157_v56, %v116_v9  ;;  %v2265_v55 = vsub.f32 %v2129_v44, %v117_v61 }
 0x10e   :  { %v250_v18 = vmul.f32 %v1905_v41, %v249_v10  ;;  %v256_v19 = vmul.f32 %v1907_v14, %v2221_v46  ;;  %1908 = vrsqrt.f32 %v2245_v11  ;;  %v451_v23 = vsel %vm51_vm0, %v2248_v12, 0.0 }
 0x10f   :  { %v148_v56 = vmul.f32 %v2255_v16, %v2255_v16  ;;  %452 = vadd.xlane.f32.xlu2 %v451_v23  ;;  %v150_v24 = vmul.f32 %v2251_v13, %v2251_v13  ;;  %v274_v44 = vsel %vm2258_vm8, %v2215_v38, %v270_v15  ;;  %vm262_vm11 = vweird.f32 %v1907_v14 }
 0x110   :  { %v257_v21 = vmul.f32 %v1907_v14, %v256_v19  ;;  %v254_v26 = vsel %vm253_vm10, %v1905_v41, %v250_v18  ;;  %v398_v49 = vmul.f32 %v274_v44, %v2111_v34  ;;  %vm263_vm13 = vmor %vm261_vm12, %vm262_vm11  ;;  %vm291_vm14 = vweird.f32 %v2245_v11 }
 0x111   :  { %v175_v27 = vpop.xlane.xlu2 %174  ;;  %v182_v28 = vsel %vm51_vm0, %v148_v56, 0.0  ;;  %v396_v29 = vmul.f32 %v254_v26, %v2113_v35  ;;  %v90_v30 = vpop.xlane.xlu0 %89  ;;  %v149_v35 = vmul.f32 %v2265_v55, %v2265_v55  ;;  %v188_v38 = vsel %vm51_vm0, %v150_v24, 0.0 }
 0x112   :  { %v258_v31 = vmul.f32 0.5, %v257_v21  ;;  %v209_v32 = vmul.f32 %v175_v27, %v2095_v20  ;;  %183 = vadd.xlane.f32.xlu1 %v182_v28  ;;  %v169_v36 = vpop.xlane.xlu1 %168  ;;  %v119_v37 = vmul.f32 %v2095_v20, %v90_v30  ;;  %v417_v62 = vmul.f32 %v2228_v50, %v398_v49 }
 0x113   :  { %v207_v33 = vmul.f32 %v169_v36, %v2095_v20  ;;  %v415_v41 = vmul.f32 %v2228_v50, %v396_v29  ;;  %v185_v61 = vsel %vm51_vm0, %v149_v35, 0.0 }
 0x114   :  { %v1909_v42 = vpop.eup %1908  ;;  %v259_v43 = vsub.f32 1.5, %v258_v31  ;;  %v2284_v48 = vadd.f32 1e-05, %v209_v32  ;;  %v2293_v53 = vsub.f32 %v2176_v0, %v119_v37  ;;  %v2313_v15 = vadd.f32 %v2237_v58, %v417_v62 }
 0x115   :  { %v286_v45 = vmul.f32 %v1909_v42, %v2245_v11  ;;  %v223_v51 = vadd.f32 1e-05, %v207_v33  ;;  %v2290_v52 = vadd.f32 %v2237_v58, %v415_v41  ;;  %vm292_vm15 = vweird.f32 %v1909_v42 }
 0x116   :  { %v260_v54 = vmul.f32 %v1907_v14, %v259_v43  ;;  %1910 = vrsqrt.f32 %v2284_v48  ;;  %v151_v1 = vmul.f32 %v2293_v53, %v2293_v53  ;;  %vm293_vm1 = vmor %vm291_vm14, %vm292_vm15  ;;  %v460_v24 = vsel %vm51_vm0, %v2313_v15, 0.0 }
 0x117   :  { %v287_v59 = vmul.f32 %v1909_v42, %v286_v45  ;;  %1912 = vrsqrt.f32 %v223_v51  ;;  %v454_v34 = vsel %vm51_vm0, %v2290_v52, 0.0  ;;  %189 = vadd.xlane.f32.xlu2 %v188_v38  ;;  %vm281_vm3 = vweird.f32 %v223_v51 }
 0x118   :  { %455 = vadd.xlane.f32.xlu0 %v454_v34  ;;  %v264_v0 = vsel %vm263_vm13, %v1907_v14, %v260_v54  ;;  %vm301_vm5 = vweird.f32 %v2284_v48 }
 0x119   :  { %v288_v63 = vmul.f32 0.5, %v287_v59  ;;  %v397_v46 = vmul.f32 %v264_v0, %v2121_v40  ;;  %v191_v40 = vsel %vm51_vm0, %v151_v1, 0.0  ;;  %v99_v41 = vpop.xlane.xlu2 %98 }
 0x11a   :  { %186 = vadd.xlane.f32.xlu1 %v185_v61  ;;  %v93_v2 = vpop.xlane.xlu1 %92  ;;  %v122_v43 = vmul.f32 %v2095_v20, %v99_v41 }
 0x11b   :  { %v289_v3 = vsub.f32 1.5, %v288_v63  ;;  %v120_v6 = vmul.f32 %v2095_v20, %v93_v2  ;;  %v416_v25 = vmul.f32 %v2228_v50, %v397_v46 }
 0x11c   :  { %v1911_v7 = vpop.eup %1910 }
 0x11d   :  { %v1913_v9 = vpop.eup %1912  ;;  %v290_v10 = vmul.f32 %v1909_v42, %v289_v3  ;;  %v296_v14 = vmul.f32 %v1911_v7, %v2284_v48  ;;  %v2316_v18 = vsub.f32 %v2190_v5, %v120_v6  ;;  %v2319_v19 = vadd.f32 %v2237_v58, %v416_v25 }
 0x11e   :  { %v276_v17 = vmul.f32 %v1913_v9, %v223_v51  ;;  %vm282_vm2 = vweird.f32 %v1913_v9  ;;  %vm302_vm6 = vweird.f32 %v1911_v7  ;;  %v2346_v51 = vsub.f32 %v2185_v4, %v122_v43 }
 0x11f   :  { %v294_v23 = vsel %vm293_vm1, %v1909_v42, %v290_v10  ;;  %v297_v56 = vmul.f32 %v1911_v7, %v296_v14  ;;  %v457_v21 = vsel %vm51_vm0, %v2319_v19, 0.0  ;;  %192 = vadd.xlane.f32.xlu2 %v191_v40  ;;  %v152_v28 = vmul.f32 %v2316_v18, %v2316_v18  ;;  %vm283_vm4 = vmor %vm281_vm3, %vm282_vm2 }
 0x120   :  { %v277_v11 = vmul.f32 %v1913_v9, %v276_v17  ;;  %v400_v26 = vmul.f32 %v294_v23, %v2138_v47  ;;  %458 = vadd.xlane.f32.xlu0 %v457_v21  ;;  %vm303_vm7 = vmor %vm301_vm5, %vm302_vm6  ;;  %v154_v34 = vmul.f32 %v2346_v51, %v2346_v51 }
 0x121   :  { %v298_v44 = vmul.f32 0.5, %v297_v56  ;;  %v194_v37 = vsel %vm51_vm0, %v152_v28, 0.0 }
 0x122   :  { %v278_v27 = vmul.f32 0.5, %v277_v11  ;;  %461 = vadd.xlane.f32.xlu1 %v460_v24  ;;  %v96_v5 = vpop.xlane.xlu1 %95  ;;  %v419_v29 = vmul.f32 %v2228_v50, %v400_v26  ;;  %v200_v0 = vsel %vm51_vm0, %v154_v34, 0.0 }
 0x123   :  { %v121_v30 = vmul.f32 %v2095_v20, %v96_v5  ;;  %v299_v35 = vsub.f32 1.5, %v298_v44 }
 0x124   :  { %v279_v31 = vsub.f32 1.5, %v278_v27  ;;  %v2331_v32 = vadd.f32 %v2237_v58, %v419_v29 }
 0x125   :  { %v2334_v36 = vsub.f32 %v2199_v8, %v121_v30  ;;  %v300_v45 = vmul.f32 %v1911_v7, %v299_v35 }
 0x126   :  { %v280_v47 = vmul.f32 %v1913_v9, %v279_v31  ;;  %v466_v33 = vsel %vm51_vm0, %v2331_v32, 0.0 }
 0x127   :  { %467 = vadd.xlane.f32.xlu2 %v466_v33  ;;  %v153_v8 = vmul.f32 %v2334_v36, %v2334_v36  ;;  %v304_v48 = vsel %vm303_vm7, %v1911_v7, %v300_v45 }
 0x128   :  { %v284_v42 = vsel %vm283_vm4, %v1913_v9, %v280_v47  ;;  %195 = vadd.xlane.f32.xlu0 %v194_v37  ;;  %v401_v61 = vmul.f32 %v304_v48, %v2159_v57 }
 0x129   :  { %v399_v38 = vmul.f32 %v284_v42, %v2165_v60  ;;  %v197_v59 = vsel %vm51_vm0, %v153_v8, 0.0 }
 0x12a   :  { %v420_v4 = vmul.f32 %v2228_v50, %v401_v61 }
 0x12b   :  { %v418_v49 = vmul.f32 %v2228_v50, %v399_v38 }
 0x12c   :  { %v2360_v62 = vadd.f32 %v2237_v58, %v420_v4 }
 0x12d   :  { %v2349_v54 = vadd.f32 %v2237_v58, %v418_v49 }
 0x12e   :  { %v469_v63 = vsel %vm51_vm0, %v2360_v62, 0.0 }
 0x12f   :  { %v463_v60 = vsel %vm51_vm0, %v2349_v54, 0.0 }
 0x130   :  { %464 = vadd.xlane.f32.xlu1 %v463_v60  ;;  %198 = vadd.xlane.f32.xlu0 %v197_v59 }
 0x138   :  { %201 = vadd.xlane.f32.xlu1 %v200_v0 }
 0x140   :  { %470 = vadd.xlane.f32.xlu1 %v469_v63 }
 0x174   :  { %v178_v46 = vpop.xlane.xlu0 %177 }
 0x175   :  { %v210_v1 = vmul.f32 %v178_v46, %v2095_v20 }
 0x177   :  { %v226_v2 = vadd.f32 1e-05, %v210_v1 }
 0x179   :  { %1914 = vrsqrt.f32 %v226_v2  ;;  %vm311_vm9 = vweird.f32 %v226_v2 }
 0x17c   :  { %v181_v3 = vpop.xlane.xlu0 %180 }
 0x17d   :  { %v211_v57 = vmul.f32 %v181_v3, %v2095_v20 }
 0x17f   :  { %v1915_v6 = vpop.eup %1914  ;;  %v227_v25 = vadd.f32 1e-05, %v211_v57 }
 0x180   :  { %v306_v7 = vmul.f32 %v1915_v6, %v226_v2  ;;  %vm312_vm8 = vweird.f32 %v1915_v6 }
 0x181   :  { %1916 = vrsqrt.f32 %v227_v25  ;;  %vm313_vm10 = vmor %vm311_vm9, %vm312_vm8  ;;  %vm321_vm11 = vweird.f32 %v227_v25 }
 0x182   :  { %v307_v9 = vmul.f32 %v1915_v6, %v306_v7  ;;  %v453_v10 = vpop.xlane.xlu2 %452 }
 0x183   :  { %v499_v40 = vmul.f32 %v453_v10, %v2095_v20 }
 0x184   :  { %v308_v14 = vmul.f32 0.5, %v307_v9 }
 0x185   :  { %v184_v17 = vpop.xlane.xlu1 %183  ;;  %v2368_v56 = vsub.f32 %v2248_v12, %v499_v40 }
 0x186   :  { %v309_v23 = vsub.f32 1.5, %v308_v14  ;;  %v212_v11 = vmul.f32 %v184_v17, %v2095_v20 }
 0x187   :  { %v1917_v21 = vpop.eup %1916  ;;  %v531_v5 = vmul.f32 %v2368_v56, %v2368_v56 }
 0x188   :  { %v310_v26 = vmul.f32 %v1915_v6, %v309_v23  ;;  %v316_v24 = vmul.f32 %v1917_v21, %v227_v25  ;;  %v228_v27 = vadd.f32 1e-05, %v212_v11  ;;  %vm322_vm12 = vweird.f32 %v1917_v21 }
 0x189   :  { %v547_v44 = vsel %vm51_vm0, %v531_v5, 0.0  ;;  %vm323_vm13 = vmor %vm321_vm11, %vm322_vm12 }
 0x18a   :  { %v317_v28 = vmul.f32 %v1917_v21, %v316_v24  ;;  %1918 = vrsqrt.f32 %v228_v27  ;;  %v314_v29 = vsel %vm313_vm10, %v1915_v6, %v310_v26  ;;  %v190_v30 = vpop.xlane.xlu2 %189  ;;  %548 = vadd.xlane.f32.xlu2 %v547_v44  ;;  %vm331_vm15 = vweird.f32 %v228_v27 }
 0x18b   :  { %v456_v31 = vpop.xlane.xlu0 %455  ;;  %v402_v12 = vmul.f32 %v314_v29, %v2208_v22  ;;  %v214_v37 = vmul.f32 %v190_v30, %v2095_v20 }
 0x18c   :  { %v318_v47 = vmul.f32 0.5, %v317_v28  ;;  %v500_v33 = vmul.f32 %v456_v31, %v2095_v20 }
 0x18d   :  { %v187_v41 = vpop.xlane.xlu1 %186  ;;  %v421_v35 = vmul.f32 %v2228_v50, %v402_v12  ;;  %v2378_v43 = vadd.f32 1e-05, %v214_v37 }
 0x18e   :  { %v319_v42 = vsub.f32 1.5, %v318_v47  ;;  %v2381_v38 = vsub.f32 %v2290_v52, %v500_v33  ;;  %v213_v8 = vmul.f32 %v187_v41, %v2095_v20 }
 0x18f   :  { %v2385_v22 = vadd.f32 %v2237_v58, %v421_v35  ;;  %1920 = vrsqrt.f32 %v2378_v43  ;;  %vm351_vm3 = vweird.f32 %v2378_v43 }
 0x190   :  { %v1919_v49 = vpop.eup %1918  ;;  %v320_v45 = vmul.f32 %v1917_v21, %v319_v42  ;;  %v2388_v59 = vadd.f32 1e-05, %v213_v8  ;;  %v532_v52 = vmul.f32 %v2381_v38, %v2381_v38 }
 0x191   :  { %v326_v60 = vmul.f32 %v1919_v49, %v228_v27  ;;  %v472_v48 = vsel %vm51_vm0, %v2385_v22, 0.0  ;;  %vm332_vm14 = vweird.f32 %v1919_v49 }
 0x192   :  { %1922 = vrsqrt.f32 %v2388_v59  ;;  %v324_v34 = vsel %vm323_vm13, %v1917_v21, %v320_v45  ;;  %v193_v0 = vpop.xlane.xlu2 %192  ;;  %v550_v4 = vsel %vm51_vm0, %v532_v52, 0.0  ;;  %473 = vadd.xlane.f32.xlu2 %v472_v48  ;;  %vm333_vm1 = vmor %vm331_vm15, %vm332_vm14  ;;  %vm341_vm6 = vweird.f32 %v2388_v59 }
 0x193   :  { %v327_v61 = vmul.f32 %v1919_v49, %v326_v60  ;;  %v403_v63 = vmul.f32 %v324_v34, %v2218_v39  ;;  %v215_v46 = vmul.f32 %v193_v0, %v2095_v20  ;;  %551 = vadd.xlane.f32.xlu0 %v550_v4  ;;  %v459_v1 = vpop.xlane.xlu0 %458 }
 0x194   :  { %v501_v3 = vmul.f32 %v459_v1, %v2095_v20 }
 0x195   :  { %v328_v2 = vmul.f32 0.5, %v327_v61  ;;  %v462_v57 = vpop.xlane.xlu1 %461  ;;  %v422_v6 = vmul.f32 %v2228_v50, %v403_v63  ;;  %v1921_v25 = vpop.eup %1920  ;;  %v2400_v7 = vadd.f32 1e-05, %v215_v46 }
 0x196   :  { %v502_v9 = vmul.f32 %v462_v57, %v2095_v20  ;;  %v346_v39 = vmul.f32 %v1921_v25, %v2378_v43  ;;  %v2405_v14 = vsub.f32 %v2319_v19, %v501_v3  ;;  %vm352_vm2 = vweird.f32 %v1921_v25 }
 0x197   :  { %v329_v10 = vsub.f32 1.5, %v328_v2  ;;  %1924 = vrsqrt.f32 %v2400_v7  ;;  %v2412_v23 = vadd.f32 %v2237_v58, %v422_v6  ;;  %vm353_vm5 = vmor %vm351_vm3, %vm352_vm2  ;;  %vm361_vm8 = vweird.f32 %v2400_v7 }
 0x198   :  { %v1923_v40 = vpop.eup %1922  ;;  %v2409_v17 = vsub.f32 %v2313_v15, %v502_v9  ;;  %v347_v21 = vmul.f32 %v1921_v25, %v346_v39  ;;  %v533_v19 = vmul.f32 %v2405_v14, %v2405_v14 }
 0x199   :  { %v330_v11 = vmul.f32 %v1919_v49, %v329_v10  ;;  %v336_v26 = vmul.f32 %v1923_v40, %v2388_v59  ;;  %v475_v24 = vsel %vm51_vm0, %v2412_v23, 0.0  ;;  %vm342_vm4 = vweird.f32 %v1923_v40 }
 0x19a   :  { %v534_v5 = vmul.f32 %v2409_v17, %v2409_v17  ;;  %v348_v15 = vmul.f32 0.5, %v347_v21  ;;  %476 = vadd.xlane.f32.xlu2 %v475_v24  ;;  %v553_v30 = vsel %vm51_vm0, %v533_v19, 0.0  ;;  %vm343_vm7 = vmor %vm341_vm6, %vm342_vm4  ;;  %v468_v52 = vpop.xlane.xlu2 %467 }
 0x19b   :  { %v337_v28 = vmul.f32 %v1923_v40, %v336_v26  ;;  %v334_v29 = vsel %vm333_vm1, %v1919_v49, %v330_v11  ;;  %v196_v27 = vpop.xlane.xlu0 %195  ;;  %554 = vadd.xlane.f32.xlu0 %v553_v30  ;;  %v504_v3 = vmul.f32 %v468_v52, %v2095_v20 }
 0x19c   :  { %v556_v44 = vsel %vm51_vm0, %v534_v5, 0.0  ;;  %v404_v31 = vmul.f32 %v334_v29, %v2255_v16  ;;  %v349_v12 = vsub.f32 1.5, %v348_v15  ;;  %v216_v37 = vmul.f32 %v196_v27, %v2095_v20 }
 0x19d   :  { %v338_v47 = vmul.f32 0.5, %v337_v28  ;;  %557 = vadd.xlane.f32.xlu1 %v556_v44  ;;  %v1925_v33 = vpop.eup %1924  ;;  %v2456_v11 = vsub.f32 %v2331_v32, %v504_v3 }
 0x19e   :  { %v423_v41 = vmul.f32 %v2228_v50, %v404_v31  ;;  %v350_v35 = vmul.f32 %v1921_v25, %v349_v12  ;;  %v356_v8 = vmul.f32 %v1925_v33, %v2400_v7  ;;  %v232_v49 = vadd.f32 1e-05, %v216_v37 }
 0x19f   :  { %v339_v42 = vsub.f32 1.5, %v338_v47  ;;  %vm362_vm9 = vweird.f32 %v1925_v33  ;;  %v536_v32 = vmul.f32 %v2456_v11, %v2456_v11 }
 0x1a0   :  { %v2429_v16 = vadd.f32 %v2237_v58, %v423_v41  ;;  %v357_v60 = vmul.f32 %v1925_v33, %v356_v8  ;;  %v354_v48 = vsel %vm353_vm5, %v1921_v25, %v350_v35  ;;  %1926 = vrsqrt.f32 %v232_v49  ;;  %vm363_vm10 = vmor %vm361_vm8, %vm362_vm9 }
 0x1a1   :  { %v340_v45 = vmul.f32 %v1923_v40, %v339_v42  ;;  %v406_v34 = vmul.f32 %v354_v48, %v2251_v13  ;;  %vm371_vm12 = vweird.f32 %v232_v49  ;;  %v562_v41 = vsel %vm51_vm0, %v536_v32, 0.0 }
 0x1a2   :  { %v478_v43 = vsel %vm51_vm0, %v2429_v16, 0.0  ;;  %v358_v61 = vmul.f32 0.5, %v357_v60 }
 0x1a3   :  { %v465_v0 = vpop.xlane.xlu1 %464  ;;  %v344_v4 = vsel %vm343_vm7, %v1923_v40, %v340_v45  ;;  %v199_v46 = vpop.xlane.xlu0 %198  ;;  %v425_v1 = vmul.f32 %v2228_v50, %v406_v34  ;;  %479 = vadd.xlane.f32.xlu0 %v478_v43 }
 0x1a4   :  { %v503_v63 = vmul.f32 %v465_v0, %v2095_v20  ;;  %v405_v59 = vmul.f32 %v344_v4, %v2265_v55  ;;  %v359_v2 = vsub.f32 1.5, %v358_v61  ;;  %v217_v57 = vmul.f32 %v199_v46, %v2095_v20 }
 0x1a5   :  { %v2445_v6 = vadd.f32 %v2237_v58, %v425_v1 }
 0x1a6   :  { %v2442_v13 = vsub.f32 %v2349_v54, %v503_v63  ;;  %v424_v25 = vmul.f32 %v2228_v50, %v405_v59  ;;  %v360_v9 = vmul.f32 %v1925_v33, %v359_v2  ;;  %v233_v10 = vadd.f32 1e-05, %v217_v57  ;;  %v1927_v55 = vpop.eup %1926 }
 0x1a7   :  { %v484_v7 = vsel %vm51_vm0, %v2445_v6, 0.0  ;;  %v366_v54 = vmul.f32 %v1927_v55, %v232_v49  ;;  %vm372_vm11 = vweird.f32 %v1927_v55 }
 0x1a8   :  { %v2451_v39 = vadd.f32 %v2237_v58, %v424_v25  ;;  %v535_v40 = vmul.f32 %v2442_v13, %v2442_v13  ;;  %1928 = vrsqrt.f32 %v233_v10  ;;  %485 = vadd.xlane.f32.xlu2 %v484_v7  ;;  %v364_v24 = vsel %vm363_vm10, %v1925_v33, %v360_v9  ;;  %vm373_vm13 = vmor %vm371_vm12, %vm372_vm11 }
 0x1a9   :  { %v367_v19 = vmul.f32 %v1927_v55, %v366_v54  ;;  %v407_v15 = vmul.f32 %v364_v24, %v2293_v53  ;;  %vm381_vm14 = vweird.f32 %v233_v10 }
 0x1aa   :  { %v481_v21 = vsel %vm51_vm0, %v2451_v39, 0.0  ;;  %v559_v26 = vsel %vm51_vm0, %v535_v40, 0.0 }
 0x1ab   :  { %482 = vadd.xlane.f32.xlu1 %v481_v21  ;;  %v202_v5 = vpop.xlane.xlu1 %201  ;;  %v368_v29 = vmul.f32 0.5, %v367_v19  ;;  %560 = vadd.xlane.f32.xlu0 %v559_v26  ;;  %v426_v30 = vmul.f32 %v2228_v50, %v407_v15  ;;  %v1872_v21 = vld [vmem:[%s3363_s5 + $0x8] sm:$0xff] }
 0x1ac   :  { %v218_v28 = vmul.f32 %v202_v5, %v2095_v20  ;;  %899 = vmatpush.bf16.msra.mxu0 %v1872_v21  ;;  %1881 = vmatpush.bf16.msra.mxu3 %v1872_v21 }
 0x1ad   :  { %v369_v31 = vsub.f32 1.5, %v368_v29  ;;  %v2467_v12 = vadd.f32 %v2237_v58, %v426_v30 }
 0x1ae   :  { %v234_v27 = vadd.f32 1e-05, %v218_v28  ;;  %v1929_v44 = vpop.eup %1928 }
 0x1af   :  { %v376_v47 = vmul.f32 %v1929_v44, %v233_v10  ;;  %v370_v37 = vmul.f32 %v1927_v55, %v369_v31  ;;  %v487_v53 = vsel %vm51_vm0, %v2467_v12, 0.0  ;;  %vm382_vm15 = vweird.f32 %v1929_v44 }
 0x1b0   :  { %1930 = vrsqrt.f32 %v234_v27  ;;  %488 = vadd.xlane.f32.xlu2 %v487_v53  ;;  %vm383_vm1 = vmor %vm381_vm14, %vm382_vm15  ;;  %vm391_vm3 = vweird.f32 %v234_v27 }
 0x1b1   :  { %v377_v33 = vmul.f32 %v1929_v44, %v376_v47  ;;  %v374_v42 = vsel %vm373_vm13, %v1927_v55, %v370_v37 }
 0x1b2   :  { %v408_v60 = vmul.f32 %v374_v42, %v2316_v18 }
 0x1b3   :  { %v471_v35 = vpop.xlane.xlu1 %470  ;;  %563 = vadd.xlane.f32.xlu1 %v562_v41  ;;  %v378_v8 = vmul.f32 0.5, %v377_v33 }
 0x1b4   :  { %v505_v45 = vmul.f32 %v471_v35, %v2095_v20  ;;  %v427_v43 = vmul.f32 %v2228_v50, %v408_v60 }
 0x1b5   :  { %v379_v52 = vsub.f32 1.5, %v378_v8 }
 0x1b6   :  { %v1931_v48 = vpop.eup %1930  ;;  %v2475_v49 = vsub.f32 %v2360_v62, %v505_v45  ;;  %v2479_v0 = vadd.f32 %v2237_v58, %v427_v43 }
 0x1b7   :  { %v386_v34 = vmul.f32 %v1931_v48, %v234_v27  ;;  %v380_v61 = vmul.f32 %v1929_v44, %v379_v52  ;;  %vm392_vm2 = vweird.f32 %v1931_v48 }
 0x1b8   :  { %v537_v4 = vmul.f32 %v2475_v49, %v2475_v49  ;;  %v490_v18 = vsel %vm51_vm0, %v2479_v0, 0.0  ;;  %vm393_vm4 = vmor %vm391_vm3, %vm392_vm2 }
 0x1b9   :  { %v387_v63 = vmul.f32 %v1931_v48, %v386_v34  ;;  %v384_v1 = vsel %vm383_vm1, %v1929_v44, %v380_v61  ;;  %491 = vadd.xlane.f32.xlu0 %v490_v18 }
 0x1ba   :  { %v565_v46 = vsel %vm51_vm0, %v537_v4, 0.0  ;;  %v409_v59 = vmul.f32 %v384_v1, %v2334_v36 }
 0x1bb   :  { %v388_v62 = vmul.f32 0.5, %v387_v63  ;;  %566 = vadd.xlane.f32.xlu1 %v565_v46  ;;  %v2531_v46 = vld [vmem:[%s3361_s3] ss:$0 sm:$0xff] }
 0x1bc   :  { %v428_v3 = vmul.f32 %v2228_v50, %v409_v59 }
 0x1bd   :  { %v389_v2 = vsub.f32 1.5, %v388_v62 }
 0x1be   :  { %v2489_v25 = vadd.f32 %v2237_v58, %v428_v3 }
 0x1bf   :  { %v390_v57 = vmul.f32 %v1931_v48, %v389_v2 }
 0x1c0   :  { %v493_v9 = vsel %vm51_vm0, %v2489_v25, 0.0 }
 0x1c1   :  { %v394_v10 = vsel %vm393_vm4, %v1931_v48, %v390_v57  ;;  %494 = vadd.xlane.f32.xlu0 %v493_v9 }
 0x1c2   :  { %v410_v55 = vmul.f32 %v394_v10, %v2346_v51 }
 0x1c4   :  { %v429_v7 = vmul.f32 %v2228_v50, %v410_v55  ;;  %v1871_v50 = vld [vmem:[%s3363_s5] sm:$0xff] }
 0x1c5   :  { %900 = vmatpush.bf16.msra.mxu0 %v1871_v50  ;;  %1882 = vmatpush.bf16.msra.mxu3 %v1871_v50  ;;  %v2541_v55 = vld [vmem:[%s3362_s4] ss:$0 sm:$0xff] }
 0x1c6   :  { %v2496_v36 = vadd.f32 %v2237_v58, %v429_v7 }
 0x1c8   :  { %v496_v40 = vsel %vm51_vm0, %v2496_v36, 0.0 }
 0x1c9   :  { %497 = vadd.xlane.f32.xlu1 %v496_v40 }
 0x1fd   :  { %v549_v54 = vpop.xlane.xlu2 %548 }
 0x1fe   :  { %v595_v26 = vmul.f32 %v549_v54, %v2095_v20 }
 0x200   :  { %v611_v51 = vadd.f32 1e-05, %v595_v26 }
 0x202   :  { %1932 = vrsqrt.f32 %v611_v51  ;;  %vm633_vm6 = vweird.f32 %v611_v51 }
 0x205   :  { %v474_v58 = vpop.xlane.xlu2 %473 }
 0x206   :  { %v552_v24 = vpop.xlane.xlu0 %551  ;;  %v506_v19 = vmul.f32 %v474_v58, %v2095_v20 }
 0x207   :  { %v596_v5 = vmul.f32 %v552_v24, %v2095_v20 }
 0x208   :  { %v1933_v15 = vpop.eup %1932  ;;  %v2510_v28 = vsub.f32 %v2385_v22, %v506_v19 }
 0x209   :  { %v612_v29 = vadd.f32 1e-05, %v596_v5  ;;  %v628_v30 = vmul.f32 %v1933_v15, %v611_v51  ;;  %vm634_vm5 = vweird.f32 %v1933_v15 }
 0x20a   :  { %v538_v27 = vmul.f32 %v2510_v28, %v2510_v28  ;;  %vm635_vm7 = vmor %vm633_vm6, %vm634_vm5 }
 0x20b   :  { %1934 = vrsqrt.f32 %v612_v29  ;;  %v629_v32 = vmul.f32 %v1933_v15, %v628_v30  ;;  %vm643_vm9 = vweird.f32 %v612_v29 }
 0x20c   :  { %v568_v44 = vsel %vm51_vm0, %v538_v27, 0.0 }
 0x20d   :  { %v630_v31 = vmul.f32 0.5, %v629_v32  ;;  %569 = vadd.xlane.f32.xlu2 %v568_v44  ;;  %v477_v47 = vpop.xlane.xlu2 %476 }
 0x20e   :  { %v507_v37 = vmul.f32 %v477_v47, %v2095_v20  ;;  %v555_v53 = vpop.xlane.xlu0 %554 }
 0x20f   :  { %v631_v41 = vsub.f32 1.5, %v630_v31  ;;  %v597_v22 = vmul.f32 %v555_v53, %v2095_v20 }
 0x210   :  { %v558_v33 = vpop.xlane.xlu1 %557  ;;  %v2519_v8 = vsub.f32 %v2412_v23, %v507_v37 }
 0x211   :  { %v598_v35 = vmul.f32 %v558_v33, %v2095_v20  ;;  %v1935_v42 = vpop.eup %1934  ;;  %v632_v45 = vmul.f32 %v1933_v15, %v631_v41  ;;  %v613_v48 = vadd.f32 1e-05, %v597_v22 }
 0x212   :  { %v638_v60 = vmul.f32 %v1935_v42, %v612_v29  ;;  %v539_v43 = vmul.f32 %v2519_v8, %v2519_v8  ;;  %vm644_vm8 = vweird.f32 %v1935_v42 }
 0x213   :  { %v2521_v52 = vadd.f32 1e-05, %v598_v35  ;;  %v636_v34 = vsel %vm635_vm7, %v1933_v15, %v632_v45  ;;  %1936 = vrsqrt.f32 %v613_v48  ;;  %vm645_vm10 = vmor %vm643_vm9, %vm644_vm8  ;;  %vm653_vm13 = vweird.f32 %v613_v48 }
 0x214   :  { %v639_v61 = vmul.f32 %v1935_v42, %v638_v60  ;;  %v571_v4 = vsel %vm51_vm0, %v539_v43, 0.0  ;;  %v787_v23 = vmul.f32 %v636_v34, %v2368_v56 }
 0x215   :  { %1938 = vrsqrt.f32 %v2521_v52  ;;  %572 = vadd.xlane.f32.xlu2 %v571_v4  ;;  %vm663_vm15 = vweird.f32 %v2521_v52 }
 0x216   :  { %v640_v63 = vmul.f32 0.5, %v639_v61  ;;  %v480_v18 = vpop.xlane.xlu0 %479  ;;  %v806_v10 = vmul.f32 %v2531_v46, %v787_v23 }
 0x217   :  { %v508_v62 = vmul.f32 %v480_v18, %v2095_v20 }
 0x218   :  { %v641_v1 = vsub.f32 1.5, %v640_v63  ;;  %v825_v30 = vadd.f32 %v2541_v55, %v806_v10 }
 0x219   :  { %v1937_v59 = vpop.eup %1936  ;;  %v2535_v3 = vsub.f32 %v2429_v16, %v508_v62 }
 0x21a   :  { %v642_v2 = vmul.f32 %v1935_v42, %v641_v1  ;;  %v648_v9 = vmul.f32 %v1937_v59, %v613_v48  ;;  %vm654_vm11 = vweird.f32 %v1937_v59 }
 0x21b   :  { %v1939_v57 = vpop.eup %1938  ;;  %v486_v56 = vpop.xlane.xlu2 %485  ;;  %v540_v51 = vmul.f32 %v2535_v3, %v2535_v3  ;;  %vm2565_vm14 = vmor %vm653_vm13, %vm654_vm11 }
 0x21c   :  { %v646_v7 = vsel %vm645_vm10, %v1935_v42, %v642_v2  ;;  %v658_v40 = vmul.f32 %v1939_v57, %v2521_v52  ;;  %v510_v54 = vmul.f32 %v486_v56, %v2095_v20  ;;  %v649_v16 = vmul.f32 %v1937_v59, %v648_v9 }
 0x21d   :  { %v788_v21 = vmul.f32 %v646_v7, %v2381_v38  ;;  %v574_v5 = vsel %vm51_vm0, %v540_v51, 0.0  ;;  %vm664_vm12 = vweird.f32 %v1939_v57 }
 0x21e   :  { %v483_v26 = vpop.xlane.xlu1 %482  ;;  %v659_v50 = vmul.f32 %v1939_v57, %v658_v40  ;;  %v2549_v58 = vsub.f32 %v2445_v6, %v510_v54  ;;  %v650_v19 = vmul.f32 0.5, %v649_v16  ;;  %v561_v15 = vpop.xlane.xlu0 %560  ;;  %575 = vadd.xlane.f32.xlu0 %v574_v5  ;;  %vm665_vm1 = vmor %vm663_vm15, %vm664_vm12 }
 0x21f   :  { %v509_v24 = vmul.f32 %v483_v26, %v2095_v20  ;;  %v807_v29 = vmul.f32 %v2531_v46, %v788_v21  ;;  %v599_v32 = vmul.f32 %v561_v15, %v2095_v20 }
 0x220   :  { %v660_v38 = vmul.f32 0.5, %v659_v50  ;;  %v542_v6 = vmul.f32 %v2549_v58, %v2549_v58  ;;  %v651_v44 = vsub.f32 1.5, %v650_v19 }
 0x221   :  { %v2556_v27 = vsub.f32 %v2451_v39, %v509_v24  ;;  %v826_v31 = vadd.f32 %v2541_v55, %v807_v29  ;;  %v615_v37 = vadd.f32 1e-05, %v599_v32 }
 0x222   :  { %v661_v47 = vsub.f32 1.5, %v660_v38  ;;  %v580_v53 = vsel %vm51_vm0, %v542_v6, 0.0  ;;  %v652_v39 = vmul.f32 %v1937_v59, %v651_v44 }
 0x223   :  { %v541_v33 = vmul.f32 %v2556_v27, %v2556_v27  ;;  %581 = vadd.xlane.f32.xlu2 %v580_v53  ;;  %v841_v41 = vpack.c.bf16 %v826_v31, %v825_v30  ;;  %1940 = vrsqrt.f32 %v615_v37  ;;  %v489_v42 = vpop.xlane.xlu2 %488  ;;  %vm673_vm3 = vweird.f32 %v615_v37 }
 0x224   :  { %v662_v35 = vmul.f32 %v1939_v57, %v661_v47  ;;  %v511_v60 = vmul.f32 %v489_v42, %v2095_v20  ;;  %v656_v43 = vsel %vm2565_vm14, %v1937_v59, %v652_v39 }
 0x225   :  { %v577_v45 = vsel %vm51_vm0, %v541_v33, 0.0  ;;  %1815 = vmatmul.msk.bf16.vlgmr.msra.gmra.mxu0 %vm51_vm0, %v841_v41  ;;  %v789_v23 = vmul.f32 %v656_v43, %v2405_v14 }
 0x226   :  { %578 = vadd.xlane.f32.xlu1 %v577_v45  ;;  %v564_v48 = vpop.xlane.xlu1 %563  ;;  %v666_v34 = vsel %vm665_vm1, %v1939_v57, %v662_v35  ;;  %v2579_v4 = vsub.f32 %v2467_v12, %v511_v60 }
 0x227   :  { %v600_v61 = vmul.f32 %v564_v48, %v2095_v20  ;;  %v790_v52 = vmul.f32 %v666_v34, %v2409_v17  ;;  %v808_v17 = vmul.f32 %v2531_v46, %v789_v23 }
 0x228   :  { %v543_v18 = vmul.f32 %v2579_v4, %v2579_v4 }
 0x229   :  { %v616_v63 = vadd.f32 1e-05, %v600_v61  ;;  %v1941_v1 = vpop.eup %1940  ;;  %v809_v59 = vmul.f32 %v2531_v46, %v790_v52  ;;  %v827_v21 = vadd.f32 %v2541_v55, %v808_v17 }
 0x22a   :  { %v668_v62 = vmul.f32 %v1941_v1, %v615_v37  ;;  %v583_v2 = vsel %vm51_vm0, %v543_v18, 0.0  ;;  %vm674_vm2 = vweird.f32 %v1941_v1 }
 0x22b   :  { %1942 = vrsqrt.f32 %v616_v63  ;;  %584 = vadd.xlane.f32.xlu0 %v583_v2  ;;  %v828_v14 = vadd.f32 %v2541_v55, %v809_v59  ;;  %vm675_vm4 = vmor %vm673_vm3, %vm674_vm2  ;;  %vm683_vm6 = vweird.f32 %v616_v63 }
 0x22c   :  { %v669_v57 = vmul.f32 %v1941_v1, %v668_v62  ;;  %v492_v9 = vpop.xlane.xlu0 %491 }
 0x22d   :  { %v512_v12 = vmul.f32 %v492_v9, %v2095_v20  ;;  %v842_v24 = vpack.c.bf16 %v828_v14, %v827_v21 }
 0x22e   :  { %v670_v56 = vmul.f32 0.5, %v669_v57  ;;  %v567_v50 = vpop.xlane.xlu1 %566 }
 0x22f   :  { %v2590_v7 = vsub.f32 %v2479_v0, %v512_v12  ;;  %v601_v45 = vmul.f32 %v567_v50, %v2095_v20 }
 0x230   :  { %v671_v40 = vsub.f32 1.5, %v670_v56 }
 0x231   :  { %v1943_v10 = vpop.eup %1942  ;;  %v544_v16 = vmul.f32 %v2590_v7, %v2590_v7  ;;  %v617_v60 = vadd.f32 1e-05, %v601_v45 }
 0x232   :  { %v678_v54 = vmul.f32 %v1943_v10, %v616_v63  ;;  %v672_v26 = vmul.f32 %v1941_v1, %v671_v40  ;;  %vm684_vm5 = vweird.f32 %v1943_v10 }
 0x233   :  { %v586_v19 = vsel %vm51_vm0, %v544_v16, 0.0  ;;  %vm685_vm7 = vmor %vm683_vm6, %vm684_vm5  ;;  %1944 = vrsqrt.f32 %v617_v60  ;;  %vm693_vm9 = vweird.f32 %v617_v60 }
 0x234   :  { %v679_v51 = vmul.f32 %v1943_v10, %v678_v54  ;;  %v676_v5 = vsel %vm675_vm4, %v1941_v1, %v672_v26  ;;  %587 = vadd.xlane.f32.xlu1 %v586_v19  ;;  %v495_v0 = vpop.xlane.xlu0 %494 }
 0x235   :  { %1816 = vmatmul.msk.bf16.gmra.mxu0 %vm51_vm0, %v842_v24  ;;  %v513_v29 = vmul.f32 %v495_v0, %v2095_v20  ;;  %v791_v38 = vmul.f32 %v676_v5, %v2442_v13 }
 0x236   :  { %v680_v15 = vmul.f32 0.5, %v679_v51 }
 0x237   :  { %v2600_v32 = vsub.f32 %v2489_v25, %v513_v29  ;;  %v810_v39 = vmul.f32 %v2531_v46, %v791_v38 }
 0x238   :  { %v681_v30 = vsub.f32 1.5, %v680_v15 }
 0x239   :  { %v545_v44 = vmul.f32 %v2600_v32, %v2600_v32  ;;  %v829_v22 = vadd.f32 %v2541_v55, %v810_v39  ;;  %v2636_v39 = vld [vmem:[%s3364_s6] ss:$0 sm:$0xff] }
 0x23a   :  { %v682_v6 = vmul.f32 %v1943_v10, %v681_v30 }
 0x23b   :  { %v589_v33 = vsel %vm51_vm0, %v545_v44, 0.0 }
 0x23c   :  { %v686_v31 = vsel %vm685_vm7, %v1943_v10, %v682_v6  ;;  %v498_v47 = vpop.xlane.xlu1 %497  ;;  %590 = vadd.xlane.f32.xlu2 %v589_v33 }
 0x23d   :  { %v792_v37 = vmul.f32 %v686_v31, %v2456_v11  ;;  %v514_v53 = vmul.f32 %v498_v47, %v2095_v20 }
 0x23f   :  { %v2609_v13 = vsub.f32 %v2496_v36, %v514_v53  ;;  %v811_v25 = vmul.f32 %v2531_v46, %v792_v37  ;;  %v1945_v36 = vpop.eup %1944 }
 0x240   :  { %v688_v48 = vmul.f32 %v1945_v36, %v617_v60  ;;  %vm694_vm8 = vweird.f32 %v1945_v36 }
 0x241   :  { %v546_v41 = vmul.f32 %v2609_v13, %v2609_v13  ;;  %v830_v35 = vadd.f32 %v2541_v55, %v811_v25  ;;  %vm695_vm10 = vmor %vm693_vm9, %vm694_vm8 }
 0x242   :  { %v689_v43 = vmul.f32 %v1945_v36, %v688_v48 }
 0x243   :  { %v592_v11 = vsel %vm51_vm0, %v546_v41, 0.0  ;;  %v843_v42 = vpack.c.bf16 %v830_v35, %v829_v22 }
 0x244   :  { %593 = vadd.xlane.f32.xlu0 %v592_v11  ;;  %v690_v63 = vmul.f32 0.5, %v689_v43 }
 0x245   :  { %1817 = vmatmul.msk.bf16.gmra.mxu0 %vm51_vm0, %v843_v42 }
 0x246   :  { %v691_v23 = vsub.f32 1.5, %v690_v63 }
 0x248   :  { %v692_v59 = vmul.f32 %v1945_v36, %v691_v23  ;;  %v1880_v23 = vld [vmem:[%s3365_s7 + $0x38] sm:$0xff] }
 0x249   :  { %1722 = vmatpush.bf16.msra.mxu1 %v1880_v23  ;;  %1883 = vmatpush.bf16.msra.mxu2 %v1880_v23 }
 0x24a   :  { %v696_v17 = vsel %vm695_vm10, %v1945_v36, %v692_v59 }
 0x24b   :  { %v793_v40 = vmul.f32 %v696_v17, %v2475_v49 }
 0x24d   :  { %v812_v0 = vmul.f32 %v2531_v46, %v793_v40 }
 0x24f   :  { %v831_v31 = vadd.f32 %v2541_v55, %v812_v0 }
 0x280   :  { %v570_v34 = vpop.xlane.xlu2 %569 }
 0x281   :  { %v602_v61 = vmul.f32 %v570_v34, %v2095_v20 }
 0x283   :  { %v618_v52 = vadd.f32 1e-05, %v602_v61 }
 0x285   :  { %1946 = vrsqrt.f32 %v618_v52  ;;  %vm703_vm12 = vweird.f32 %v618_v52 }
 0x288   :  { %v573_v18 = vpop.xlane.xlu2 %572 }
 0x289   :  { %v603_v1 = vmul.f32 %v573_v18, %v2095_v20 }
 0x28b   :  { %v1947_v62 = vpop.eup %1946  ;;  %v619_v2 = vadd.f32 1e-05, %v603_v1 }
 0x28c   :  { %v698_v57 = vmul.f32 %v1947_v62, %v618_v52  ;;  %vm704_vm11 = vweird.f32 %v1947_v62 }
 0x28d   :  { %1948 = vrsqrt.f32 %v619_v2  ;;  %vm705_vm13 = vmor %vm703_vm12, %vm704_vm11  ;;  %vm713_vm15 = vweird.f32 %v619_v2 }
 0x28e   :  { %v699_v9 = vmul.f32 %v1947_v62, %v698_v57 }
 0x290   :  { %v700_v12 = vmul.f32 0.5, %v699_v9 }
 0x291   :  { %v576_v14 = vpop.xlane.xlu0 %575 }
 0x292   :  { %v701_v56 = vsub.f32 1.5, %v700_v12  ;;  %v604_v54 = vmul.f32 %v576_v14, %v2095_v20 }
 0x293   :  { %v1949_v10 = vpop.eup %1948 }
 0x294   :  { %v702_v21 = vmul.f32 %v1947_v62, %v701_v56  ;;  %v708_v16 = vmul.f32 %v1949_v10, %v619_v2  ;;  %v620_v26 = vadd.f32 1e-05, %v604_v54  ;;  %vm714_vm14 = vweird.f32 %v1949_v10 }
 0x295   :  { %vm715_vm1 = vmor %vm713_vm15, %vm714_vm14 }
 0x296   :  { %v582_v51 = vpop.xlane.xlu2 %581  ;;  %v706_v50 = vsel %vm705_vm13, %v1947_v62, %v702_v21  ;;  %v709_v24 = vmul.f32 %v1949_v10, %v708_v16  ;;  %1950 = vrsqrt.f32 %v620_v26  ;;  %vm723_vm3 = vweird.f32 %v620_v26 }
 0x297   :  { %v606_v19 = vmul.f32 %v582_v51, %v2095_v20  ;;  %v794_v5 = vmul.f32 %v706_v50, %v2510_v28 }
 0x298   :  { %v710_v29 = vmul.f32 0.5, %v709_v24 }
 0x299   :  { %v579_v15 = vpop.xlane.xlu1 %578  ;;  %v622_v49 = vadd.f32 1e-05, %v606_v19  ;;  %v813_v38 = vmul.f32 %v2531_v46, %v794_v5 }
 0x29a   :  { %v605_v30 = vmul.f32 %v579_v15, %v2095_v20  ;;  %v711_v44 = vsub.f32 1.5, %v710_v29  ;;  %v1878_v29 = vld [vmem:[%s3365_s7 + $0x28] sm:$0xff] }
 0x29b   :  { %1952 = vrsqrt.f32 %v622_v49  ;;  %v832_v47 = vadd.f32 %v2541_v55, %v813_v38  ;;  %vm743_vm6 = vweird.f32 %v622_v49 }
 0x29c   :  { %v2628_v6 = vadd.f32 1e-05, %v605_v30  ;;  %v1951_v28 = vpop.eup %1950  ;;  %v712_v25 = vmul.f32 %v1949_v10, %v711_v44 }
 0x29d   :  { %v844_v37 = vpack.c.bf16 %v832_v47, %v831_v31  ;;  %v718_v53 = vmul.f32 %v1951_v28, %v620_v26  ;;  %vm724_vm2 = vweird.f32 %v1951_v28 }
 0x29e   :  { %1954 = vrsqrt.f32 %v2628_v6  ;;  %v585_v33 = vpop.xlane.xlu0 %584  ;;  %v716_v43 = vsel %vm715_vm1, %v1949_v10, %v712_v25  ;;  %vm725_vm4 = vmor %vm723_vm3, %vm724_vm2  ;;  %vm733_vm7 = vweird.f32 %v2628_v6 }
 0x29f   :  { %v607_v41 = vmul.f32 %v585_v33, %v2095_v20  ;;  %1818 = vmatmul.msk.bf16.gmra.mxu0 %vm51_vm0, %v844_v37  ;;  %v719_v35 = vmul.f32 %v1951_v28, %v718_v53  ;;  %v795_v62 = vmul.f32 %v716_v43, %v2519_v8  ;;  %v1879_v8 = vld [vmem:[%s3365_s7 + $0x30] sm:$0xff] }
 0x2a0   :  { %1723 = vmatpush.bf16.msra.mxu1 %v1879_v8  ;;  %1884 = vmatpush.bf16.msra.mxu2 %v1879_v8 }
 0x2a1   :  { %v1953_v22 = vpop.eup %1952  ;;  %v2640_v42 = vadd.f32 1e-05, %v607_v41  ;;  %v720_v36 = vmul.f32 0.5, %v719_v35  ;;  %v814_v50 = vmul.f32 %v2531_v46, %v795_v62 }
 0x2a2   :  { %v738_v11 = vmul.f32 %v1953_v22, %v622_v49  ;;  %v902_v45 = vpop.f32.mrf.mxu0  ;;  %vm744_vm5 = vweird.f32 %v1953_v22 }
 0x2a3   :  { %v2643_v48 = vadd.f32 %v2636_v39, %v902_v45  ;;  %1956 = vrsqrt.f32 %v2640_v42  ;;  %v721_v52 = vsub.f32 1.5, %v720_v36  ;;  %vm745_vm9 = vmor %vm743_vm6, %vm744_vm5  ;;  %vm753_vm12 = vweird.f32 %v2640_v42 }
 0x2a4   :  { %v1955_v60 = vpop.eup %1954  ;;  %v739_v34 = vmul.f32 %v1953_v22, %v738_v11  ;;  %1724 = vmatpush.bf16.msra.mxu1 %v1878_v29  ;;  %1885 = vmatpush.bf16.msra.mxu2 %v1878_v29 }
 0x2a5   :  { %v728_v61 = vmul.f32 %v1955_v60, %v2628_v6  ;;  %v2648_v63 = vmul.f32 0.70710677, %v2643_v48  ;;  %v722_v2 = vmul.f32 %v1951_v28, %v721_v52  ;;  %vm734_vm8 = vweird.f32 %v1955_v60 }
 0x2a6   :  { %v740_v18 = vmul.f32 0.5, %v739_v34  ;;  %vm735_vm10 = vmor %vm733_vm7, %vm734_vm8 }
 0x2a7   :  { %v729_v1 = vmul.f32 %v1955_v60, %v728_v61  ;;  %v974_v59 = vmul.f32 %v2648_v63, %v2648_v63  ;;  %v588_v17 = vpop.xlane.xlu1 %587  ;;  %v726_v12 = vsel %vm725_vm4, %v1951_v28, %v722_v2 }
 0x2a8   :  { %v741_v57 = vsub.f32 1.5, %v740_v18  ;;  %v608_v56 = vmul.f32 %v588_v17, %v2095_v20  ;;  %v796_v10 = vmul.f32 %v726_v12, %v2535_v3  ;;  %v1876_v18 = vld [vmem:[%s3365_s7 + $0x18] sm:$0xff] }
 0x2a9   :  { %v730_v9 = vmul.f32 0.5, %v729_v1  ;;  %v2661_v14 = vpop.eup %1956  ;;  %v2666_v26 = vmin.f32 %v974_v59, 16.0 }
 0x2aa   :  { %v742_v40 = vmul.f32 %v1953_v22, %v741_v57  ;;  %v904_v21 = vpop.f32.mrf.mxu0  ;;  %v748_v16 = vmul.f32 %v2661_v14, %v2640_v42  ;;  %v2668_v51 = vadd.f32 1e-05, %v608_v56  ;;  %v815_v5 = vmul.f32 %v2531_v46, %v796_v10 }
 0x2ab   :  { %v731_v54 = vsub.f32 1.5, %v730_v9  ;;  %v2672_v3 = vadd.f32 %v2636_v39, %v904_v21  ;;  %v987_v28 = vmul.f32 3.8918573e-05, %v2666_v26  ;;  %v976_v45 = vmul.f32 2.1237322e-06, %v2666_v26 }
 0x2ac   :  { %v746_v24 = vsel %vm745_vm9, %v1953_v22, %v742_v40  ;;  %v749_v0 = vmul.f32 %v2661_v14, %v748_v16  ;;  %1958 = vrsqrt.f32 %v2668_v51  ;;  %v834_v6 = vadd.f32 %v2541_v55, %v815_v5 }
 0x2ad   :  { %v732_v19 = vmul.f32 %v1955_v60, %v731_v54  ;;  %v798_v15 = vmul.f32 %v746_v24, %v2549_v58  ;;  %v2684_v30 = vmul.f32 0.70710677, %v2672_v3  ;;  %v833_v58 = vadd.f32 %v2541_v55, %v814_v50 }
 0x2ae   :  { %v750_v44 = vmul.f32 0.5, %v749_v0  ;;  %v988_v61 = vadd.f32 0.001143296, %v987_v28  ;;  %vm754_vm11 = vweird.f32 %v2661_v14  ;;  %v977_v59 = vadd.f32 0.00028619796, %v976_v45 }
 0x2af   :  { %v736_v49 = vsel %vm735_vm10, %v1955_v60, %v732_v19  ;;  %v1014_v31 = vmul.f32 %v2684_v30, %v2684_v30  ;;  %v591_v47 = vpop.xlane.xlu2 %590  ;;  %v845_v53 = vpack.c.bf16 %v834_v6, %v833_v58  ;;  %v817_v33 = vmul.f32 %v2531_v46, %v798_v15  ;;  %vm2723_vm13 = vmor %vm753_vm12, %vm754_vm11 }
 0x2b0   :  { %v797_v38 = vmul.f32 %v736_v49, %v2556_v27  ;;  %v609_v37 = vmul.f32 %v591_v47, %v2095_v20  ;;  %v1877_v27 = vld [vmem:[%s3365_s7 + $0x20] sm:$0xff]  ;;  %v751_v25 = vsub.f32 1.5, %v750_v44  ;;  %v989_v56 = vmul.f32 %v988_v61, %v2666_v26 }
 0x2b1   :  { %v2697_v41 = vmin.f32 %v1014_v31, 16.0  ;;  %1819 = vmatmul.msk.bf16.gmra.mxu0 %vm51_vm0, %v845_v53  ;;  %1725 = vmatpush.bf16.msra.mxu1 %v1877_v27  ;;  %v836_v23 = vadd.f32 %v2541_v55, %v817_v33  ;;  %v978_v19 = vmul.f32 %v977_v59, %v2666_v26  ;;  %vm763_vm15 = vweird.f32 %v2668_v51 }
 0x2b2   :  { %v907_v22 = vpop.f32.mrf.mxu0  ;;  %v816_v35 = vmul.f32 %v2531_v46, %v797_v38  ;;  %v1959_v11 = vpop.eup %1958  ;;  %v2701_v60 = vadd.f32 1e-05, %v609_v37  ;;  %1886 = vmatpush.bf16.msra.mxu2 %v1877_v27  ;;  %v752_v1 = vmul.f32 %v2661_v14, %v751_v25  ;;  %v990_v50 = vadd.f32 0.014752088, %v989_v56  ;;  %v1874_v38 = vld [vmem:[%s3365_s7 + $0x8] sm:$0xff] }
 0x2b3   :  { %v2705_v36 = vadd.f32 %v2636_v39, %v907_v22  ;;  %v758_v43 = vmul.f32 %v1959_v11, %v2668_v51  ;;  %v1016_v52 = vmul.f32 2.1237322e-06, %v2697_v41  ;;  %vm764_vm14 = vweird.f32 %v1959_v11 }
 0x2b4   :  { %v835_v34 = vadd.f32 %v2541_v55, %v816_v35  ;;  %1960 = vrsqrt.f32 %v2701_v60  ;;  %v756_v42 = vsel %vm2723_vm13, %v2661_v14, %v752_v1  ;;  %vm765_vm1 = vmor %vm763_vm15, %vm764_vm14  ;;  %v991_v44 = vmul.f32 %v990_v50, %v2666_v26 }
 0x2b5   :  { %v759_v62 = vmul.f32 %v1959_v11, %v758_v43  ;;  %v2718_v57 = vmul.f32 0.70710677, %v2705_v36  ;;  %1726 = vmatpush.bf16.msra.mxu1 %v1876_v18  ;;  %v1017_v10 = vadd.f32 0.00028619796, %v1016_v52  ;;  %v799_v14 = vmul.f32 %v756_v42, %v2579_v4 }
 0x2b6   :  { %v846_v17 = vpack.c.bf16 %v836_v23, %v835_v34  ;;  %1887 = vmatpush.bf16.msra.mxu2 %v1876_v18  ;;  %v979_v6 = vadd.f32 0.0036580483, %v978_v19  ;;  %v992_v28 = vadd.f32 0.112945676, %v991_v44  ;;  %v1027_v37 = vmul.f32 3.8918573e-05, %v2697_v41 }
 0x2b7   :  { %v594_v2 = vpop.xlane.xlu0 %593  ;;  %v760_v12 = vmul.f32 0.5, %v759_v62  ;;  %v1054_v40 = vmul.f32 %v2718_v57, %v2718_v57  ;;  %v1018_v29 = vmul.f32 %v1017_v10, %v2697_v41  ;;  %v818_v25 = vmul.f32 %v2531_v46, %v799_v14 }
 0x2b8   :  { %v610_v9 = vmul.f32 %v594_v2, %v2095_v20  ;;  %1820 = vmatmul.msk.bf16.vlgmr.msra.gmra.mxu3 %vm51_vm0, %v846_v17  ;;  %v1875_v20 = vld [vmem:[%s3365_s7 + $0x10] sm:$0xff]  ;;  %v980_v43 = vmul.f32 %v979_v6, %v2666_v26  ;;  %v993_v23 = vmul.f32 %v992_v28, %v2666_v26  ;;  %v1028_v18 = vadd.f32 0.001143296, %v1027_v37 }
 0x2b9   :  { %v761_v21 = vsub.f32 1.5, %v760_v12  ;;  %v2741_v5 = vmin.f32 %v1054_v40, 16.0  ;;  %1727 = vmatpush.bf16.msra.mxu1 %v1875_v20  ;;  %v1019_v33 = vadd.f32 0.0036580483, %v1018_v29  ;;  %v837_v59 = vadd.f32 %v2541_v55, %v818_v25 }
 0x2ba   :  { %v2729_v54 = vadd.f32 1e-05, %v610_v9  ;;  %v909_v16 = vpop.f32.mrf.mxu0  ;;  %v2738_v24 = vpop.eup %1960  ;;  %1888 = vmatpush.bf16.msra.mxu2 %v1875_v20  ;;  %v981_v12 = vadd.f32 0.05243302, %v980_v43  ;;  %vm773_vm3 = vweird.f32 %v2701_v60  ;;  %v994_v40 = vadd.f32 0.4994258, %v993_v23 }
 0x2bb   :  { %v762_v15 = vmul.f32 %v1959_v11, %v761_v21  ;;  %v768_v0 = vmul.f32 %v2738_v24, %v2701_v60  ;;  %v2750_v49 = vadd.f32 %v2636_v39, %v909_v16  ;;  %v1056_v4 = vmul.f32 2.1237322e-06, %v2741_v5 }
 0x2bc   :  { %1962 = vrsqrt.f32 %v2729_v54  ;;  %v1020_v1 = vmul.f32 %v1019_v33, %v2697_v41  ;;  %vm774_vm2 = vweird.f32 %v2738_v24  ;;  %v1029_v20 = vmul.f32 %v1028_v18, %v2697_v41 }
 0x2bd   :  { %v766_v58 = vsel %vm765_vm1, %v1959_v11, %v762_v15  ;;  %v769_v51 = vmul.f32 %v2738_v24, %v768_v0  ;;  %1728 = vmatpush.bf16.msra.mxu1 %v1874_v38  ;;  %v2761_v27 = vmul.f32 0.70710677, %v2750_v49  ;;  %v1057_v34 = vadd.f32 0.00028619796, %v1056_v4  ;;  %vm2784_vm5 = vmor %vm773_vm3, %vm774_vm2 }
 0x2be   :  { %v800_v31 = vmul.f32 %v766_v58, %v2590_v7  ;;  %1889 = vmatpush.bf16.msra.mxu2 %v1874_v38  ;;  %v1873_v7 = vld [vmem:[%s3365_s7] sm:$0xff]  ;;  %v1021_v42 = vadd.f32 0.05243302, %v1020_v1  ;;  %vm783_vm6 = vweird.f32 %v2729_v54  ;;  %v995_v0 = vmul.f32 %v994_v40, %v2666_v26 }
 0x2bf   :  { %v770_v47 = vmul.f32 0.5, %v769_v51  ;;  %v1094_v62 = vmul.f32 %v2761_v27, %v2761_v27  ;;  %v1058_v56 = vmul.f32 %v1057_v34, %v2741_v5  ;;  %v1030_v14 = vadd.f32 0.014752088, %v1029_v20 }
 0x2c0   :  { %v819_v22 = vmul.f32 %v2531_v46, %v800_v31  ;;  %v982_v29 = vmul.f32 %v981_v12, %v2666_v26  ;;  %v1067_v38 = vmul.f32 3.8918573e-05, %v2741_v5  ;;  %v2805_v51 = vadd.f32 1.0, %v995_v0 }
 0x2c1   :  { %v771_v35 = vsub.f32 1.5, %v770_v47  ;;  %1729 = vmatpush.bf16.msra.mxu1 %v1873_v7  ;;  %v2789_v16 = vmin.f32 %v1094_v62, 16.0  ;;  %v1059_v44 = vadd.f32 0.0036580483, %v1058_v56  ;;  %v1022_v28 = vmul.f32 %v1021_v42, %v2697_v41 }
 0x2c2   :  { %v1963_v53 = vpop.eup %1962  ;;  %v912_v45 = vpop.f32.mrf.mxu0  ;;  %v838_v61 = vadd.f32 %v2541_v55, %v819_v22  ;;  %1890 = vmatpush.bf16.msra.mxu2 %v1873_v7  ;;  %1964 = vrcp.f32 %v2805_v51  ;;  %v1068_v33 = vadd.f32 0.001143296, %v1067_v38  ;;  %v983_v25 = vadd.f32 0.18741608, %v982_v29 }
 0x2c3   :  { %v778_v11 = vmul.f32 %v1963_v53, %v2729_v54  ;;  %v2776_v2 = vadd.f32 %v2636_v39, %v912_v45  ;;  %v772_v9 = vmul.f32 %v2738_v24, %v771_v35  ;;  %vm784_vm4 = vweird.f32 %v1963_v53 }
 0x2c4   :  { %v847_v8 = vpack.c.bf16 %v838_v61, %v837_v59  ;;  %vm785_vm7 = vmor %vm783_vm6, %vm784_vm4  ;;  %v1096_v4 = vmul.f32 2.1237322e-06, %v2789_v16  ;;  %v1069_v61 = vmul.f32 %v1068_v33, %v2741_v5  ;;  %v984_v23 = vmul.f32 %v983_v25, %v2666_v26 }
 0x2c5   :  { %v779_v52 = vmul.f32 %v1963_v53, %v778_v11  ;;  %v2792_v50 = vmul.f32 0.70710677, %v2776_v2  ;;  %v776_v60 = vsel %vm2784_vm5, %v2738_v24, %v772_v9  ;;  %v1031_v24 = vmul.f32 %v1030_v14, %v2697_v41 }
 0x2c6   :  { %v801_v6 = vmul.f32 %v776_v60, %v2600_v32  ;;  %v1060_v32 = vmul.f32 %v1059_v44, %v2741_v5  ;;  %v1023_v11 = vadd.f32 0.18741608, %v1022_v28  ;;  %v1107_v62 = vmul.f32 3.8918573e-05, %v2789_v16 }
 0x2c7   :  { %v780_v17 = vmul.f32 0.5, %v779_v52  ;;  %v1134_v47 = vmul.f32 %v2792_v50, %v2792_v50  ;;  %v1032_v22 = vadd.f32 0.112945676, %v1031_v24  ;;  %v1008_v29 = vand.u32 2147483648, %v2805_v51 }
 0x2c8   :  { %1821 = vmatmul.msk.bf16.gmra.mxu3 %vm51_vm0, %v847_v8  ;;  %v820_v35 = vmul.f32 %v2531_v46, %v801_v6  ;;  %v1965_v52 = vpop.eup %1964  ;;  %v1061_v18 = vadd.f32 0.05243302, %v1060_v32  ;;  %v1024_v12 = vmul.f32 %v1023_v11, %v2697_v41  ;;  %v1070_v8 = vadd.f32 0.014752088, %v1069_v61 }
 0x2c9   :  { %v781_v10 = vsub.f32 1.5, %v780_v17  ;;  %v2820_v7 = vmin.f32 %v1134_v47, 16.0  ;;  %v1033_v45 = vmul.f32 %v1032_v22, %v2697_v41  ;;  %v998_v17 = vmul.f32 %v1965_v52, %v2805_v51 }
 0x2ca   :  { %v914_v15 = vpop.f32.mrf.mxu0  ;;  %v839_v9 = vadd.f32 %v2541_v55, %v820_v35  ;;  %v1062_v21 = vmul.f32 %v1061_v18, %v2741_v5  ;;  %vm1003_vm8 = vweird.f32 %v1965_v52  ;;  %v985_v38 = vadd.f32 1.1283791, %v984_v23 }
 0x2cb   :  { %v782_v19 = vmul.f32 %v1963_v53, %v781_v10  ;;  %v2802_v54 = vadd.f32 %v2636_v39, %v914_v15  ;;  %v1034_v1 = vadd.f32 0.4994258, %v1033_v45  ;;  %v1108_v10 = vadd.f32 0.001143296, %v1107_v62 }
 0x2cc   :  { %v999_v20 = vsub.f32 1.0, %v998_v17  ;;  %v1147_v42 = vmul.f32 3.8918573e-05, %v2820_v7  ;;  %v1025_v44 = vadd.f32 1.1283791, %v1024_v12  ;;  %vm1002_vm9 = vweird.f32 %v2805_v51 }
 0x2cd   :  { %v786_v58 = vsel %vm785_vm7, %v1963_v53, %v782_v19  ;;  %v2816_v37 = vmul.f32 0.70710677, %v2802_v54  ;;  %v1035_v56 = vmul.f32 %v1034_v1, %v2697_v41  ;;  %v1109_v19 = vmul.f32 %v1108_v10, %v2789_v16  ;;  %vm2852_vm10 = vmor %vm1002_vm9, %vm1003_vm8 }
 0x2ce   :  { %v802_v31 = vmul.f32 %v786_v58, %v2609_v13  ;;  %v1097_v13 = vadd.f32 0.00028619796, %v1096_v4  ;;  %v1000_v41 = vmul.f32 %v1965_v52, %v999_v20  ;;  %v1148_v14 = vadd.f32 0.001143296, %v1147_v42 }
 0x2cf   :  { %v1174_v43 = vmul.f32 %v2816_v37, %v2816_v37  ;;  %v2840_v60 = vadd.f32 1.0, %v1035_v56  ;;  %v1006_v6 = vand.u32 2147483647, %v2805_v51  ;;  %v1110_v4 = vadd.f32 0.014752088, %v1109_v19 }
 0x2d0   :  { %v821_v53 = vmul.f32 %v2531_v46, %v802_v31  ;;  %v1098_v59 = vmul.f32 %v1097_v13, %v2789_v16  ;;  %v1136_v46 = vmul.f32 2.1237322e-06, %v2820_v7  ;;  %v1001_v24 = vadd.f32 %v1965_v52, %v1000_v41 }
 0x2d1   :  { %v2836_v40 = vmin.f32 %v1174_v43, 16.0  ;;  %1966 = vrcp.f32 %v2840_v60  ;;  %v1063_v47 = vadd.f32 0.18741608, %v1062_v21  ;;  %v1149_v25 = vmul.f32 %v1148_v14, %v2820_v7 }
 0x2d2   :  { %v840_v34 = vadd.f32 %v2541_v55, %v821_v53  ;;  %v1071_v55 = vmul.f32 %v1070_v8, %v2741_v5  ;;  %v1099_v15 = vadd.f32 0.0036580483, %v1098_v59  ;;  %v1137_v0 = vadd.f32 0.00028619796, %v1136_v46 }
 0x2d3   :  { %v1176_v58 = vmul.f32 2.1237322e-06, %v2836_v40  ;;  %v1005_v32 = vsel %vm2852_vm10, %v1965_v52, %v1001_v24  ;;  %v1009_v22 = vor.u32 1.1754944e-38, %v1008_v29  ;;  %v1111_v51 = vmul.f32 %v1110_v4, %v2789_v16 }
 0x2d4   :  { %v848_v26 = vpack.c.bf16 %v840_v34, %v839_v9  ;;  %v1072_v31 = vadd.f32 0.112945676, %v1071_v55  ;;  %v1100_v28 = vmul.f32 %v1099_v15, %v2789_v16  ;;  %v1138_v53 = vmul.f32 %v1137_v0, %v2820_v7 }
 0x2d5   :  { %v986_v35 = vmul.f32 %v985_v38, %v2648_v63  ;;  %v1177_v11 = vadd.f32 0.00028619796, %v1176_v58  ;;  %v1150_v45 = vadd.f32 0.014752088, %v1149_v25  ;;  %v1187_v43 = vmul.f32 3.8918573e-05, %v2836_v40 }
 0x2d6   :  { %v1073_v13 = vmul.f32 %v1072_v31, %v2741_v5  ;;  %v1026_v61 = vmul.f32 %v1025_v44, %v2684_v30  ;;  %vm1007_vm11 = vcmp.eq.f32.partialorder %v1006_v6, 8.507059e+37  ;;  %v1112_v18 = vadd.f32 0.112945676, %v1111_v51 }
 0x2d7   :  { %v1967_v34 = vpop.eup %1966  ;;  %v1101_v1 = vadd.f32 0.05243302, %v1100_v28  ;;  %v1010_v62 = vsel %vm1007_vm11, %v1009_v22, %v1005_v32  ;;  %v1151_v59 = vmul.f32 %v1150_v45, %v2820_v7  ;;  %v1139_v46 = vadd.f32 0.0036580483, %v1138_v53 }
 0x2d8   :  { %1822 = vmatmul.msk.bf16.gmra.mxu3 %vm51_vm0, %v848_v26  ;;  %v1074_v23 = vadd.f32 0.4994258, %v1073_v13  ;;  %v1038_v52 = vmul.f32 %v1967_v34, %v2840_v60  ;;  %v1113_v63 = vmul.f32 %v1112_v18, %v2789_v16  ;;  %v1188_v17 = vadd.f32 0.001143296, %v1187_v43 }
 0x2d9   :  { %v1178_v12 = vmul.f32 %v1177_v11, %v2836_v40  ;;  %v1048_v30 = vand.u32 2147483648, %v2840_v60  ;;  %v1152_v8 = vadd.f32 0.112945676, %v1151_v59  ;;  %v1011_v10 = vmul.f32 %v1010_v62, %v986_v35 }
 0x2da   :  { %v1075_v9 = vmul.f32 %v1074_v23, %v2741_v5  ;;  %v1039_v56 = vsub.f32 1.0, %v1038_v52  ;;  %v1114_v20 = vadd.f32 0.4994258, %v1113_v63  ;;  %v1189_v42 = vmul.f32 %v1188_v17, %v2836_v40 }
 0x2db   :  { %vm1043_vm12 = vweird.f32 %v1967_v34  ;;  %v1046_v55 = vand.u32 2147483647, %v2840_v60  ;;  %v1153_v19 = vmul.f32 %v1152_v8, %v2820_v7  ;;  %v1064_v15 = vmul.f32 %v1063_v47, %v2741_v5 }
 0x2dc   :  { %v2870_v26 = vadd.f32 1.0, %v1075_v9  ;;  %v1040_v21 = vmul.f32 %v1967_v34, %v1039_v56  ;;  %v1102_v0 = vmul.f32 %v1101_v1, %v2789_v16  ;;  %v1140_v41 = vmul.f32 %v1139_v46, %v2820_v7 }
 0x2dd   :  { %vm1042_vm13 = vweird.f32 %v2840_v60  ;;  %v1115_v29 = vmul.f32 %v1114_v20, %v2789_v16  ;;  %v1154_v38 = vadd.f32 0.4994258, %v1153_v19  ;;  %v1179_v44 = vadd.f32 0.0036580483, %v1178_v12 }
 0x2de   :  { %1968 = vrcp.f32 %v2870_v26  ;;  %v1041_v14 = vadd.f32 %v1967_v34, %v1040_v21  ;;  %v1823_v58 = vclamps-f32 %v1011_v10, 1.0  ;;  %vm1044_vm14 = vmor %vm1042_vm13, %vm1043_vm12  ;;  %v1049_v24 = vor.u32 1.1754944e-38, %v1048_v30 }
 0x2df   :  { %v1190_v6 = vadd.f32 0.014752088, %v1189_v42  ;;  %vm1047_vm15 = vcmp.eq.f32.partialorder %v1046_v55, 8.507059e+37  ;;  %v2881_v5 = vadd.f32 1.0, %v1115_v29  ;;  %v1155_v4 = vmul.f32 %v1154_v38, %v2820_v7 }
 0x2e0   :  { %v1045_v31 = vsel %vm1044_vm14, %v1967_v34, %v1041_v14  ;;  %v1103_v47 = vadd.f32 0.18741608, %v1102_v0  ;;  %v1141_v28 = vadd.f32 0.05243302, %v1140_v41  ;;  %v1180_v32 = vmul.f32 %v1179_v44, %v2836_v40 }
 0x2e1   :  { %v1050_v53 = vsel %vm1047_vm15, %v1049_v24, %v1045_v31  ;;  %v1191_v33 = vmul.f32 %v1190_v6, %v2836_v40  ;;  %1970 = vrcp.f32 %v2881_v5  ;;  %v1614_v22 = vadd.f32 1.0, %v1823_v58 }
 0x2e2   :  { %v1051_v60 = vmul.f32 %v1050_v53, %v1026_v61  ;;  %v2887_v13 = vadd.f32 1.0, %v1155_v4  ;;  %v942_v35 = vmul.f32 0.5, %v2643_v48  ;;  %v1065_v43 = vadd.f32 1.1283791, %v1064_v15 }
 0x2e3   :  { %v1192_v51 = vadd.f32 0.112945676, %v1191_v33  ;;  %v1104_v34 = vmul.f32 %v1103_v47, %v2789_v16  ;;  %v1142_v23 = vmul.f32 %v1141_v28, %v2820_v7  ;;  %v943_v61 = vmul.f32 0.5, %v2672_v3 }
 0x2e4   :  { %v1969_v25 = vpop.eup %1968  ;;  %v1824_v11 = vclamps-f32 %v1051_v60, 1.0  ;;  %1972 = vrcp.f32 %v2887_v13  ;;  %v1181_v52 = vadd.f32 0.05243302, %v1180_v32  ;;  %v1630_v59 = vmul.f32 %v1614_v22, %v942_v35 }
 0x2e5   :  { %v1078_v45 = vmul.f32 %v1969_v25, %v2870_v26  ;;  %v1193_v62 = vmul.f32 %v1192_v51, %v2836_v40  ;;  %v1086_v48 = vand.u32 2147483647, %v2870_v26  ;;  %v1088_v46 = vand.u32 2147483648, %v2870_v26 }
 0x2e6   :  { %v1615_v18 = vadd.f32 1.0, %v1824_v11  ;;  %vm1083_vm1 = vweird.f32 %v1969_v25  ;;  %v1066_v12 = vmul.f32 %v1065_v43, %v2718_v57  ;;  %v1105_v56 = vadd.f32 1.1283791, %v1104_v34 }
 0x2e7   :  { %v1079_v1 = vsub.f32 1.0, %v1078_v45  ;;  %v1971_v9 = vpop.eup %1970  ;;  %v1194_v16 = vadd.f32 0.4994258, %v1193_v62  ;;  %v1143_v30 = vadd.f32 0.18741608, %v1142_v23  ;;  %vm1082_vm2 = vweird.f32 %v2870_v26 }
 0x2e8   :  { %v1631_v63 = vmul.f32 %v1615_v18, %v943_v61  ;;  %v1118_v3 = vmul.f32 %v1971_v9, %v2881_v5  ;;  %v1182_v21 = vmul.f32 %v1181_v52, %v2836_v40  ;;  %vm1084_vm3 = vmor %vm1082_vm2, %vm1083_vm1  ;;  %vm1087_vm4 = vcmp.eq.f32.partialorder %v1086_v48, 8.507059e+37 }
 0x2e9   :  { %v1080_v17 = vmul.f32 %v1969_v25, %v1079_v1  ;;  %v1195_v20 = vmul.f32 %v1194_v16, %v2836_v40  ;;  %v1089_v55 = vor.u32 1.1754944e-38, %v1088_v46  ;;  %v1128_v57 = vand.u32 2147483648, %v2881_v5 }
 0x2ea   :  { %v1646_v8 = vpack.c.bf16 %v1631_v63, %v1630_v59  ;;  %v1973_v42 = vpop.eup %1972  ;;  %v1119_v19 = vsub.f32 1.0, %v1118_v3  ;;  %vm1123_vm5 = vweird.f32 %v1971_v9  ;;  %v1126_v26 = vand.u32 2147483647, %v2881_v5 }
 0x2eb   :  { %v1081_v10 = vadd.f32 %v1969_v25, %v1080_v17  ;;  %v1158_v0 = vmul.f32 %v1973_v42, %v2887_v13  ;;  %v1196_v41 = vadd.f32 1.0, %v1195_v20  ;;  %v1144_v58 = vmul.f32 %v1143_v30, %v2820_v7 }
 0x2ec   :  { %1730 = vmatmul.bf16.vlgmr.msra.gmra.mxu1 %v1646_v8  ;;  %v1120_v29 = vmul.f32 %v1971_v9, %v1119_v19  ;;  %vm1122_vm6 = vweird.f32 %v2881_v5  ;;  %v1106_v6 = vmul.f32 %v1105_v56, %v2761_v27  ;;  %v1183_v31 = vadd.f32 0.18741608, %v1182_v21 }
 0x2ed   :  { %v1085_v15 = vsel %vm1084_vm3, %v1969_v25, %v1081_v10  ;;  %v1159_v44 = vsub.f32 1.0, %v1158_v0  ;;  %1974 = vrcp.f32 %v1196_v41  ;;  %vm1124_vm7 = vmor %vm1122_vm6, %vm1123_vm5  ;;  %v1129_v4 = vor.u32 1.1754944e-38, %v1128_v57 }
 0x2ee   :  { %v1090_v14 = vsel %vm1087_vm4, %v1089_v55, %v1085_v15  ;;  %v1121_v24 = vadd.f32 %v1971_v9, %v1120_v29  ;;  %vm1127_vm8 = vcmp.eq.f32.partialorder %v1126_v26, 8.507059e+37  ;;  %vm1163_vm9 = vweird.f32 %v1973_v42 }
 0x2ef   :  { %v1091_v38 = vmul.f32 %v1090_v14, %v1066_v12  ;;  %v1160_v47 = vmul.f32 %v1973_v42, %v1159_v44  ;;  %v1168_v25 = vand.u32 2147483648, %v2887_v13  ;;  %v1145_v32 = vadd.f32 1.1283791, %v1144_v58 }
 0x2f0   :  { %v1125_v53 = vsel %vm1124_vm7, %v1971_v9, %v1121_v24  ;;  %vm1162_vm10 = vweird.f32 %v2887_v13  ;;  %v1166_v7 = vand.u32 2147483647, %v2887_v13  ;;  %v1184_v27 = vmul.f32 %v1183_v31, %v2836_v40 }
 0x2f1   :  { %v1825_v28 = vclamps-f32 %v1091_v38, 1.0  ;;  %v1130_v33 = vsel %vm1127_vm8, %v1129_v4, %v1125_v53  ;;  %v1161_v60 = vadd.f32 %v1973_v42, %v1160_v47  ;;  %vm1164_vm11 = vmor %vm1162_vm10, %vm1163_vm9  ;;  %v944_v43 = vmul.f32 0.5, %v2705_v36 }
 0x2f2   :  { %v1131_v22 = vmul.f32 %v1130_v33, %v1106_v6  ;;  %v945_v34 = vmul.f32 0.5, %v2750_v49  ;;  %v1169_v23 = vor.u32 1.1754944e-38, %v1168_v25  ;;  %v1146_v61 = vmul.f32 %v1145_v32, %v2792_v50 }
 0x2f3   :  { %v1975_v5 = vpop.eup %1974  ;;  %v1616_v35 = vadd.f32 1.0, %v1825_v28  ;;  %v1165_v11 = vsel %vm1164_vm11, %v1973_v42, %v1161_v60  ;;  %vm1167_vm12 = vcmp.eq.f32.partialorder %v1166_v7, 8.507059e+37  ;;  %v1185_v62 = vadd.f32 1.1283791, %v1184_v27 }
 0x2f4   :  { %v1826_v51 = vclamps-f32 %v1131_v22, 1.0  ;;  %v1198_v45 = vmul.f32 %v1975_v5, %v1196_v41  ;;  %v1170_v13 = vsel %vm1167_vm12, %v1169_v23, %v1165_v11  ;;  %v1206_v52 = vand.u32 2147483647, %v1196_v41 }
 0x2f5   :  { %v1208_v59 = vand.u32 2147483648, %v1196_v41  ;;  %v1632_v40 = vmul.f32 %v1616_v35, %v944_v43  ;;  %vm1203_vm13 = vweird.f32 %v1975_v5  ;;  %v1171_v63 = vmul.f32 %v1170_v13, %v1146_v61 }
 0x2f6   :  { %v1617_v18 = vadd.f32 1.0, %v1826_v51  ;;  %v1199_v1 = vsub.f32 1.0, %v1198_v45  ;;  %vm1202_vm14 = vweird.f32 %v1196_v41  ;;  %v1186_v49 = vmul.f32 %v1185_v62, %v2816_v37 }
 0x2f7   :  { %vm1204_vm15 = vmor %vm1202_vm14, %vm1203_vm13  ;;  %v1209_v36 = vor.u32 1.1754944e-38, %v1208_v59  ;;  %vm1207_vm1 = vcmp.eq.f32.partialorder %v1206_v52, 8.507059e+37  ;;  %v1827_v12 = vclamps-f32 %v1171_v63, 1.0  ;;  %v947_v3 = vmul.f32 0.5, %v2802_v54 }
 0x2f8   :  { %v1633_v48 = vmul.f32 %v1617_v18, %v945_v34  ;;  %v1200_v46 = vmul.f32 %v1975_v5, %v1199_v1  ;;  %v946_v20 = vmul.f32 0.5, %v2776_v2 }
 0x2f9   :  { %v1618_v8 = vadd.f32 1.0, %v1827_v12 }
 0x2fa   :  { %v1647_v9 = vpack.c.bf16 %v1633_v48, %v1632_v40  ;;  %v1201_v17 = vadd.f32 %v1975_v5, %v1200_v46 }
 0x2fb   :  { %v1634_v21 = vmul.f32 %v1618_v8, %v946_v20 }
 0x2fc   :  { %1735 = vmatmul.bf16.gmra.mxu1 %v1647_v9  ;;  %v1205_v50 = vsel %vm1204_vm15, %v1975_v5, %v1201_v17 }
 0x2fd   :  { %v1210_v16 = vsel %vm1207_vm1, %v1209_v36, %v1205_v50 }
 0x2fe   :  { %v1211_v56 = vmul.f32 %v1210_v16, %v1186_v49 }
 0x300   :  { %v1828_v30 = vclamps-f32 %v1211_v56, 1.0 }
 0x302   :  { %v1619_v10 = vadd.f32 1.0, %v1828_v30 }
 0x304   :  { %v1635_v42 = vmul.f32 %v1619_v10, %v947_v3 }
 0x306   :  { %v1648_v55 = vpack.c.bf16 %v1635_v42, %v1634_v21 }
 0x30c   :  { %1740 = vmatmul.bf16.gmra.mxu1 %v1648_v55 }
 0x31c   :  { %v917_v19 = vpop.f32.mrf.mxu0 }
 0x31d   :  { %v2920_v37 = vadd.f32 %v2636_v39, %v917_v19 }
 0x31f   :  { %v2923_v15 = vmul.f32 0.70710677, %v2920_v37 }
 0x321   :  { %v1214_v57 = vmul.f32 %v2923_v15, %v2923_v15 }
 0x323   :  { %v1215_v0 = vmin.f32 %v1214_v57, 16.0 }
 0x324   :  { %v919_v54 = vpop.f32.mrf.mxu0 }
 0x325   :  { %v1216_v41 = vmul.f32 2.1237322e-06, %v1215_v0  ;;  %v2928_v14 = vadd.f32 %v2636_v39, %v919_v54  ;;  %v1227_v2 = vmul.f32 3.8918573e-05, %v1215_v0 }
 0x327   :  { %v1217_v29 = vadd.f32 0.00028619796, %v1216_v41  ;;  %v2931_v26 = vmul.f32 0.70710677, %v2928_v14  ;;  %v1228_v38 = vadd.f32 0.001143296, %v1227_v2 }
 0x329   :  { %v1254_v44 = vmul.f32 %v2931_v26, %v2931_v26  ;;  %v1218_v58 = vmul.f32 %v1217_v29, %v1215_v0  ;;  %v1229_v24 = vmul.f32 %v1228_v38, %v1215_v0 }
 0x32b   :  { %v2935_v6 = vmin.f32 %v1254_v44, 16.0  ;;  %v1230_v31 = vadd.f32 0.014752088, %v1229_v24  ;;  %v1219_v28 = vadd.f32 0.0036580483, %v1218_v58 }
 0x32d   :  { %v1256_v4 = vmul.f32 2.1237322e-06, %v2935_v6  ;;  %v1267_v47 = vmul.f32 3.8918573e-05, %v2935_v6  ;;  %v1231_v53 = vmul.f32 %v1230_v31, %v1215_v0  ;;  %v1220_v27 = vmul.f32 %v1219_v28, %v1215_v0 }
 0x32e   :  { %v922_v60 = vpop.f32.mrf.mxu0 }
 0x32f   :  { %v1257_v33 = vadd.f32 0.00028619796, %v1256_v4  ;;  %v1268_v25 = vadd.f32 0.001143296, %v1267_v47  ;;  %v2940_v32 = vadd.f32 %v2636_v39, %v922_v60  ;;  %v1232_v22 = vadd.f32 0.112945676, %v1231_v53 }
 0x330   :  { %v1221_v61 = vadd.f32 0.05243302, %v1220_v27 }
 0x331   :  { %v1258_v7 = vmul.f32 %v1257_v33, %v2935_v6  ;;  %v1269_v5 = vmul.f32 %v1268_v25, %v2935_v6  ;;  %v2945_v51 = vmul.f32 0.70710677, %v2940_v32  ;;  %v1233_v35 = vmul.f32 %v1232_v22, %v1215_v0 }
 0x332   :  { %v1222_v9 = vmul.f32 %v1221_v61, %v1215_v0 }
 0x333   :  { %v1270_v11 = vadd.f32 0.014752088, %v1269_v5  ;;  %v1259_v45 = vadd.f32 0.0036580483, %v1258_v7  ;;  %v1294_v43 = vmul.f32 %v2945_v51, %v2945_v51  ;;  %v1234_v34 = vadd.f32 0.4994258, %v1233_v35 }
 0x334   :  { %v1223_v56 = vadd.f32 0.18741608, %v1222_v9 }
 0x335   :  { %v1271_v23 = vmul.f32 %v1270_v11, %v2935_v6  ;;  %v2950_v18 = vmin.f32 %v1294_v43, 16.0  ;;  %v1235_v1 = vmul.f32 %v1234_v34, %v1215_v0  ;;  %v1260_v52 = vmul.f32 %v1259_v45, %v2935_v6 }
 0x336   :  { %v924_v62 = vpop.f32.mrf.mxu0  ;;  %v1224_v54 = vmul.f32 %v1223_v56, %v1215_v0 }
 0x337   :  { %v1272_v13 = vadd.f32 0.112945676, %v1271_v23  ;;  %v2954_v59 = vadd.f32 %v2636_v39, %v924_v62  ;;  %v1236_v40 = vadd.f32 1.0, %v1235_v1  ;;  %v1307_v46 = vmul.f32 3.8918573e-05, %v2950_v18 }
 0x338   :  { %v1261_v36 = vadd.f32 0.05243302, %v1260_v52  ;;  %v1296_v3 = vmul.f32 2.1237322e-06, %v2950_v18  ;;  %v1225_v28 = vadd.f32 1.1283791, %v1224_v54 }
 0x339   :  { %v1273_v48 = vmul.f32 %v1272_v13, %v2935_v6  ;;  %v2959_v63 = vmul.f32 0.70710677, %v2954_v59  ;;  %1976 = vrcp.f32 %v1236_v40  ;;  %v1308_v12 = vadd.f32 0.001143296, %v1307_v46 }
 0x33a   :  { %v1262_v20 = vmul.f32 %v1261_v36, %v2935_v6  ;;  %v1297_v2 = vadd.f32 0.00028619796, %v1296_v3  ;;  %vm1242_vm3 = vweird.f32 %v1236_v40  ;;  %v1248_v0 = vand.u32 2147483648, %v1236_v40 }
 0x33b   :  { %v927_v17 = vpop.f32.mrf.mxu3  ;;  %v1334_v49 = vmul.f32 %v2959_v63, %v2959_v63  ;;  %v1274_v16 = vadd.f32 0.4994258, %v1273_v48  ;;  %v1309_v57 = vmul.f32 %v1308_v12, %v2950_v18  ;;  %v1246_v22 = vand.u32 2147483647, %v1236_v40 }
 0x33c   :  { %v2964_v50 = vadd.f32 %v2636_v39, %v927_v17  ;;  %v1263_v44 = vadd.f32 0.18741608, %v1262_v20  ;;  %v1298_v33 = vmul.f32 %v1297_v2, %v2950_v18  ;;  %v1226_v34 = vmul.f32 %v1225_v28, %v2923_v15 }
 0x33d   :  { %v1275_v8 = vmul.f32 %v1274_v16, %v2935_v6  ;;  %v2972_v42 = vmin.f32 %v1334_v49, 16.0  ;;  %v1310_v47 = vadd.f32 0.014752088, %v1309_v57  ;;  %v1249_v23 = vor.u32 1.1754944e-38, %v1248_v0 }
 0x33e   :  { %v2967_v30 = vmul.f32 0.70710677, %v2964_v50  ;;  %vm1247_vm5 = vcmp.eq.f32.partialorder %v1246_v22, 8.507059e+37 }
 0x33f   :  { %v1977_v10 = vpop.eup %1976  ;;  %v2976_v19 = vadd.f32 1.0, %v1275_v8  ;;  %v1336_v58 = vmul.f32 2.1237322e-06, %v2972_v42  ;;  %v1347_v53 = vmul.f32 3.8918573e-05, %v2972_v42  ;;  %v1311_v43 = vmul.f32 %v1310_v47, %v2950_v18 }
 0x340   :  { %v1374_v21 = vmul.f32 %v2967_v30, %v2967_v30  ;;  %v1238_v55 = vmul.f32 %v1977_v10, %v1236_v40  ;;  %vm1243_vm2 = vweird.f32 %v1977_v10  ;;  %v3009_v40 = vld [vmem:[%s3364_s6] ss:$0 sm:$0xff] }
 0x341   :  { %1978 = vrcp.f32 %v2976_v19  ;;  %v1337_v7 = vadd.f32 0.00028619796, %v1336_v58  ;;  %vm2993_vm4 = vmor %vm1242_vm3, %vm1243_vm2  ;;  %v1348_v61 = vadd.f32 0.001143296, %v1347_v53  ;;  %v1286_v15 = vand.u32 2147483647, %v2976_v19 }
 0x342   :  { %v2979_v41 = vmin.f32 %v1374_v21, 16.0  ;;  %v1239_v38 = vsub.f32 1.0, %v1238_v55  ;;  %v1312_v49 = vadd.f32 0.112945676, %v1311_v43  ;;  %v1288_v12 = vand.u32 2147483648, %v2976_v19 }
 0x343   :  { %v929_v29 = vpop.f32.mrf.mxu3  ;;  %v1338_v9 = vmul.f32 %v1337_v7, %v2972_v42  ;;  %v1349_v56 = vmul.f32 %v1348_v61, %v2972_v42  ;;  %vm1282_vm7 = vweird.f32 %v2976_v19  ;;  %vm1287_vm9 = vcmp.eq.f32.partialorder %v1286_v15, 8.507059e+37 }
 0x344   :  { %v2984_v24 = vadd.f32 %v2636_v39, %v929_v29  ;;  %v1376_v31 = vmul.f32 2.1237322e-06, %v2979_v41  ;;  %v1240_v4 = vmul.f32 %v1977_v10, %v1239_v38  ;;  %v1264_v39 = vmul.f32 %v1263_v44, %v2935_v6 }
 0x345   :  { %v1299_v6 = vadd.f32 0.0036580483, %v1298_v33  ;;  %v1387_v3 = vmul.f32 3.8918573e-05, %v2979_v41  ;;  %v1313_v57 = vmul.f32 %v1312_v49, %v2950_v18  ;;  %v1350_v54 = vadd.f32 0.014752088, %v1349_v56 }
 0x346   :  { %v2990_v60 = vmul.f32 0.70710677, %v2984_v24  ;;  %v1241_v25 = vadd.f32 %v1977_v10, %v1240_v4  ;;  %v1377_v35 = vadd.f32 0.00028619796, %v1376_v31  ;;  %v1265_v52 = vadd.f32 1.1283791, %v1264_v39 }
 0x347   :  { %v1979_v27 = vpop.eup %1978  ;;  %v1300_v55 = vmul.f32 %v1299_v6, %v2950_v18  ;;  %v1339_v2 = vadd.f32 0.0036580483, %v1338_v9  ;;  %v1289_v31 = vor.u32 1.1754944e-38, %v1288_v12  ;;  %v1314_v4 = vadd.f32 0.4994258, %v1313_v57 }
 0x348   :  { %v1414_v11 = vmul.f32 %v2990_v60, %v2990_v60  ;;  %v1245_v45 = vsel %vm2993_vm4, %v1977_v10, %v1241_v25  ;;  %v1278_v13 = vmul.f32 %v1979_v27, %v2976_v19  ;;  %v1378_v17 = vmul.f32 %v1377_v35, %v2979_v41 }
 0x349   :  { %v1250_v46 = vsel %vm1247_vm5, %v1249_v23, %v1245_v45  ;;  %vm1283_vm6 = vweird.f32 %v1979_v27  ;;  %v1266_v21 = vmul.f32 %v1265_v52, %v2931_v26  ;;  %v1388_v0 = vadd.f32 0.001143296, %v1387_v3 }
 0x34a   :  { %v3003_v1 = vmin.f32 %v1414_v11, 16.0  ;;  %v1279_v36 = vsub.f32 1.0, %v1278_v13  ;;  %v1251_v10 = vmul.f32 %v1250_v46, %v1226_v34  ;;  %v1379_v29 = vadd.f32 0.0036580483, %v1378_v17  ;;  %vm1284_vm8 = vmor %vm1282_vm7, %vm1283_vm6 }
 0x34b   :  { %v932_v62 = vpop.f32.mrf.mxu3  ;;  %v1301_v53 = vadd.f32 0.05243302, %v1300_v55  ;;  %v1351_v22 = vmul.f32 %v1350_v54, %v2972_v42  ;;  %v1340_v19 = vmul.f32 %v1339_v2, %v2972_v42  ;;  %v1315_v5 = vmul.f32 %v1314_v4, %v2950_v18 }
 0x34c   :  { %v3012_v48 = vadd.f32 %v3009_v40, %v932_v62  ;;  %v1416_v16 = vmul.f32 2.1237322e-06, %v3003_v1  ;;  %v1280_v20 = vmul.f32 %v1979_v27, %v1279_v36  ;;  %v1829_v28 = vclamps-f32 %v1251_v10, 1.0 }
 0x34d   :  { %v1380_v39 = vmul.f32 %v1379_v29, %v2979_v41  ;;  %v3044_v23 = vadd.f32 1.0, %v1315_v5  ;;  %v948_v61 = vmul.f32 0.5, %v2920_v37  ;;  %v949_v6 = vmul.f32 0.5, %v2928_v14 }
 0x34e   :  { %v3022_v8 = vmul.f32 0.70710677, %v3012_v48  ;;  %v1281_v38 = vadd.f32 %v1979_v27, %v1280_v20  ;;  %v1417_v44 = vadd.f32 0.00028619796, %v1416_v16  ;;  %v1620_v34 = vadd.f32 1.0, %v1829_v28 }
 0x34f   :  { %v1302_v62 = vmul.f32 %v1301_v53, %v2950_v18  ;;  %v1352_v13 = vadd.f32 0.112945676, %v1351_v22  ;;  %v1341_v52 = vadd.f32 0.05243302, %v1340_v19  ;;  %v1381_v46 = vadd.f32 0.05243302, %v1380_v39 }
 0x350   :  { %v1454_v58 = vmul.f32 %v3022_v8, %v3022_v8  ;;  %v1285_v26 = vsel %vm1284_vm8, %v1979_v27, %v1281_v38  ;;  %v1418_v35 = vmul.f32 %v1417_v44, %v3003_v1  ;;  %v1389_v27 = vmul.f32 %v1388_v0, %v2979_v41 }
 0x351   :  { %v1290_v25 = vsel %vm1287_vm9, %v1289_v31, %v1285_v26  ;;  %1980 = vrcp.f32 %v3044_v23  ;;  %v1636_v12 = vmul.f32 %v1620_v34, %v948_v61  ;;  %v1353_v14 = vmul.f32 %v1352_v13, %v2972_v42 }
 0x352   :  { %v1291_v7 = vmul.f32 %v1290_v25, %v1266_v21  ;;  %v3038_v11 = vmin.f32 %v1454_v58, 16.0  ;;  %v1419_v9 = vadd.f32 0.0036580483, %v1418_v35  ;;  %v1390_v36 = vadd.f32 0.014752088, %v1389_v27 }
 0x353   :  { %v934_v47 = vpop.f32.mrf.mxu3  ;;  %v1303_v56 = vadd.f32 0.18741608, %v1302_v62  ;;  %v1342_v3 = vmul.f32 %v1341_v52, %v2972_v42  ;;  %v1354_v20 = vadd.f32 0.4994258, %v1353_v14  ;;  %v1382_v21 = vmul.f32 %v1381_v46, %v2979_v41 }
 0x354   :  { %v3031_v33 = vadd.f32 %v3009_v40, %v934_v47  ;;  %v1830_v43 = vclamps-f32 %v1291_v7, 1.0  ;;  %v1456_v17 = vmul.f32 2.1237322e-06, %v3038_v11  ;;  %v1420_v55 = vmul.f32 %v1419_v9, %v3003_v1 }
 0x355   :  { %v1391_v54 = vmul.f32 %v1390_v36, %v2979_v41  ;;  %v1355_v44 = vmul.f32 %v1354_v20, %v2972_v42  ;;  %v1427_v58 = vmul.f32 3.8918573e-05, %v3003_v1  ;;  %v3066_v31 = vmul.f32 0.5, %v2940_v32 }
 0x356   :  { %v3042_v45 = vmul.f32 0.70710677, %v3031_v33  ;;  %v1621_v15 = vadd.f32 1.0, %v1830_v43  ;;  %v1457_v57 = vadd.f32 0.00028619796, %v1456_v17  ;;  %v1304_v47 = vmul.f32 %v1303_v56, %v2950_v18 }
 0x357   :  { %v1981_v2 = vpop.eup %1980  ;;  %v1343_v28 = vadd.f32 0.18741608, %v1342_v3  ;;  %v3070_v26 = vadd.f32 1.0, %v1355_v44  ;;  %v1392_v0 = vadd.f32 0.112945676, %v1391_v54  ;;  %v1328_v27 = vand.u32 2147483648, %v3044_v23 }
 0x358   :  { %v1494_v49 = vmul.f32 %v3042_v45, %v3042_v45  ;;  %v1637_v37 = vmul.f32 %v1621_v15, %v949_v6  ;;  %v1318_v4 = vmul.f32 %v1981_v2, %v3044_v23  ;;  %v1383_v53 = vadd.f32 0.18741608, %v1382_v21 }
 0x359   :  { %v1421_v25 = vadd.f32 0.05243302, %v1420_v55  ;;  %v1458_v22 = vmul.f32 %v1457_v57, %v3038_v11  ;;  %1982 = vrcp.f32 %v3070_v26  ;;  %v1428_v5 = vadd.f32 0.001143296, %v1427_v58 }
 0x35a   :  { %v1649_v10 = vpack.c.bf16 %v1637_v37, %v1636_v12  ;;  %v3058_v29 = vmin.f32 %v1494_v49, 16.0  ;;  %v1319_v19 = vsub.f32 1.0, %v1318_v4  ;;  %vm1323_vm10 = vweird.f32 %v1981_v2 }
 0x35b   :  { %v937_v16 = vpop.f32.mrf.mxu3  ;;  %v1305_v43 = vadd.f32 1.1283791, %v1304_v47  ;;  %v1344_v34 = vmul.f32 %v1343_v28, %v2972_v42  ;;  %v1326_v61 = vand.u32 2147483647, %v3044_v23  ;;  %v1393_v6 = vmul.f32 %v1392_v0, %v2979_v41 }
 0x35c   :  { %v3061_v38 = vadd.f32 %v3009_v40, %v937_v16  ;;  %1745 = vmatmul.bf16.gmra.mxu1 %v1649_v10  ;;  %v1496_v39 = vmul.f32 2.1237322e-06, %v3058_v29  ;;  %v1320_v35 = vmul.f32 %v1981_v2, %v1319_v19  ;;  %v1384_v62 = vmul.f32 %v1383_v53, %v2979_v41 }
 0x35d   :  { %v1422_v13 = vmul.f32 %v1421_v25, %v3003_v1  ;;  %vm1322_vm11 = vweird.f32 %v3044_v23  ;;  %v1429_v9 = vmul.f32 %v1428_v5, %v3003_v1  ;;  %v1329_v36 = vor.u32 1.1754944e-38, %v1328_v27 }
 0x35e   :  { %v3075_v7 = vmul.f32 0.70710677, %v3061_v38  ;;  %v1321_v52 = vadd.f32 %v1981_v2, %v1320_v35  ;;  %v1497_v46 = vadd.f32 0.00028619796, %v1496_v39  ;;  %vm1324_vm12 = vmor %vm1322_vm11, %vm1323_vm10  ;;  %v1394_v49 = vadd.f32 0.4994258, %v1393_v6 }
 0x35f   :  { %v1983_v16 = vpop.eup %1982  ;;  %v1306_v12 = vmul.f32 %v1305_v43, %v2945_v51  ;;  %v3096_v37 = vmul.f32 0.5, %v2954_v59  ;;  %vm1327_vm13 = vcmp.eq.f32.partialorder %v1326_v61, 8.507059e+37  ;;  %v1430_v23 = vadd.f32 0.014752088, %v1429_v9 }
 0x360   :  { %v1534_v15 = vmul.f32 %v3075_v7, %v3075_v7  ;;  %v1325_v17 = vsel %vm1324_vm12, %v1981_v2, %v1321_v52  ;;  %v1345_v14 = vadd.f32 1.1283791, %v1344_v34  ;;  %v1385_v56 = vadd.f32 1.1283791, %v1384_v62 }
 0x361   :  { %v1330_v3 = vsel %vm1327_vm13, %v1329_v36, %v1325_v17  ;;  %v1358_v10 = vmul.f32 %v1983_v16, %v3070_v26  ;;  %v1498_v20 = vmul.f32 %v1497_v46, %v3058_v29  ;;  %v1395_v55 = vmul.f32 %v1394_v49, %v2979_v41  ;;  %v3114_v41 = vld [vmem:[%s3366_s8] ss:$0 sm:$0xff] }
 0x362   :  { %v3100_v21 = vmin.f32 %v1534_v15, 16.0  ;;  %v1431_v57 = vmul.f32 %v1430_v23, %v3003_v1  ;;  %v1423_v54 = vadd.f32 0.18741608, %v1422_v13  ;;  %v1331_v44 = vmul.f32 %v1330_v3, %v1306_v12 }
 0x363   :  { %v939_v32 = vpop.f32.mrf.mxu3  ;;  %v1359_v2 = vsub.f32 1.0, %v1358_v10  ;;  %v1368_v58 = vand.u32 2147483648, %v3070_v26  ;;  %v3108_v4 = vadd.f32 1.0, %v1395_v55  ;;  %v1346_v28 = vmul.f32 %v1345_v14, %v2959_v63 }
 0x364   :  { %v3079_v18 = vadd.f32 %v3009_v40, %v939_v32  ;;  %v1459_v40 = vadd.f32 0.0036580483, %v1458_v22  ;;  %v1432_v47 = vadd.f32 0.112945676, %v1431_v57  ;;  %vm1363_vm14 = vweird.f32 %v1983_v16 }
 0x365   :  { %v1360_v0 = vmul.f32 %v1983_v16, %v1359_v2  ;;  %v1366_v53 = vand.u32 2147483647, %v3070_v26  ;;  %v3118_v25 = vmul.f32 %v1385_v56, %v2967_v30  ;;  %v1499_v22 = vadd.f32 0.0036580483, %v1498_v20 }
 0x366   :  { %v3092_v42 = vmul.f32 0.70710677, %v3079_v18  ;;  %v1460_v51 = vmul.f32 %v1459_v40, %v3038_v11  ;;  %v1536_v19 = vmul.f32 2.1237322e-06, %v3100_v21  ;;  %1984 = vrcp.f32 %v3108_v4 }
 0x367   :  { %v1424_v39 = vmul.f32 %v1423_v54, %v3003_v1  ;;  %v1361_v32 = vadd.f32 %v1983_v16, %v1360_v0  ;;  %vm1362_vm15 = vweird.f32 %v3070_v26  ;;  %v1831_v27 = vclamps-f32 %v1331_v44, 1.0  ;;  %v1997_v26 = vld [vmem:[%s3358_s0] sm:$0xff] }
 0x368   :  { %v1574_v59 = vmul.f32 %v3092_v42, %v3092_v42  ;;  %v1461_v5 = vadd.f32 0.05243302, %v1460_v51  ;;  %vm1364_vm1 = vmor %vm1362_vm15, %vm1363_vm14  ;;  %v1369_v43 = vor.u32 1.1754944e-38, %v1368_v58  ;;  %v1433_v30 = vmul.f32 %v1432_v47, %v3003_v1 }
 0x369   :  { %v1731_v35 = vpop.f32.mrf.mxu1  ;;  %v1365_v61 = vsel %vm1364_vm1, %v1983_v16, %v1361_v32  ;;  %vm1367_vm2 = vcmp.eq.f32.partialorder %v1366_v53, 8.507059e+37  ;;  %v1467_v6 = vmul.f32 3.8918573e-05, %v3038_v11  ;;  %v1500_v62 = vmul.f32 %v1499_v22, %v3058_v29 }
 0x36a   :  { %v3123_v63 = vmin.f32 %v1574_v59, 16.0  ;;  %v1732_v34 = vadd.f32 %v3114_v41, %v1731_v35  ;;  %v1537_v13 = vadd.f32 0.00028619796, %v1536_v19  ;;  %v1370_v52 = vsel %vm1367_vm2, %v1369_v43, %v1365_v61 }
 0x36b   :  { %v1434_v40 = vadd.f32 0.4994258, %v1433_v30  ;;  %v1371_v9 = vmul.f32 %v1370_v52, %v1346_v28  ;;  %v1468_v17 = vadd.f32 0.001143296, %v1467_v6  ;;  %v1622_v49 = vadd.f32 1.0, %v1831_v27 }
 0x36c   :  { %v1771_v46 = vadd.f32 %v1997_v26, %v1732_v34  ;;  %v1576_v15 = vmul.f32 2.1237322e-06, %v3123_v63  ;;  %v1985_v36 = vpop.eup %1984  ;;  %v1507_v12 = vmul.f32 3.8918573e-05, %v3058_v29  ;;  %v1547_v23 = vmul.f32 3.8918573e-05, %v3100_v21 }
 0x36d   :  { %v1435_v16 = vmul.f32 %v1434_v40, %v3003_v1  ;;  %v1425_v14 = vadd.f32 1.1283791, %v1424_v39  ;;  %v1462_v56 = vmul.f32 %v1461_v5, %v3038_v11  ;;  %v1832_v3 = vclamps-f32 %v1371_v9, 1.0  ;;  %v1998_v5 = vld [vmem:[%s3358_s0 + $0x8] sm:$0xff] }
 0x36e   :  { %1787 = vst.msk [vmem:[%s3367_s9] sm:$0xff] %vm51_vm0, %v1771_v46  ;;  %v1398_v10 = vmul.f32 %v1985_v36, %v3108_v4  ;;  %v1501_v20 = vadd.f32 0.05243302, %v1500_v62  ;;  %v1469_v1 = vmul.f32 %v1468_v17, %v3038_v11  ;;  %v1508_v57 = vadd.f32 0.001143296, %v1507_v12 }
 0x36f   :  { %v3143_v55 = vadd.f32 1.0, %v1435_v16  ;;  %v1538_v54 = vmul.f32 %v1537_v13, %v3100_v21  ;;  %v1577_v51 = vadd.f32 0.00028619796, %v1576_v15  ;;  %v1623_v59 = vadd.f32 1.0, %v1832_v3 }
 0x370   :  { %v1399_v2 = vsub.f32 1.0, %v1398_v10  ;;  %v1638_v58 = vmul.f32 %v1622_v49, %v3066_v31  ;;  %vm1402_vm3 = vweird.f32 %v3108_v4  ;;  %v1548_v47 = vadd.f32 0.001143296, %v1547_v23 }
 0x371   :  { %v1733_v44 = vpop.f32.mrf.mxu1  ;;  %1986 = vrcp.f32 %v3143_v55  ;;  %v1639_v0 = vmul.f32 %v1623_v59, %v3096_v37  ;;  %vm1403_vm4 = vweird.f32 %v1985_v36  ;;  %v1406_v22 = vand.u32 2147483647, %v3108_v4 }
 0x372   :  { %v1734_v28 = vadd.f32 %v3114_v41, %v1733_v44  ;;  %v1400_v53 = vmul.f32 %v1985_v36, %v1399_v2  ;;  %v1408_v19 = vand.u32 2147483648, %v3108_v4  ;;  %v1470_v39 = vadd.f32 0.014752088, %v1469_v1  ;;  %vm3162_vm5 = vmor %vm1402_vm3, %vm1403_vm4 }
 0x373   :  { %v1509_v32 = vmul.f32 %v1508_v57, %v3058_v29  ;;  %v1578_v31 = vmul.f32 %v1577_v51, %v3123_v63  ;;  %v1650_v27 = vpack.c.bf16 %v1639_v0, %v1638_v58  ;;  %v1426_v37 = vmul.f32 %v1425_v14, %v2990_v60  ;;  %v1999_v58 = vld [vmem:[%s3358_s0 + $0x10] sm:$0xff] }
 0x374   :  { %v1772_v35 = vadd.f32 %v1998_v5, %v1734_v28  ;;  %v1401_v43 = vadd.f32 %v1985_v36, %v1400_v53  ;;  %v1471_v34 = vmul.f32 %v1470_v39, %v3038_v11  ;;  %v1549_v6 = vmul.f32 %v1548_v47, %v3100_v21 }
 0x375   :  { %v1510_v61 = vadd.f32 0.014752088, %v1509_v32  ;;  %v1463_v62 = vadd.f32 0.18741608, %v1462_v56  ;;  %v1502_v13 = vmul.f32 %v1501_v20, %v3058_v29  ;;  %1750 = vmatmul.bf16.vlgmr.msra.gmra.mxu2 %v1650_v27  ;;  %v1587_v4 = vmul.f32 3.8918573e-05, %v3123_v63 }
 0x376   :  { %1788 = vst.msk [vmem:[%s3367_s9 + $0x8] sm:$0xff] %vm51_vm0, %v1772_v35  ;;  %v1405_v60 = vsel %vm3162_vm5, %v1985_v36, %v1401_v43  ;;  %v1539_v40 = vadd.f32 0.0036580483, %v1538_v54  ;;  %v1409_v26 = vor.u32 1.1754944e-38, %v1408_v19  ;;  %v1472_v46 = vadd.f32 0.112945676, %v1471_v34 }
 0x377   :  { %v1987_v52 = vpop.eup %1986  ;;  %v1511_v15 = vmul.f32 %v1510_v61, %v3058_v29  ;;  %v1579_v9 = vadd.f32 0.0036580483, %v1578_v31  ;;  %vm1407_vm6 = vcmp.eq.f32.partialorder %v1406_v22, 8.507059e+37  ;;  %v1550_v49 = vadd.f32 0.014752088, %v1549_v6 }
 0x378   :  { %v1438_v17 = vmul.f32 %v1987_v52, %v3143_v55  ;;  %v1410_v16 = vsel %vm1407_vm6, %v1409_v26, %v1405_v60  ;;  %v1473_v12 = vmul.f32 %v1472_v46, %v3038_v11  ;;  %v1588_v14 = vadd.f32 0.001143296, %v1587_v4 }
 0x379   :  { %v1512_v23 = vadd.f32 0.112945676, %v1511_v15  ;;  %v1736_v56 = vpop.f32.mrf.mxu1  ;;  %v1446_v3 = vand.u32 2147483647, %v3143_v55  ;;  %v1448_v10 = vand.u32 2147483648, %v3143_v55  ;;  %v1551_v20 = vmul.f32 %v1550_v49, %v3100_v21 }
 0x37a   :  { %v1439_v36 = vsub.f32 1.0, %v1438_v17  ;;  %v1737_v1 = vadd.f32 %v3114_v41, %v1736_v56  ;;  %v1474_v57 = vadd.f32 0.4994258, %v1473_v12  ;;  %v1589_v51 = vmul.f32 %v1588_v14, %v3123_v63 }
 0x37b   :  { %v1513_v54 = vmul.f32 %v1512_v23, %v3058_v29  ;;  %v1411_v59 = vmul.f32 %v1410_v16, %v3118_v25  ;;  %vm1443_vm7 = vweird.f32 %v1987_v52  ;;  %v1552_v44 = vadd.f32 0.112945676, %v1551_v20 }
 0x37c   :  { %v1440_v2 = vmul.f32 %v1987_v52, %v1439_v36  ;;  %v1773_v47 = vadd.f32 %v1999_v58, %v1737_v1  ;;  %v1475_v28 = vmul.f32 %v1474_v57, %v3038_v11  ;;  %v1590_v53 = vadd.f32 0.014752088, %v1589_v51 }
 0x37d   :  { %v1514_v0 = vadd.f32 0.4994258, %v1513_v54  ;;  %v1540_v22 = vmul.f32 %v1539_v40, %v3100_v21  ;;  %vm1442_vm8 = vweird.f32 %v3143_v55  ;;  %v1553_v39 = vmul.f32 %v1552_v44, %v3100_v21 }
 0x37e   :  { %v1441_v19 = vadd.f32 %v1987_v52, %v1440_v2  ;;  %1789 = vst.msk [vmem:[%s3367_s9 + $0x10] sm:$0xff] %vm51_vm0, %v1773_v47  ;;  %vm1444_vm9 = vmor %vm1442_vm8, %vm1443_vm7  ;;  %v1449_v25 = vor.u32 1.1754944e-38, %v1448_v10  ;;  %v3197_v32 = vadd.f32 1.0, %v1475_v28  ;;  %v1591_v5 = vmul.f32 %v1590_v53, %v3123_v63 }
 0x37f   :  { %v1515_v31 = vmul.f32 %v1514_v0, %v3058_v29  ;;  %v1833_v35 = vclamps-f32 %v1411_v59, 1.0  ;;  %vm1447_vm10 = vcmp.eq.f32.partialorder %v1446_v3, 8.507059e+37  ;;  %v1554_v43 = vadd.f32 0.4994258, %v1553_v39 }
 0x380   :  { %v1445_v27 = vsel %vm1444_vm9, %v1987_v52, %v1441_v19  ;;  %v1464_v55 = vmul.f32 %v1463_v62, %v3038_v11  ;;  %v1580_v30 = vmul.f32 %v1579_v9, %v3123_v63  ;;  %1988 = vrcp.f32 %v3197_v32  ;;  %v2001_v19 = vld [vmem:[%s3358_s0 + $0x20] sm:$0xff] }
 0x381   :  { %v1450_v34 = vsel %vm1447_vm10, %v1449_v25, %v1445_v27  ;;  %v1503_v61 = vadd.f32 0.18741608, %v1502_v13  ;;  %v1738_v6 = vpop.f32.mrf.mxu1  ;;  %v3204_v4 = vadd.f32 1.0, %v1515_v31  ;;  %v1555_v40 = vmul.f32 %v1554_v43, %v3100_v21 }
 0x382   :  { %v1451_v60 = vmul.f32 %v1450_v34, %v1426_v37  ;;  %v1541_v26 = vadd.f32 0.05243302, %v1540_v22  ;;  %v1739_v46 = vadd.f32 %v3114_v41, %v1738_v6  ;;  %v1592_v52 = vadd.f32 0.112945676, %v1591_v5  ;;  %v2000_v37 = vld [vmem:[%s3358_s0 + $0x18] sm:$0xff] }
 0x383   :  { %v952_v15 = vmul.f32 0.5, %v2964_v50  ;;  %v1624_v11 = vadd.f32 1.0, %v1833_v35  ;;  %1990 = vrcp.f32 %v3204_v4  ;;  %v953_v62 = vmul.f32 0.5, %v2984_v24 }
 0x384   :  { %v1834_v17 = vclamps-f32 %v1451_v60, 1.0  ;;  %v1581_v9 = vadd.f32 0.05243302, %v1580_v30  ;;  %v1774_v13 = vadd.f32 %v2000_v37, %v1739_v46  ;;  %v3214_v49 = vadd.f32 1.0, %v1555_v40 }
 0x385   :  { %v1465_v16 = vadd.f32 1.1283791, %v1464_v55  ;;  %v1504_v12 = vmul.f32 %v1503_v61, %v3058_v29  ;;  %v1593_v50 = vmul.f32 %v1592_v52, %v3123_v63  ;;  %v1542_v56 = vmul.f32 %v1541_v26, %v3100_v21 }
 0x386   :  { %v1625_v23 = vadd.f32 1.0, %v1834_v17  ;;  %v1989_v14 = vpop.eup %1988  ;;  %1790 = vst.msk [vmem:[%s3367_s9 + $0x18] sm:$0xff] %vm51_vm0, %v1774_v13  ;;  %1992 = vrcp.f32 %v3214_v49  ;;  %v1640_v24 = vmul.f32 %v1624_v11, %v952_v15  ;;  %v1582_v10 = vmul.f32 %v1581_v9, %v3123_v63 }
 0x387   :  { %v1478_v3 = vmul.f32 %v1989_v14, %v3197_v32  ;;  %v1594_v29 = vadd.f32 0.4994258, %v1593_v50  ;;  %v1466_v1 = vmul.f32 %v1465_v16, %v3022_v8  ;;  %v1505_v57 = vadd.f32 1.1283791, %v1504_v12 }
 0x388   :  { %v1641_v36 = vmul.f32 %v1625_v23, %v953_v62  ;;  %v1543_v2 = vadd.f32 0.18741608, %v1542_v56  ;;  %v1488_v58 = vand.u32 2147483648, %v3197_v32  ;;  %vm1483_vm11 = vweird.f32 %v1989_v14 }
 0x389   :  { %v1991_v20 = vpop.eup %1990  ;;  %v1741_v51 = vpop.f32.mrf.mxu1  ;;  %v1479_v59 = vsub.f32 1.0, %v1478_v3  ;;  %v1486_v0 = vand.u32 2147483647, %v3197_v32  ;;  %v1595_v53 = vmul.f32 %v1594_v29, %v3123_v63  ;;  %v1583_v8 = vadd.f32 0.18741608, %v1582_v10 }
 0x38a   :  { %v1651_v54 = vpack.c.bf16 %v1641_v36, %v1640_v24  ;;  %v1742_v44 = vadd.f32 %v3114_v41, %v1741_v51  ;;  %v1518_v47 = vmul.f32 %v1991_v20, %v3204_v4  ;;  %vm1482_vm12 = vweird.f32 %v3197_v32 }
 0x38b   :  { %v1480_v28 = vmul.f32 %v1989_v14, %v1479_v59  ;;  %v1528_v5 = vand.u32 2147483648, %v3204_v4  ;;  %v3241_v27 = vadd.f32 1.0, %v1595_v53  ;;  %vm1484_vm13 = vmor %vm1482_vm12, %vm1483_vm11  ;;  %v1489_v43 = vor.u32 1.1754944e-38, %v1488_v58 }
 0x38c   :  { %1755 = vmatmul.bf16.gmra.mxu2 %v1651_v54  ;;  %v3232_v22 = vpop.eup %1992  ;;  %v1775_v39 = vadd.f32 %v2001_v19, %v1742_v44  ;;  %v1519_v25 = vsub.f32 1.0, %v1518_v47  ;;  %vm1523_vm14 = vweird.f32 %v1991_v20  ;;  %v1526_v32 = vand.u32 2147483647, %v3204_v4 }
 0x38d   :  { %v1481_v31 = vadd.f32 %v1989_v14, %v1480_v28  ;;  %v1558_v35 = vmul.f32 %v3232_v22, %v3214_v49  ;;  %vm1487_vm15 = vcmp.eq.f32.partialorder %v1486_v0, 8.507059e+37  ;;  %1994 = vrcp.f32 %v3241_v27 }
 0x38e   :  { %1791 = vst.msk [vmem:[%s3367_s9 + $0x20] sm:$0xff] %vm51_vm0, %v1775_v39  ;;  %v1520_v55 = vmul.f32 %v1991_v20, %v1519_v25  ;;  %vm1522_vm1 = vweird.f32 %v3204_v4  ;;  %v1529_v26 = vor.u32 1.1754944e-38, %v1528_v5  ;;  %v1506_v52 = vmul.f32 %v1505_v57, %v3042_v45  ;;  %v2002_v4 = vld [vmem:[%s3358_s0 + $0x28] sm:$0xff] }
 0x38f   :  { %v1485_v30 = vsel %vm1484_vm13, %v1989_v14, %v1481_v31  ;;  %v1559_v34 = vsub.f32 1.0, %v1558_v35  ;;  %vm1524_vm2 = vmor %vm1522_vm1, %vm1523_vm14  ;;  %vm1527_vm3 = vcmp.eq.f32.partialorder %v1526_v32, 8.507059e+37  ;;  %v1544_v11 = vmul.f32 %v1543_v2, %v3100_v21 }
 0x390   :  { %v1490_v61 = vsel %vm1487_vm15, %v1489_v43, %v1485_v30  ;;  %v1521_v6 = vadd.f32 %v1991_v20, %v1520_v55  ;;  %v1584_v62 = vmul.f32 %v1583_v8, %v3123_v63  ;;  %vm1563_vm4 = vweird.f32 %v3232_v22  ;;  %v2003_v55 = vld [vmem:[%s3358_s0 + $0x30] sm:$0xff]  ;;  %v2004_v30 = vld [vmem:[%s3358_s0 + $0x38] sm:$0xff] }
 0x391   :  { %v1743_v60 = vpop.f32.mrf.mxu1  ;;  %v1491_v40 = vmul.f32 %v1490_v61, %v1466_v1  ;;  %v1560_v46 = vmul.f32 %v3232_v22, %v1559_v34  ;;  %v1566_v23 = vand.u32 2147483647, %v3214_v49  ;;  %v1568_v50 = vand.u32 2147483648, %v3214_v49 }
 0x392   :  { %v1744_v15 = vadd.f32 %v3114_v41, %v1743_v60  ;;  %v1525_v17 = vsel %vm1524_vm2, %v1991_v20, %v1521_v6  ;;  %vm1562_vm5 = vweird.f32 %v3214_v49  ;;  %v954_v56 = vmul.f32 0.5, %v3012_v48  ;;  %v2005_v60 = vld [vmem:[%s3358_s0 + $0x40] sm:$0xff] }
 0x393   :  { %v1835_v9 = vclamps-f32 %v1491_v40, 1.0  ;;  %v1530_v37 = vsel %vm1527_vm3, %v1529_v26, %v1525_v17  ;;  %v1561_v12 = vadd.f32 %v3232_v22, %v1560_v46  ;;  %v1995_v45 = vpop.eup %1994  ;;  %v955_v24 = vmul.f32 0.5, %v3031_v33  ;;  %vm1564_vm6 = vmor %vm1562_vm5, %vm1563_vm4 }
 0x394   :  { %v1776_v13 = vadd.f32 %v2002_v4, %v1744_v15  ;;  %v1531_v16 = vmul.f32 %v1530_v37, %v1506_v52  ;;  %v1598_v14 = vmul.f32 %v1995_v45, %v3241_v27  ;;  %v1545_v36 = vadd.f32 1.1283791, %v1544_v11  ;;  %v2006_v52 = vld [vmem:[%s3358_s0 + $0x48] sm:$0xff] }
 0x395   :  { %v1626_v63 = vadd.f32 1.0, %v1835_v9  ;;  %v1585_v3 = vadd.f32 1.1283791, %v1584_v62  ;;  %v1565_v29 = vsel %vm1564_vm6, %v3232_v22, %v1561_v12  ;;  %vm1567_vm7 = vcmp.eq.f32.partialorder %v1566_v23, 8.507059e+37  ;;  %v2007_v62 = vld [vmem:[%s3358_s0 + $0x50] sm:$0xff]  ;;  %v2009_v23 = vld [vmem:[%s3358_s0 + $0x60] sm:$0xff] }
 0x396   :  { %1792 = vst.msk [vmem:[%s3367_s9 + $0x28] sm:$0xff] %vm51_vm0, %v1776_v13  ;;  %v1836_v21 = vclamps-f32 %v1531_v16, 1.0  ;;  %v1599_v20 = vsub.f32 1.0, %v1598_v14  ;;  %v1569_v1 = vor.u32 1.1754944e-38, %v1568_v50  ;;  %v1606_v57 = vand.u32 2147483647, %v3241_v27 }
 0x397   :  { %v1608_v54 = vand.u32 2147483648, %v3241_v27  ;;  %v1642_v49 = vmul.f32 %v1626_v63, %v954_v56  ;;  %vm1603_vm8 = vweird.f32 %v1995_v45  ;;  %v1546_v33 = vmul.f32 %v1545_v36, %v3075_v7  ;;  %v2008_v13 = vld [vmem:[%s3358_s0 + $0x58] sm:$0xff]  ;;  %v2010_v14 = vld [vmem:[%s3358_s0 + $0x68] sm:$0xff] }
 0x398   :  { %v1627_v10 = vadd.f32 1.0, %v1836_v21  ;;  %v1600_v59 = vmul.f32 %v1995_v45, %v1599_v20  ;;  %v1570_v48 = vsel %vm1567_vm7, %v1569_v1, %v1565_v29  ;;  %vm1602_vm9 = vweird.f32 %v3241_v27  ;;  %v2012_v1 = vld [vmem:[%s3358_s0 + $0x78] sm:$0xff] }
 0x399   :  { %vm1604_vm10 = vmor %vm1602_vm9, %vm1603_vm8  ;;  %v1609_v58 = vor.u32 1.1754944e-38, %v1608_v54  ;;  %v1586_v47 = vmul.f32 %v1585_v3, %v3092_v42  ;;  %v1571_v28 = vmul.f32 %v1570_v48, %v1546_v33  ;;  %vm1607_vm11 = vcmp.eq.f32.partialorder %v1606_v57, 8.507059e+37  ;;  %v2011_v3 = vld [vmem:[%s3358_s0 + $0x70] sm:$0xff] }
 0x39a   :  { %v1643_v51 = vmul.f32 %v1627_v10, %v955_v24  ;;  %v1601_v44 = vadd.f32 %v1995_v45, %v1600_v59  ;;  %v957_v25 = vmul.f32 0.5, %v3079_v18  ;;  %v956_v31 = vmul.f32 0.5, %v3061_v38 }
 0x39b   :  { %v1837_v8 = vclamps-f32 %v1571_v28, 1.0 }
 0x39c   :  { %v1652_v2 = vpack.c.bf16 %v1643_v51, %v1642_v49  ;;  %v1605_v0 = vsel %vm1604_vm10, %v1995_v45, %v1601_v44 }
 0x39d   :  { %v1610_v53 = vsel %vm1607_vm11, %v1609_v58, %v1605_v0  ;;  %v1628_v7 = vadd.f32 1.0, %v1837_v8 }
 0x39e   :  { %1760 = vmatmul.bf16.gmra.mxu2 %v1652_v2  ;;  %v1611_v22 = vmul.f32 %v1610_v53, %v1586_v47 }
 0x39f   :  { %v1644_v35 = vmul.f32 %v1628_v7, %v956_v31 }
 0x3a0   :  { %v1838_v19 = vclamps-f32 %v1611_v22, 1.0 }
 0x3a2   :  { %v1629_v39 = vadd.f32 1.0, %v1838_v19 }
 0x3a4   :  { %v1645_v5 = vmul.f32 %v1629_v39, %v957_v25 }
 0x3a6   :  { %v1653_v27 = vpack.c.bf16 %v1645_v5, %v1644_v35 }
 0x3ae   :  { %1765 = vmatmul.bf16.gmra.mxu2 %v1653_v27 }
 0x3d9   :  { %v1746_v43 = vpop.f32.mrf.mxu1 }
 0x3da   :  { %v1747_v42 = vadd.f32 %v3114_v41, %v1746_v43 }
 0x3dc   :  { %v1777_v32 = vadd.f32 %v2003_v55, %v1747_v42 }
 0x3de   :  { %1793 = vst.msk [vmem:[%s3367_s9 + $0x30] sm:$0xff] %vm51_vm0, %v1777_v32 }
 0x3e1   :  { %v1748_v18 = vpop.f32.mrf.mxu1 }
 0x3e2   :  { %v1749_v38 = vadd.f32 %v3114_v41, %v1748_v18 }
 0x3e4   :  { %v1778_v34 = vadd.f32 %v2004_v30, %v1749_v38 }
 0x3e6   :  { %1794 = vst.msk [vmem:[%s3367_s9 + $0x38] sm:$0xff] %vm51_vm0, %v1778_v34 }
 0x3f8   :  { %v1751_v61 = vpop.f32.mrf.mxu2 }
 0x3f9   :  { %v1752_v6 = vadd.f32 %v3114_v41, %v1751_v61 }
 0x3fb   :  { %v1779_v40 = vadd.f32 %v2005_v60, %v1752_v6 }
 0x3fd   :  { %1795 = vst.msk [vmem:[%s3367_s9 + $0x40] sm:$0xff] %vm51_vm0, %v1779_v40 }
 0x400   :  { %v1753_v26 = vpop.f32.mrf.mxu2 }
 0x401   :  { %v1754_v46 = vadd.f32 %v3114_v41, %v1753_v26 }
 0x403   :  { %v1780_v15 = vadd.f32 %v2006_v52, %v1754_v46 }
 0x405   :  { %1796 = vst.msk [vmem:[%s3367_s9 + $0x48] sm:$0xff] %vm51_vm0, %v1780_v15 }
 0x40f   :  { %v1756_v17 = vpop.f32.mrf.mxu2 }
 0x410   :  { %v1757_v11 = vadd.f32 %v3114_v41, %v1756_v17 }
 0x412   :  { %v1781_v9 = vadd.f32 %v2007_v62, %v1757_v11 }
 0x414   :  { %1797 = vst.msk [vmem:[%s3367_s9 + $0x50] sm:$0xff] %vm51_vm0, %v1781_v9 }
 0x417   :  { %v1758_v37 = vpop.f32.mrf.mxu2 }
 0x418   :  { %v1759_v4 = vadd.f32 %v3114_v41, %v1758_v37 }
 0x41a   :  { %v1782_v16 = vadd.f32 %v2008_v13, %v1759_v4 }
 0x41c   :  { %1798 = vst.msk [vmem:[%s3367_s9 + $0x58] sm:$0xff] %vm51_vm0, %v1782_v16 }
 0x421   :  { %v1761_v12 = vpop.f32.mrf.mxu2 }
 0x422   :  { %v1762_v45 = vadd.f32 %v3114_v41, %v1761_v12 }
 0x424   :  { %v1783_v50 = vadd.f32 %v2009_v23, %v1762_v45 }
 0x426   :  { %1799 = vst.msk [vmem:[%s3367_s9 + $0x60] sm:$0xff] %vm51_vm0, %v1783_v50 }
 0x429   :  { %v1763_v21 = vpop.f32.mrf.mxu2 }
 0x42a   :  { %v1764_v63 = vadd.f32 %v3114_v41, %v1763_v21 }
 0x42c   :  { %v1784_v56 = vadd.f32 %v2010_v14, %v1764_v63 }
 0x42e   :  { %1800 = vst.msk [vmem:[%s3367_s9 + $0x68] sm:$0xff] %vm51_vm0, %v1784_v56 }
 0x431   :  { %v1766_v24 = vpop.f32.mrf.mxu2 }
 0x432   :  { %v1767_v36 = vadd.f32 %v3114_v41, %v1766_v24 }
 0x434   :  { %v1785_v10 = vadd.f32 %v2011_v3, %v1767_v36 }
 0x436   :  { %1801 = vst.msk [vmem:[%s3367_s9 + $0x70] sm:$0xff] %vm51_vm0, %v1785_v10 }
 0x439   :  { %v1768_v29 = vpop.f32.mrf.mxu2 }
 0x43a   :  { %v1769_v20 = vadd.f32 %v3114_v41, %v1768_v29 }
 0x43c   :  { %v1786_v57 = vadd.f32 %v2012_v1, %v1769_v20 }
 0x43e   :  { %1802 = vst.msk [vmem:[%s3367_s9 + $0x78] sm:$0xff] %vm51_vm0, %v1786_v57 }

// kernel: _lambda_.4
= control target key start
LH: loop header
LB: loop body
LE: loop exit
PB: predicated region body
PF: predicated region fallthrough
CT: control target
= control target key end

     0   :  { %s1882_s27 = smov 0   ;;  %s2506_s0 = inlined_call_operand.vmem [shape: f32[2,64,32], index: 0, kind: input, shape index: {}]   ;;  %s2507_s1 = inlined_call_operand.vmem [shape: f32[1,32], index: 1, kind: input, shape index: {}]   ;;  %s2508_s2 = inlined_call_operand.vmem [shape: f32[1,32], index: 2, kind: input, shape index: {}]   ;;  %s2509_s3 = inlined_call_operand.vmem [shape: bf16[32,96], index: 3, kind: input, shape index: {}]   ;;  %s2510_s4 = inlined_call_operand.vmem [shape: f32[1,96], index: 4, kind: input, shape index: {}]   ;;  %s2511_s5 = inlined_call_operand.vmem [shape: bf16[32,32], index: 5, kind: input, shape index: {}]   ;;  %s2512_s6 = inlined_call_operand.vmem [shape: f32[1,32], index: 6, kind: input, shape index: {}]   ;;  %s2513_s7 = inlined_call_operand.vmem [shape: f32[2,4,16,16], index: 7, kind: input, shape index: {}]   ;;  %s2514_s8 = inlined_call_operand.vmem [shape: f32[2,64,32], index: 8, kind: output, shape index: {}]  }
   0x1 LB: > { %s1643_s28 = sadd.s32 4294967295, %s1829_s27   ;;  %p1647_p0 = scmp.ge.s32.totalorder %s1829_s27, 1  ;;  %s1829_s27 = sphi %s1882_s27, %s18_s27  }
   0x2   : > { %p262_p1 = scmp.lt.s32.totalorder %s1829_s27, 3 }
   0x4   : > { %p263_p2 = pnand %p1647_p0, %p262_p1 }
   0x5   : > { %p296_p3 = scmp.lt.s32.totalorder (!%p263_p2), %s1643_s28, 1  ;;  %s1832_s21 = smov (!%p263_p2), 96  }
   0x6   : > { %266 = sbr.rel (%p263_p2) target bundleno = 1789 (0x6fd), region = 52  ;;  %s1833_s20 = smov (!%p263_p2), 64  }
   0x7   : > { %s1835_s22 = smov (!%p263_p2), 112  }
   0xb   : > { %s2532_s28 = smov (!%p296_p3, %s1643_s28), 1  ;;  %vm315_vm0 = vcmask 261120   ;;  %v1831_v16 = vmov 32.0  }
   0xc   : > { %s1706_s29 = sshll.u32 %s2532_s28, 6  ;;  %1733 = vrcp.f32 %v1831_v16 }
   0xd   : > { %s1898_s10 = scalar_lea.vmem %s2506_s0, %s1706_s29  ;;  %s2477_s12 = scalar_lea.vmem %s2514_s8, %s1706_s29 }
   0xe   : > { %v311_v0 = vld [vmem:[%s1898_s10 + $0x20] sm:$0xff]  ;;  %v309_v1 = vld [vmem:[%s1898_s10 + $0x10] sm:$0xff]  ;;  %v312_v6 = vld [vmem:[%s1898_s10 + $0x28] sm:$0xff] }
   0xf   : > { %v307_v2 = vld [vmem:[%s1898_s10] sm:$0xff]  ;;  %v328_v3 = vsel %vm315_vm0, %v311_v0, 0.0  ;;  %v322_v4 = vsel %vm315_vm0, %v309_v1, 0.0  ;;  %v310_v7 = vld [vmem:[%s1898_s10 + $0x18] sm:$0xff]  ;;  %v308_v8 = vld [vmem:[%s1898_s10 + $0x8] sm:$0xff]  ;;  %v331_v9 = vsel %vm315_vm0, %v312_v6, 0.0 }
  0x10   : > { %v316_v5 = vsel %vm315_vm0, %v307_v2, 0.0  ;;  %329 = vadd.xlane.f32.xlu2 %v328_v3  ;;  %323 = vadd.xlane.f32.xlu1 %v322_v4  ;;  %v325_v10 = vsel %vm315_vm0, %v310_v7, 0.0  ;;  %v319_v11 = vsel %vm315_vm0, %v308_v8, 0.0  ;;  %v314_v12 = vld [vmem:[%s1898_s10 + $0x38] sm:$0xff]  ;;  %v313_v13 = vld [vmem:[%s1898_s10 + $0x30] sm:$0xff] }
  0x11   : > { %317 = vadd.xlane.f32.xlu0 %v316_v5  ;;  %v337_v14 = vsel %vm315_vm0, %v314_v12, 0.0  ;;  %v334_v15 = vsel %vm315_vm0, %v313_v13, 0.0  ;;  %v1708_v5 = vld [vmem:[%s2509_s3] sm:$0xff] }
  0x12   : > { %v1734_v17 = vpop.eup %1733 }
  0x13   : > { %v341_v18 = vmul.f32 32.0, %v1734_v17  ;;  %vm345_vm1 = vweird.f32 %v1734_v17 }
  0x15   : > { %v342_v19 = vsub.f32 1.0, %v341_v18 }
  0x17   : > { %v343_v20 = vmul.f32 %v1734_v17, %v342_v19 }
  0x18   : > { %332 = vadd.xlane.f32.xlu2 %v331_v9  ;;  %326 = vadd.xlane.f32.xlu1 %v325_v10 }
  0x19   : > { %320 = vadd.xlane.f32.xlu0 %v319_v11  ;;  %v344_v21 = vadd.f32 %v1734_v17, %v343_v20 }
  0x1b   : > { %v1916_v22 = vsel %vm345_vm1, %v1734_v17, %v344_v21 }
  0x20   : > { %338 = vadd.xlane.f32.xlu1 %v337_v14 }
  0x21   : > { %335 = vadd.xlane.f32.xlu0 %v334_v15 }
  0x83   : > { %v330_v23 = vpop.xlane.xlu2 %329  ;;  %v324_v24 = vpop.xlane.xlu1 %323 }
  0x84   : > { %v349_v25 = vmul.f32 %v1916_v22, %v324_v24  ;;  %v318_v26 = vpop.xlane.xlu0 %317  ;;  %v351_v42 = vmul.f32 %v1916_v22, %v330_v23 }
  0x85   : > { %v347_v27 = vmul.f32 %v1916_v22, %v318_v26 }
  0x86   : > { %v1920_v28 = vsub.f32 %v309_v1, %v349_v25  ;;  %v1948_v49 = vsub.f32 %v311_v0, %v351_v42 }
  0x87   : > { %v1922_v29 = vsub.f32 %v307_v2, %v347_v27  ;;  %v1709_v2 = vld [vmem:[%s2509_s3 + $0x8] sm:$0xff] }
  0x88   : > { %v365_v30 = vmul.f32 %v1920_v28, %v1920_v28  ;;  %v367_v56 = vmul.f32 %v1948_v49, %v1948_v49  ;;  %565 = vmatpush.bf16.msra.mxu0 %v1709_v2  ;;  %1712 = vmatpush.bf16.msra.mxu2 %v1709_v2 }
  0x89   : > { %v363_v31 = vmul.f32 %v1922_v29, %v1922_v29 }
  0x8a   : > { %v377_v32 = vsel %vm315_vm0, %v365_v30, 0.0  ;;  %v383_v59 = vsel %vm315_vm0, %v367_v56, 0.0 }
  0x8b   : > { %v333_v33 = vpop.xlane.xlu2 %332  ;;  %378 = vadd.xlane.f32.xlu1 %v377_v32  ;;  %v327_v34 = vpop.xlane.xlu1 %326  ;;  %v371_v35 = vsel %vm315_vm0, %v363_v31, 0.0 }
  0x8c   : > { %v352_v36 = vmul.f32 %v1916_v22, %v333_v33  ;;  %v350_v37 = vmul.f32 %v1916_v22, %v327_v34  ;;  %372 = vadd.xlane.f32.xlu2 %v371_v35  ;;  %v321_v38 = vpop.xlane.xlu0 %320  ;;  %566 = vmatpush.bf16.msra.mxu0 %v1708_v5 }
  0x8d   : > { %v348_v39 = vmul.f32 %v1916_v22, %v321_v38  ;;  %1713 = vmatpush.bf16.msra.mxu2 %v1708_v5  ;;  %v2032_v5 = vld [vmem:[%s2508_s2] ss:$0 sm:$0xff] }
  0x8e   : > { %v1933_v40 = vsub.f32 %v312_v6, %v352_v36  ;;  %v1935_v41 = vsub.f32 %v310_v7, %v350_v37 }
  0x8f   : > { %v1938_v43 = vsub.f32 %v308_v8, %v348_v39 }
  0x90   : > { %v368_v44 = vmul.f32 %v1933_v40, %v1933_v40  ;;  %v366_v45 = vmul.f32 %v1935_v41, %v1935_v41 }
  0x91   : > { %v364_v46 = vmul.f32 %v1938_v43, %v1938_v43 }
  0x92   : > { %v386_v47 = vsel %vm315_vm0, %v368_v44, 0.0  ;;  %v380_v48 = vsel %vm315_vm0, %v366_v45, 0.0 }
  0x93   : > { %387 = vadd.xlane.f32.xlu1 %v386_v47  ;;  %v374_v50 = vsel %vm315_vm0, %v364_v46, 0.0  ;;  %v339_v51 = vpop.xlane.xlu1 %338 }
  0x94   : > { %381 = vadd.xlane.f32.xlu2 %v380_v48  ;;  %375 = vadd.xlane.f32.xlu0 %v374_v50  ;;  %v336_v52 = vpop.xlane.xlu0 %335  ;;  %v354_v54 = vmul.f32 %v1916_v22, %v339_v51 }
  0x95   : > { %v353_v53 = vmul.f32 %v1916_v22, %v336_v52 }
  0x96   : > { %v1957_v57 = vsub.f32 %v314_v12, %v354_v54 }
  0x97   : > { %v1953_v55 = vsub.f32 %v313_v13, %v353_v53 }
  0x98   : > { %v370_v61 = vmul.f32 %v1957_v57, %v1957_v57 }
  0x99   : > { %v369_v58 = vmul.f32 %v1953_v55, %v1953_v55 }
  0x9a   : > { %v392_v62 = vsel %vm315_vm0, %v370_v61, 0.0 }
  0x9b   : > { %v389_v60 = vsel %vm315_vm0, %v369_v58, 0.0 }
  0x9c   : > { %384 = vadd.xlane.f32.xlu0 %v383_v59  ;;  %390 = vadd.xlane.f32.xlu2 %v389_v60  ;;  %v2018_v60 = vld [vmem:[%s2507_s1] ss:$0 sm:$0xff] }
  0xa4   : > { %393 = vadd.xlane.f32.xlu0 %v392_v62 }
  0xfe   : > { %v379_v63 = vpop.xlane.xlu1 %378 }
  0xff   : > { %v373_v0 = vpop.xlane.xlu2 %372  ;;  %v397_v3 = vmul.f32 %v379_v63, %v1916_v22 }
 0x100   : > { %v395_v1 = vmul.f32 %v373_v0, %v1916_v22 }
 0x101   : > { %v1974_v6 = vadd.f32 1e-05, %v397_v3 }
 0x102   : > { %v403_v4 = vadd.f32 1e-05, %v395_v1 }
 0x103   : > { %vm437_vm13 = vweird.f32 %v1974_v6 }
 0x104   : > { %1735 = vrsqrt.f32 %v403_v4  ;;  %vm417_vm3 = vweird.f32 %v403_v4 }
 0x105   : > { %1737 = vrsqrt.f32 %v1974_v6 }
 0x106   : > { %v388_v7 = vpop.xlane.xlu1 %387 }
 0x107   : > { %v400_v8 = vmul.f32 %v388_v7, %v1916_v22  ;;  %v382_v9 = vpop.xlane.xlu2 %381  ;;  %v376_v10 = vpop.xlane.xlu0 %375 }
 0x108   : > { %v398_v11 = vmul.f32 %v382_v9, %v1916_v22  ;;  %v396_v12 = vmul.f32 %v376_v10, %v1916_v22 }
 0x109   : > { %v1979_v13 = vadd.f32 1e-05, %v400_v8 }
 0x10a   : > { %v1736_v14 = vpop.eup %1735  ;;  %v1982_v15 = vadd.f32 1e-05, %v398_v11  ;;  %v404_v16 = vadd.f32 1e-05, %v396_v12 }
 0x10b   : > { %v412_v17 = vmul.f32 %v1736_v14, %v403_v4  ;;  %1739 = vrsqrt.f32 %v1979_v13  ;;  %v1986_v23 = vpop.eup %1737  ;;  %vm418_vm2 = vweird.f32 %v1736_v14  ;;  %vm467_vm7 = vweird.f32 %v1979_v13 }
 0x10c   : > { %1741 = vrsqrt.f32 %v1982_v15  ;;  %v432_v34 = vmul.f32 %v1986_v23, %v1974_v6  ;;  %vm419_vm4 = vmor %vm417_vm3, %vm418_vm2  ;;  %vm427_vm6 = vweird.f32 %v404_v16  ;;  %vm447_vm10 = vweird.f32 %v1982_v15 }
 0x10d   : > { %v413_v18 = vmul.f32 %v1736_v14, %v412_v17  ;;  %1743 = vrsqrt.f32 %v404_v16  ;;  %vm438_vm14 = vweird.f32 %v1986_v23 }
 0x10e   : > { %v433_v47 = vmul.f32 %v1986_v23, %v432_v34  ;;  %vm2062_vm3 = vmor %vm437_vm13, %vm438_vm14 }
 0x10f   : > { %v414_v19 = vmul.f32 0.5, %v413_v18  ;;  %v391_v20 = vpop.xlane.xlu2 %390  ;;  %v385_v21 = vpop.xlane.xlu0 %384 }
 0x110   : > { %v401_v24 = vmul.f32 %v391_v20, %v1916_v22  ;;  %v399_v25 = vmul.f32 %v385_v21, %v1916_v22  ;;  %v434_v61 = vmul.f32 0.5, %v433_v47 }
 0x111   : > { %v1990_v26 = vpop.eup %1739  ;;  %v415_v27 = vsub.f32 1.5, %v414_v19 }
 0x112   : > { %v1992_v30 = vpop.eup %1741  ;;  %v462_v31 = vmul.f32 %v1990_v26, %v1979_v13  ;;  %v1996_v32 = vadd.f32 1e-05, %v401_v24  ;;  %v2002_v36 = vadd.f32 1e-05, %v399_v25  ;;  %vm468_vm8 = vweird.f32 %v1990_v26 }
 0x113   : > { %v1744_v33 = vpop.eup %1743  ;;  %v442_v35 = vmul.f32 %v1992_v30, %v1982_v15  ;;  %v416_v37 = vmul.f32 %v1736_v14, %v415_v27  ;;  %v435_v7 = vsub.f32 1.5, %v434_v61  ;;  %vm448_vm11 = vweird.f32 %v1992_v30  ;;  %vm2040_vm12 = vmor %vm467_vm7, %vm468_vm8 }
 0x114   : > { %v463_v38 = vmul.f32 %v1990_v26, %v462_v31  ;;  %v422_v39 = vmul.f32 %v1744_v33, %v404_v16  ;;  %1745 = vrsqrt.f32 %v1996_v32  ;;  %vm428_vm5 = vweird.f32 %v1744_v33  ;;  %vm2052_vm15 = vmor %vm447_vm10, %vm448_vm11 }
 0x115   : > { %v443_v42 = vmul.f32 %v1992_v30, %v442_v35  ;;  %1747 = vrsqrt.f32 %v2002_v36  ;;  %v420_v48 = vsel %vm419_vm4, %v1736_v14, %v416_v37  ;;  %vm429_vm9 = vmor %vm427_vm6, %vm428_vm5  ;;  %v436_v18 = vmul.f32 %v1986_v23, %v435_v7 }
 0x116   : > { %v464_v44 = vmul.f32 0.5, %v463_v38  ;;  %v423_v45 = vmul.f32 %v1744_v33, %v422_v39  ;;  %v491_v59 = vmul.f32 %v420_v48, %v1922_v29  ;;  %vm457_vm2 = vweird.f32 %v2002_v36 }
 0x117   : > { %v394_v46 = vpop.xlane.xlu0 %393  ;;  %v444_v52 = vmul.f32 0.5, %v443_v42  ;;  %vm477_vm7 = vweird.f32 %v1996_v32  ;;  %vm636_vm11 = vcmask 130048  }
 0x118   : > { %v424_v50 = vmul.f32 0.5, %v423_v45  ;;  %v402_v51 = vmul.f32 %v394_v46, %v1916_v22  ;;  %v465_v53 = vsub.f32 1.5, %v464_v44  ;;  %v503_v4 = vmul.f32 %v2018_v60, %v491_v59 }
 0x119   : > { %v445_v22 = vsub.f32 1.5, %v444_v52 }
 0x11a   : > { %v425_v54 = vsub.f32 1.5, %v424_v50  ;;  %v2010_v56 = vadd.f32 1e-05, %v402_v51  ;;  %v2012_v58 = vpop.eup %1745  ;;  %v466_v0 = vmul.f32 %v1990_v26, %v465_v53  ;;  %v515_v16 = vadd.f32 %v2032_v5, %v503_v4 }
 0x11b   : > { %v1748_v63 = vpop.eup %1747  ;;  %v472_v1 = vmul.f32 %v2012_v58, %v1996_v32  ;;  %v446_v11 = vmul.f32 %v1992_v30, %v445_v22  ;;  %vm478_vm8 = vweird.f32 %v2012_v58 }
 0x11c   : > { %v426_v62 = vmul.f32 %v1744_v33, %v425_v54  ;;  %1749 = vrsqrt.f32 %v2010_v56  ;;  %v452_v2 = vmul.f32 %v1748_v63, %v2002_v36  ;;  %v470_v10 = vsel %vm2040_vm12, %v1990_v26, %v466_v0  ;;  %vm479_vm10 = vmor %vm477_vm7, %vm478_vm8 }
 0x11d   : > { %v473_v12 = vmul.f32 %v2012_v58, %v472_v1  ;;  %vm458_vm1 = vweird.f32 %v1748_v63  ;;  %v496_v21 = vmul.f32 %v470_v10, %v1933_v40  ;;  %v450_v25 = vsel %vm2052_vm15, %v1992_v30, %v446_v11 }
 0x11e   : > { %v430_v29 = vsel %vm429_vm9, %v1744_v33, %v426_v62  ;;  %v453_v8 = vmul.f32 %v1748_v63, %v452_v2  ;;  %vm459_vm4 = vmor %vm457_vm2, %vm458_vm1  ;;  %v440_v40 = vsel %vm2062_vm3, %v1986_v23, %v436_v18  ;;  %v494_v35 = vmul.f32 %v450_v25, %v1935_v41 }
 0x11f   : > { %v492_v3 = vmul.f32 %v430_v29, %v1938_v43  ;;  %v474_v26 = vmul.f32 0.5, %v473_v12  ;;  %v508_v37 = vmul.f32 %v2018_v60, %v496_v21  ;;  %vm487_vm5 = vweird.f32 %v2010_v56 }
 0x120   : > { %v454_v14 = vmul.f32 0.5, %v453_v8  ;;  %v493_v39 = vmul.f32 %v440_v40, %v1920_v28  ;;  %v506_v44 = vmul.f32 %v2018_v60, %v494_v35 }
 0x121   : > { %v504_v43 = vmul.f32 %v2018_v60, %v492_v3  ;;  %v475_v38 = vsub.f32 1.5, %v474_v26 }
 0x122   : > { %v1750_v15 = vpop.eup %1749  ;;  %v455_v19 = vsub.f32 1.5, %v454_v14  ;;  %v505_v28 = vmul.f32 %v2018_v60, %v493_v39  ;;  %v518_v32 = vadd.f32 %v2032_v5, %v506_v44 }
 0x123   : > { %v516_v17 = vadd.f32 %v2032_v5, %v504_v43  ;;  %v482_v20 = vmul.f32 %v1750_v15, %v2010_v56  ;;  %vm488_vm6 = vweird.f32 %v1750_v15  ;;  %v476_v45 = vmul.f32 %v2012_v58, %v475_v38 }
 0x124   : > { %v456_v27 = vmul.f32 %v1748_v63, %v455_v19  ;;  %vm489_vm9 = vmor %vm487_vm5, %vm488_vm6  ;;  %v517_v51 = vadd.f32 %v2032_v5, %v505_v28 }
 0x125   : > { %v523_v6 = vpack.c.bf16 %v516_v17, %v515_v16  ;;  %v483_v31 = vmul.f32 %v1750_v15, %v482_v20  ;;  %v480_v48 = vsel %vm479_vm10, %v2012_v58, %v476_v45 }
 0x126   : > { %v460_v33 = vsel %vm459_vm4, %v1748_v63, %v456_v27  ;;  %v497_v52 = vmul.f32 %v480_v48, %v1953_v55  ;;  %v524_v53 = vpack.c.bf16 %v518_v32, %v517_v51 }
 0x127   : > { %1660 = vmatmul.msk.bf16.vlgmr.msra.gmra.mxu0 %vm315_vm0, %v523_v6  ;;  %v484_v34 = vmul.f32 0.5, %v483_v31  ;;  %v495_v36 = vmul.f32 %v460_v33, %v1948_v49  ;;  %v520_v49 = vadd.f32 %v2032_v5, %v508_v37 }
 0x128   : > { %v509_v56 = vmul.f32 %v2018_v60, %v497_v52 }
 0x129   : > { %v485_v30 = vsub.f32 1.5, %v484_v34  ;;  %v507_v42 = vmul.f32 %v2018_v60, %v495_v36 }
 0x12a   : > { %v521_v61 = vadd.f32 %v2032_v5, %v509_v56 }
 0x12b   : > { %v486_v23 = vmul.f32 %v1750_v15, %v485_v30  ;;  %v519_v41 = vadd.f32 %v2032_v5, %v507_v42 }
 0x12d   : > { %v525_v46 = vpack.c.bf16 %v520_v49, %v519_v41  ;;  %v490_v47 = vsel %vm489_vm9, %v1750_v15, %v486_v23 }
 0x12e   : > { %v498_v50 = vmul.f32 %v490_v47, %v1957_v57  ;;  %v1731_v57 = vld [vmem:[%s2510_s4] ss:$0 sm:$0xff] }
 0x12f   : > { %1662 = vmatmul.msk.bf16.vlgmr.msra.gmra.mxu2 %vm315_vm0, %v525_v46 }
 0x130   : > { %v510_v54 = vmul.f32 %v2018_v60, %v498_v50 }
 0x132   : > { %v522_v59 = vadd.f32 %v2032_v5, %v510_v54 }
 0x134   : > { %v526_v62 = vpack.c.bf16 %v522_v59, %v521_v61 }
 0x137   : > { %1661 = vmatmul.msk.bf16.gmra.mxu0 %vm315_vm0, %v524_v53 }
 0x13f   : > { %1663 = vmatmul.msk.bf16.gmra.mxu2 %vm315_vm0, %v526_v62 }
 0x1a4   : > { %v568_v58 = vpop.f32.mrf.mxu0 }
 0x1a5   : > { %v569_v55 = vadd.f32 %v1731_v57, %v568_v58 }
 0x1a7   : > { %v592_v63 = vmul.f32 0.25, %v569_v55  ;;  %v608_v0 = vpack.c.bf16 %v569_v55, %v569_v55 }
 0x1a9   : > { %v600_v1 = vpack.c.bf16 %v592_v63, %v592_v63  ;;  %v631_v3 = vunpack.c.l.b16 %v608_v0 }
 0x1ab   : > { %v626_v5 = vunpack.c.l.b16 %v600_v1 }
 0x1ac   : > { %v570_v22 = vpop.f32.mrf.mxu0 }
 0x1ad   : > { %v571_v29 = vadd.f32 %v1731_v57, %v570_v22 }
 0x1af   : > { %v593_v2 = vmul.f32 0.25, %v571_v29  ;;  %v609_v60 = vpack.c.bf16 %v571_v29, %v571_v29 }
 0x1b1   : > { %v601_v4 = vpack.c.bf16 %v593_v2, %v593_v2  ;;  %v632_v7 = vunpack.c.l.b16 %v609_v60  ;;  %v616_v60 = vld [vmem:[%s2513_s7] sm:$0xff] }
 0x1b2   : > { %v578_v43 = vpop.f32.mrf.mxu2 }
 0x1b3   : > { %v627_v8 = vunpack.c.l.b16 %v601_v4  ;;  %v2101_v9 = vpack.c.b16 %v632_v7, %v631_v3  ;;  %v579_v12 = vadd.f32 %v1731_v57, %v578_v43  ;;  %v618_v43 = vld [vmem:[%s2513_s7 + $0x10] sm:$0xff] }
 0x1b4   : > { %v573_v10 = vpop.f32.mrf.mxu0 }
 0x1b5   : > { %634 = vrot.lane.b32.xlu2 %v2101_v9, %s1832_s21  ;;  %v2105_v11 = vpack.c.b16 %v627_v8, %v626_v5  ;;  %v574_v14 = vadd.f32 %v1731_v57, %v573_v10  ;;  %v596_v15 = vmul.f32 0.25, %v579_v12  ;;  %v612_v16 = vpack.c.bf16 %v579_v12, %v579_v12  ;;  %v620_v8 = vld [vmem:[%s2513_s7 + $0x20] sm:$0xff] }
 0x1b7   : > { %v594_v13 = vmul.f32 0.25, %v574_v14  ;;  %v610_v17 = vpack.c.bf16 %v574_v14, %v574_v14  ;;  %v604_v6 = vpack.c.bf16 %v596_v15, %v596_v15  ;;  %v696_v40 = vunpack.c.l.b16 %v612_v16 }
 0x1b9   : > { %v602_v24 = vpack.c.bf16 %v594_v13, %v594_v13  ;;  %v664_v33 = vunpack.c.l.b16 %v610_v17  ;;  %v691_v38 = vunpack.c.l.b16 %v604_v6 }
 0x1ba   : > { %v580_v18 = vpop.f32.mrf.mxu2 }
 0x1bb   : > { %v581_v20 = vadd.f32 %v1731_v57, %v580_v18  ;;  %v659_v30 = vunpack.c.l.b16 %v602_v24  ;;  %v617_v18 = vld [vmem:[%s2513_s7 + $0x8] sm:$0xff] }
 0x1bc   : > { %v575_v19 = vpop.f32.mrf.mxu0 }
 0x1bd   : > { %v576_v21 = vadd.f32 %v1731_v57, %v575_v19  ;;  %v597_v25 = vmul.f32 0.25, %v581_v20  ;;  %v613_v26 = vpack.c.bf16 %v581_v20, %v581_v20  ;;  %v621_v19 = vld [vmem:[%s2513_s7 + $0x28] sm:$0xff]  ;;  %v619_v20 = vld [vmem:[%s2513_s7 + $0x18] sm:$0xff] }
 0x1bf   : > { %v595_v27 = vmul.f32 0.25, %v576_v21  ;;  %v611_v31 = vpack.c.bf16 %v576_v21, %v576_v21  ;;  %v605_v34 = vpack.c.bf16 %v597_v25, %v597_v25  ;;  %v697_v35 = vunpack.c.l.b16 %v613_v26 }
 0x1c1   : > { %v603_v36 = vpack.c.bf16 %v595_v27, %v595_v27  ;;  %v665_v37 = vunpack.c.l.b16 %v611_v31  ;;  %v692_v39 = vunpack.c.l.b16 %v605_v34  ;;  %v2107_v42 = vpack.c.b16 %v697_v35, %v696_v40  ;;  %v623_v34 = vld [vmem:[%s2513_s7 + $0x38] sm:$0xff] }
 0x1c2   : > { %v583_v49 = vpop.f32.mrf.mxu2 }
 0x1c3   : > { %v660_v23 = vunpack.c.l.b16 %v603_v36  ;;  %v2109_v41 = vpack.c.b16 %v665_v37, %v664_v33  ;;  %699 = vrot.lane.b32.xlu0 %v2107_v42, %s1832_s21  ;;  %v2117_v45 = vpack.c.b16 %v692_v39, %v691_v38  ;;  %v584_v46 = vadd.f32 %v1731_v57, %v583_v49  ;;  %v622_v33 = vld [vmem:[%s2513_s7 + $0x30] sm:$0xff] }
 0x1c5   : > { %v2111_v44 = vpack.c.b16 %v660_v23, %v659_v30  ;;  %667 = vrot.lane.b32.xlu1 %v2109_v41, %s1832_s21  ;;  %v598_v28 = vmul.f32 0.25, %v584_v46  ;;  %v614_v32 = vpack.c.bf16 %v584_v46, %v584_v46 }
 0x1c7   : > { %v606_v50 = vpack.c.bf16 %v598_v28, %v598_v28  ;;  %v728_v53 = vunpack.c.l.b16 %v614_v32 }
 0x1c9   : > { %v723_v59 = vunpack.c.l.b16 %v606_v50 }
 0x1ca   : > { %v585_v47 = vpop.f32.mrf.mxu2 }
 0x1cb   : > { %v586_v48 = vadd.f32 %v1731_v57, %v585_v47 }
 0x1cd   : > { %v599_v51 = vmul.f32 0.25, %v586_v48  ;;  %v615_v52 = vpack.c.bf16 %v586_v48, %v586_v48 }
 0x1cf   : > { %v607_v54 = vpack.c.bf16 %v599_v51, %v599_v51  ;;  %v729_v56 = vunpack.c.l.b16 %v615_v52 }
 0x1d1   : > { %v724_v61 = vunpack.c.l.b16 %v607_v54  ;;  %v2119_v62 = vpack.c.b16 %v729_v56, %v728_v53 }
 0x1d3   : > { %v2121_v58 = vpack.c.b16 %v724_v61, %v723_v59  ;;  %731 = vrot.lane.b32.xlu2 %v2119_v62, %s1832_s21  ;;  %s1834_s21 = smov 80  }
 0x20f   : > { %v635_v55 = vpop.permute.xlu2 %634 }
 0x210   : > { %v641_v63 = vsel %vm636_vm11, %v635_v55, 0 }
 0x211   : > { %650 = vmatpush.bf16.xpose.msra.mxu1 %v641_v63 }
 0x218   : > { %1664 = vmatmul.msk.bf16.vlgmr.msra.gmra.mxu1 %vm636_vm11, %v2105_v11 }
 0x22d   : > { %v732_v57 = vpop.permute.xlu2 %731 }
 0x22e   : > { %v737_v22 = vsel %vm636_vm11, %v732_v57, 0 }
 0x22f   : > { %746 = vmatpush.bf16.xpose.msrb.mxu1 %v737_v22 }
 0x235   : > { %v700_v0 = vpop.permute.xlu0 %699 }
 0x236   : > { %1667 = vmatmul.msk.bf16.vlgmr.msrb.gmra.mxu1 %vm636_vm11, %v2121_v58  ;;  %v705_v1 = vsel %vm636_vm11, %v700_v0, 0 }
 0x237   : > { %v668_v29 = vpop.permute.xlu1 %667  ;;  %714 = vmatpush.bf16.xpose.msra.mxu3 %v705_v1 }
 0x238   : > { %v673_v2 = vsel %vm636_vm11, %v668_v29, 0 }
 0x239   : > { %682 = vmatpush.bf16.xpose.msrb.mxu2 %v673_v2 }
 0x23e   : > { %1666 = vmatmul.msk.bf16.vlgmr.msra.gmra.mxu3 %vm636_vm11, %v2117_v45 }
 0x240   : > { %1665 = vmatmul.msk.bf16.vlgmr.msrb.gmra.mxu2 %vm636_vm11, %v2111_v44 }
 0x295   : > { %v652_v3 = vpop.f32.mrf.mxu1 }
 0x296   : > { %v653_v4 = vadd.f32 %v652_v3, %v616_v60 }
 0x298   : > { %v753_v7 = vsel %vm636_vm11, %v653_v4, -inf }
 0x299   : > { %754 = vmax.xlane.f32.xlu2 %v753_v7 }
 0x29d   : > { %v654_v5 = vpop.f32.mrf.mxu1 }
 0x29e   : > { %v655_v21 = vadd.f32 %v654_v5, %v617_v18 }
 0x2a0   : > { %v756_v31 = vsel %vm636_vm11, %v655_v21, -inf }
 0x2b3   : > { %v748_v13 = vpop.f32.mrf.mxu1 }
 0x2b4   : > { %v749_v36 = vadd.f32 %v748_v13, %v622_v33 }
 0x2b6   : > { %v771_v38 = vsel %vm636_vm11, %v749_v36, -inf }
 0x2bb   : > { %v750_v35 = vpop.f32.mrf.mxu1 }
 0x2bc   : > { %v2167_v37 = vadd.f32 %v750_v35, %v623_v34 }
 0x2be   : > { %v774_v30 = vsel %vm636_vm11, %v2167_v37, -inf }
 0x2c1   : > { %v716_v10 = vpop.f32.mrf.mxu3 }
 0x2c2   : > { %v717_v14 = vadd.f32 %v716_v10, %v620_v8 }
 0x2c3   : > { %v684_v12 = vpop.f32.mrf.mxu2 }
 0x2c4   : > { %v685_v15 = vadd.f32 %v684_v12, %v618_v43  ;;  %v765_v16 = vsel %vm636_vm11, %v717_v14, -inf }
 0x2c5   : > { %766 = vmax.xlane.f32.xlu0 %v765_v16 }
 0x2c6   : > { %v759_v17 = vsel %vm636_vm11, %v685_v15, -inf }
 0x2c7   : > { %760 = vmax.xlane.f32.xlu1 %v759_v17 }
 0x2c9   : > { %v718_v6 = vpop.f32.mrf.mxu3 }
 0x2ca   : > { %v719_v25 = vadd.f32 %v718_v6, %v621_v19 }
 0x2cb   : > { %v686_v24 = vpop.f32.mrf.mxu2 }
 0x2cc   : > { %v687_v26 = vadd.f32 %v686_v24, %v619_v20  ;;  %v768_v27 = vsel %vm636_vm11, %v719_v25, -inf }
 0x2cd   : > { %769 = vmax.xlane.f32.xlu2 %v768_v27 }
 0x2ce   : > { %v762_v40 = vsel %vm636_vm11, %v687_v26, -inf }
 0x2cf   : > { %757 = vmax.xlane.f32.xlu1 %v756_v31  ;;  %763 = vmax.xlane.f32.xlu0 %v762_v40 }
 0x2d7   : > { %772 = vmax.xlane.f32.xlu1 %v771_v38  ;;  %775 = vmax.xlane.f32.xlu0 %v774_v30 }
 0x2e5   : > { %983 = vrot.lane.b32.xlu2 %v2109_v41, %s1833_s20 }
 0x30c   : > { %v755_v39 = vpop.xlane.xlu2 %754 }
 0x30d   : > { %v777_v23 = vsub.f32 %v653_v4, %v755_v39 }
 0x30f   : > { %v785_v49 = vmul.f32 1.442695, %v777_v23 }
 0x311   : > { %1751 = vpow2.f32 %v785_v49 }
 0x317   : > { %v2174_v46 = vpop.eup %1751 }
 0x318   : > { %v801_v28 = vsel %vm636_vm11, %v2174_v46, 0.0 }
 0x319   : > { %802 = vadd.xlane.f32.xlu0 %v801_v28 }
 0x338   : > { %v767_v47 = vpop.xlane.xlu0 %766 }
 0x339   : > { %v781_v48 = vsub.f32 %v717_v14, %v767_v47 }
 0x33a   : > { %v761_v32 = vpop.xlane.xlu1 %760 }
 0x33b   : > { %v793_v50 = vmul.f32 1.442695, %v781_v48  ;;  %v779_v55 = vsub.f32 %v685_v15, %v761_v32 }
 0x33d   : > { %1753 = vpow2.f32 %v793_v50  ;;  %v789_v22 = vmul.f32 1.442695, %v779_v55 }
 0x340   : > { %v770_v51 = vpop.xlane.xlu2 %769 }
 0x341   : > { %v782_v53 = vsub.f32 %v719_v25, %v770_v51 }
 0x342   : > { %v758_v52 = vpop.xlane.xlu1 %757  ;;  %v764_v57 = vpop.xlane.xlu0 %763 }
 0x343   : > { %v778_v54 = vsub.f32 %v655_v21, %v758_v52  ;;  %v2178_v56 = vpop.eup %1753  ;;  %v795_v59 = vmul.f32 1.442695, %v782_v53  ;;  %v780_v60 = vsub.f32 %v687_v26, %v764_v57 }
 0x344   : > { %v813_v63 = vsel %vm636_vm11, %v2178_v56, 0.0 }
 0x345   : > { %v787_v61 = vmul.f32 1.442695, %v778_v54  ;;  %1755 = vpow2.f32 %v795_v59  ;;  %814 = vadd.xlane.f32.xlu1 %v813_v63  ;;  %v791_v8 = vmul.f32 1.442695, %v780_v60 }
 0x347   : > { %1757 = vpow2.f32 %v787_v61 }
 0x348   : > { %v984_v0 = vpop.permute.xlu2 %983  ;;  %1759 = vpow2.f32 %v789_v22 }
 0x349   : > { %996 = vmatpush.bf16.msrb.mxu3 %v984_v0 }
 0x34a   : > { %v773_v29 = vpop.xlane.xlu1 %772  ;;  %v776_v16 = vpop.xlane.xlu0 %775 }
 0x34b   : > { %v783_v1 = vsub.f32 %v749_v36, %v773_v29  ;;  %v2182_v2 = vpop.eup %1755  ;;  %v784_v17 = vsub.f32 %v2167_v37, %v776_v16 }
 0x34c   : > { %v816_v7 = vsel %vm636_vm11, %v2182_v2, 0.0 }
 0x34d   : > { %v797_v3 = vmul.f32 1.442695, %v783_v1  ;;  %v2184_v4 = vpop.eup %1757  ;;  %817 = vadd.xlane.f32.xlu0 %v816_v7  ;;  %v799_v18 = vmul.f32 1.442695, %v784_v17 }
 0x34e   : > { %v804_v5 = vsel %vm636_vm11, %v2184_v4, 0.0  ;;  %v2190_v43 = vpop.eup %1759 }
 0x34f   : > { %1761 = vpow2.f32 %v797_v3  ;;  %805 = vadd.xlane.f32.xlu2 %v804_v5  ;;  %v807_v14 = vsel %vm636_vm11, %v2190_v43, 0.0 }
 0x350   : > { %1763 = vpow2.f32 %v791_v8 }
 0x351   : > { %1765 = vpow2.f32 %v799_v18 }
 0x355   : > { %v2192_v10 = vpop.eup %1761 }
 0x356   : > { %v819_v12 = vsel %vm636_vm11, %v2192_v10, 0.0  ;;  %v2198_v15 = vpop.eup %1763 }
 0x357   : > { %820 = vadd.xlane.f32.xlu1 %v819_v12  ;;  %808 = vadd.xlane.f32.xlu2 %v807_v14  ;;  %v810_v13 = vsel %vm636_vm11, %v2198_v15, 0.0 }
 0x35f   : > { %811 = vadd.xlane.f32.xlu1 %v810_v13 }
 0x361   : > { %1068 = vrot.lane.b32.xlu0 %v2101_v9, %s1834_s21 }
 0x369   : > { %1033 = vrot.lane.b32.xlu0 %v2119_v62, %s1833_s20 }
 0x36f   : > { %1066 = vrot.lane.b32.xlu2 %v2105_v11, %s1835_s22  ;;  %v2215_v11 = vpop.eup %1765 }
 0x370   : > { %v822_v19 = vsel %vm636_vm11, %v2215_v11, 0.0 }
 0x377   : > { %1008 = vrot.lane.b32.xlu2 %v2107_v42, %s1833_s20 }
 0x378   : > { %958 = vrot.lane.b32.xlu1 %v2101_v9, %s1833_s20 }
 0x37f   : > { %1116 = vrot.lane.b32.xlu2 %v2107_v42, %s1834_s21 }
 0x380   : > { %1092 = vrot.lane.b32.xlu1 %v2109_v41, %s1834_s21 }
 0x387   : > { %1140 = vrot.lane.b32.xlu2 %v2119_v62, %s1834_s21  ;;  %s1836_s21 = smov 48  }
 0x388   : > { %1114 = vrot.lane.b32.xlu1 %v2117_v45, %s1835_s22 }
 0x38c   : > { %v2221_v20 = vpop.xlane.xlu0 %802 }
 0x38d   : > { %v836_v60 = vand.u32 2147483648, %v2221_v20 }
 0x393   : > { %823 = vadd.xlane.f32.xlu0 %v822_v19 }
 0x3a7   : > { %1090 = vrot.lane.b32.xlu0 %v2111_v44, %s1835_s22 }
 0x3af   : > { %1138 = vrot.lane.b32.xlu0 %v2121_v58, %s1835_s22 }
 0x3b8   : > { %v815_v21 = vpop.xlane.xlu1 %814 }
 0x3b9   : > { %1767 = vrcp.f32 %v815_v21  ;;  %v896_v40 = vand.u32 2147483648, %v815_v21  ;;  %vm890_vm13 = vweird.f32 %v815_v21  ;;  %v894_v36 = vand.u32 2147483647, %v815_v21 }
 0x3ba   : > { %1769 = vrcp.f32 %v2221_v20 }
 0x3bb   : > { %v897_v49 = vor.u32 1.1754944e-38, %v896_v40  ;;  %vm895_vm1 = vcmp.eq.f32.partialorder %v894_v36, 8.507059e+37  ;;  %v837_v36 = vor.u32 1.1754944e-38, %v836_v60 }
 0x3bf   : > { %v1768_v6 = vpop.eup %1767 }
 0x3c0   : > { %v886_v24 = vmul.f32 %v1768_v6, %v815_v21  ;;  %v818_v45 = vpop.xlane.xlu0 %817  ;;  %v2227_v31 = vpop.eup %1769  ;;  %vm891_vm12 = vweird.f32 %v1768_v6 }
 0x3c1   : > { %1771 = vrcp.f32 %v818_v45  ;;  %v826_v30 = vmul.f32 %v2227_v31, %v2221_v20  ;;  %vm892_vm14 = vmor %vm890_vm13, %vm891_vm12  ;;  %v911_v28 = vand.u32 2147483648, %v818_v45  ;;  %v909_v32 = vand.u32 2147483647, %v818_v45 }
 0x3c2   : > { %v2224_v25 = vpop.xlane.xlu2 %805  ;;  %v887_v26 = vsub.f32 1.0, %v886_v24  ;;  %vm905_vm2 = vweird.f32 %v818_v45  ;;  %vm831_vm5 = vweird.f32 %v2227_v31  ;;  %vm830_vm12 = vweird.f32 %v2221_v20 }
 0x3c3   : > { %1773 = vrcp.f32 %v2224_v25  ;;  %v827_v50 = vsub.f32 1.0, %v826_v30  ;;  %v912_v53 = vor.u32 1.1754944e-38, %v911_v28  ;;  %vm910_vm4 = vcmp.eq.f32.partialorder %v909_v32, 8.507059e+37 }
 0x3c4   : > { %v888_v27 = vmul.f32 %v1768_v6, %v887_v26  ;;  %v851_v14 = vand.u32 2147483648, %v2224_v25  ;;  %vm845_vm8 = vweird.f32 %v2224_v25  ;;  %v849_v16 = vand.u32 2147483647, %v2224_v25 }
 0x3c5   : > { %v828_v29 = vmul.f32 %v2227_v31, %v827_v50 }
 0x3c6   : > { %v889_v58 = vadd.f32 %v1768_v6, %v888_v27 }
 0x3c7   : > { %v1772_v44 = vpop.eup %1771 }
 0x3c8   : > { %v901_v34 = vmul.f32 %v1772_v44, %v818_v45  ;;  %v893_v23 = vsel %vm892_vm14, %v1768_v6, %v889_v58  ;;  %vm906_vm15 = vweird.f32 %v1772_v44  ;;  %v834_v45 = vand.u32 2147483647, %v2221_v20  ;;  %vm2278_vm14 = vmor %vm830_vm12, %vm831_vm5 }
 0x3c9   : > { %v2229_v33 = vpop.eup %1773  ;;  %v898_v51 = vsel %vm895_vm1, %v897_v49, %v893_v23  ;;  %vm907_vm3 = vmor %vm905_vm2, %vm906_vm15  ;;  %v852_v58 = vor.u32 1.1754944e-38, %v851_v14  ;;  %vm850_vm15 = vcmp.eq.f32.partialorder %v849_v16, 8.507059e+37 }
 0x3ca   : > { %v2231_v35 = vpop.xlane.xlu1 %820  ;;  %v841_v37 = vmul.f32 %v2229_v33, %v2224_v25  ;;  %v2235_v38 = vpop.xlane.xlu2 %808  ;;  %v902_v39 = vsub.f32 1.0, %v901_v34  ;;  %v899_v63 = vmul.f32 %v2178_v56, %v898_v51  ;;  %vm846_vm6 = vweird.f32 %v2229_v33 }
 0x3cb   : > { %1775 = vrcp.f32 %v2235_v38  ;;  %v866_v17 = vand.u32 2147483648, %v2235_v38  ;;  %vm2260_vm9 = vmor %vm845_vm8, %vm846_vm6  ;;  %vm860_vm10 = vweird.f32 %v2235_v38  ;;  %v864_v6 = vand.u32 2147483647, %v2235_v38 }
 0x3cc   : > { %v903_v47 = vmul.f32 %v1772_v44, %v902_v39  ;;  %v842_v48 = vsub.f32 1.0, %v841_v37  ;;  %v949_v12 = vpack.c.bf16 %v899_v63, %v899_v63  ;;  %vm835_vm2 = vcmp.eq.f32.partialorder %v834_v45, 8.507059e+37 }
 0x3cd   : > { %v867_v37 = vor.u32 1.1754944e-38, %v866_v17  ;;  %vm865_vm1 = vcmp.eq.f32.partialorder %v864_v6, 8.507059e+37  ;;  %v926_v19 = vand.u32 2147483648, %v2231_v35  ;;  %vm920_vm8 = vweird.f32 %v2231_v35 }
 0x3ce   : > { %v904_v52 = vadd.f32 %v1772_v44, %v903_v47  ;;  %v843_v61 = vmul.f32 %v2229_v33, %v842_v48 }
 0x3d0   : > { %v908_v59 = vsel %vm907_vm3, %v1772_v44, %v904_v52  ;;  %v844_v56 = vadd.f32 %v2229_v33, %v843_v61  ;;  %v1005_v44 = vunpack.c.l.b16 %v949_v12 }
 0x3d1   : > { %v1776_v54 = vpop.eup %1775  ;;  %v913_v57 = vsel %vm910_vm4, %v912_v53, %v908_v59 }
 0x3d2   : > { %v2241_v55 = vpop.xlane.xlu1 %811  ;;  %v856_v22 = vmul.f32 %v1776_v54, %v2235_v38  ;;  %v2245_v0 = vpop.permute.xlu2 %1066  ;;  %v914_v1 = vmul.f32 %v2182_v2, %v913_v57  ;;  %vm861_vm7 = vweird.f32 %v1776_v54  ;;  %v829_v2 = vadd.f32 %v2227_v31, %v828_v29 }
 0x3d3   : > { %1777 = vrcp.f32 %v2241_v55  ;;  %v1069_v7 = vpop.permute.xlu0 %1068  ;;  %v848_v25 = vsel %vm2260_vm9, %v2229_v33, %v844_v56  ;;  %vm2272_vm13 = vmor %vm860_vm10, %vm861_vm7  ;;  %v881_v49 = vand.u32 2147483648, %v2241_v55  ;;  %v879_v32 = vand.u32 2147483647, %v2241_v55 }
 0x3d4   : > { %v857_v3 = vsub.f32 1.0, %v856_v22  ;;  %v950_v5 = vpack.c.bf16 %v914_v1, %v914_v1  ;;  %v1074_v8 = vsel %vm636_vm11, %v1069_v7, 0  ;;  %v833_v33 = vsel %vm2278_vm14, %v2227_v31, %v829_v2 }
 0x3d5   : > { %1083 = vmatpush.bf16.xpose.msra.mxu3 %v1074_v8  ;;  %v853_v38 = vsel %vm850_vm15, %v852_v58, %v848_v25  ;;  %v838_v28 = vsel %vm835_vm2, %v837_v36, %v833_v33  ;;  %vm875_vm4 = vweird.f32 %v2241_v55  ;;  %v882_v52 = vor.u32 1.1754944e-38, %v881_v49 }
 0x3d6   : > { %v858_v13 = vmul.f32 %v1776_v54, %v857_v3  ;;  %v1006_v18 = vunpack.c.l.b16 %v950_v5  ;;  %v854_v31 = vmul.f32 %v2184_v4, %v853_v38  ;;  %v839_v51 = vmul.f32 %v2174_v46, %v838_v28 }
 0x3d7   : > { %vm880_vm6 = vcmp.eq.f32.partialorder %v879_v32, 8.507059e+37  ;;  %1779 = vrcp.f32 %v2231_v35  ;;  %v927_v25 = vor.u32 1.1754944e-38, %v926_v19 }
 0x3d8   : > { %v859_v21 = vadd.f32 %v1776_v54, %v858_v13  ;;  %v1007_v39 = vpack.c.b16 %v1006_v18, %v1005_v44  ;;  %v946_v59 = vpack.c.bf16 %v854_v31, %v854_v31  ;;  %v945_v22 = vpack.c.bf16 %v839_v51, %v839_v51 }
 0x3d9   : > { %v1778_v24 = vpop.eup %1777 }
 0x3da   : > { %v863_v20 = vsel %vm2272_vm13, %v1776_v54, %v859_v21  ;;  %v871_v40 = vmul.f32 %v1778_v24, %v2241_v55  ;;  %v1009_v34 = vpop.permute.xlu2 %1008  ;;  %vm876_vm3 = vweird.f32 %v1778_v24  ;;  %v956_v4 = vunpack.c.l.b16 %v946_v59 }
 0x3db   : > { %1021 = vmatpush.bf16.msra.mxu1 %v1009_v34  ;;  %v868_v23 = vsel %vm865_vm1, %v867_v37, %v863_v20  ;;  %vm877_vm5 = vmor %vm875_vm4, %vm876_vm3  ;;  %v955_v55 = vunpack.c.l.b16 %v945_v22  ;;  %v924_v21 = vand.u32 2147483647, %v2231_v35 }
 0x3dc   : > { %v872_v30 = vsub.f32 1.0, %v871_v40  ;;  %v869_v50 = vmul.f32 %v2190_v43, %v868_v23  ;;  %v1034_v43 = vpop.permute.xlu0 %1033 }
 0x3dd   : > { %v957_v56 = vpack.c.b16 %v956_v4, %v955_v55  ;;  %v1780_v14 = vpop.eup %1779  ;;  %vm925_vm10 = vcmp.eq.f32.partialorder %v924_v21, 8.507059e+37  ;;  %v1679_v21 = vld [vmem:[%s2513_s7 + $0x78] sm:$0xff] }
 0x3de   : > { %v873_v47 = vmul.f32 %v1778_v24, %v872_v30  ;;  %1670 = vmatmul.msk.bf16.vlgmr.msra.gmra.mxu1 %vm636_vm11, %v1007_v39  ;;  %v947_v57 = vpack.c.bf16 %v869_v50, %v869_v50  ;;  %v916_v13 = vmul.f32 %v1780_v14, %v2231_v35  ;;  %vm921_vm7 = vweird.f32 %v1780_v14 }
 0x3df   : > { %vm922_vm9 = vmor %vm920_vm8, %vm921_vm7 }
 0x3e0   : > { %v874_v48 = vadd.f32 %v1778_v24, %v873_v47  ;;  %v980_v1 = vunpack.c.l.b16 %v947_v57  ;;  %v917_v2 = vsub.f32 1.0, %v916_v13  ;;  %v1673_v57 = vld [vmem:[%s2513_s7 + $0x48] sm:$0xff] }
 0x3e2   : > { %v878_v53 = vsel %vm877_vm5, %v1778_v24, %v874_v48  ;;  %v1117_v54 = vpop.permute.xlu2 %1116  ;;  %v918_v16 = vmul.f32 %v1780_v14, %v917_v2 }
 0x3e3   : > { %v883_v61 = vsel %vm880_vm6, %v882_v52, %v878_v53 }
 0x3e4   : > { %v884_v63 = vmul.f32 %v2198_v15, %v883_v61  ;;  %v1122_v15 = vsel %vm636_vm11, %v1117_v54, 0  ;;  %v919_v18 = vadd.f32 %v1780_v14, %v918_v16  ;;  %v1672_v54 = vld [vmem:[%s2513_s7 + $0x40] sm:$0xff] }
 0x3e5   : > { %v1676_v16 = vld [vmem:[%s2513_s7 + $0x60] sm:$0xff] }
 0x3e6   : > { %v948_v29 = vpack.c.bf16 %v884_v63, %v884_v63  ;;  %v923_v24 = vsel %vm922_vm9, %v1780_v14, %v919_v18 }
 0x3e7   : > { %v928_v26 = vsel %vm925_vm10, %v927_v25, %v923_v24  ;;  %v1677_v24 = vld [vmem:[%s2513_s7 + $0x68] sm:$0xff] }
 0x3e8   : > { %v981_v60 = vunpack.c.l.b16 %v948_v29  ;;  %v929_v20 = vmul.f32 %v2192_v10, %v928_v26 }
 0x3ea   : > { %v959_v3 = vpop.permute.xlu1 %958  ;;  %v1141_v7 = vpop.permute.xlu2 %1140  ;;  %v982_v46 = vpack.c.b16 %v981_v60, %v980_v1  ;;  %v951_v36 = vpack.c.bf16 %v929_v20, %v929_v20  ;;  %v1674_v1 = vld [vmem:[%s2513_s7 + $0x50] sm:$0xff] }
 0x3eb   : > { %971 = vmatpush.bf16.msra.mxu2 %v959_v3  ;;  %v1146_v5 = vsel %vm636_vm11, %v1141_v7, 0 }
 0x3ec   : > { %1669 = vmatmul.msk.bf16.vlgmr.msrb.gmra.mxu3 %vm636_vm11, %v982_v46  ;;  %v1030_v39 = vunpack.c.l.b16 %v951_v36 }
 0x3ed   : > { %1155 = vmatpush.bf16.xpose.msrb.mxu3 %v1146_v5 }
 0x3ee   : > { %1668 = vmatmul.msk.bf16.vlgmr.msra.gmra.mxu2 %vm636_vm11, %v957_v56 }
 0x3ef   : > { %1046 = vmatpush.bf16.msrb.mxu2 %v1034_v43  ;;  %v1675_v43 = vld [vmem:[%s2513_s7 + $0x58] sm:$0xff] }
 0x3f2   : > { %v1093_v8 = vpop.permute.xlu1 %1092 }
 0x3f3   : > { %1131 = vmatpush.bf16.xpose.msra.mxu2 %v1122_v15  ;;  %v1098_v12 = vsel %vm636_vm11, %v1093_v8, 0  ;;  %v1678_v15 = vld [vmem:[%s2513_s7 + $0x70] sm:$0xff] }
 0x3f4   : > { %1107 = vmatpush.bf16.xpose.msrb.mxu1 %v1098_v12 }
 0x3fa   : > { %v1115_v28 = vpop.permute.xlu1 %1114 }
 0x3fc   : > { %1680 = vmatmul.msk.bf16.vlgmr.msra.gmra.mxu3 %vm636_vm11, %v2245_v0 }
 0x406   : > { %v824_v17 = vpop.xlane.xlu0 %823 }
 0x407   : > { %1781 = vrcp.f32 %v824_v17  ;;  %v941_v27 = vand.u32 2147483648, %v824_v17  ;;  %v939_v58 = vand.u32 2147483647, %v824_v17  ;;  %vm935_vm13 = vweird.f32 %v824_v17 }
 0x409   : > { %v942_v34 = vor.u32 1.1754944e-38, %v941_v27  ;;  %vm940_vm15 = vcmp.eq.f32.partialorder %v939_v58, 8.507059e+37 }
 0x40d   : > { %v1782_v6 = vpop.eup %1781 }
 0x40e   : > { %v931_v45 = vmul.f32 %v1782_v6, %v824_v17  ;;  %vm936_vm12 = vweird.f32 %v1782_v6 }
 0x40f   : > { %vm937_vm14 = vmor %vm935_vm13, %vm936_vm12 }
 0x410   : > { %v932_v0 = vsub.f32 1.0, %v931_v45 }
 0x412   : > { %v933_v44 = vmul.f32 %v1782_v6, %v932_v0 }
 0x414   : > { %v934_v40 = vadd.f32 %v1782_v6, %v933_v44 }
 0x416   : > { %v938_v33 = vsel %vm937_vm14, %v1782_v6, %v934_v40 }
 0x417   : > { %v943_v35 = vsel %vm940_vm15, %v942_v34, %v938_v33 }
 0x418   : > { %v944_v37 = vmul.f32 %v2215_v11, %v943_v35 }
 0x419   : > { %v1091_v38 = vpop.permute.xlu0 %1090 }
 0x41a   : > { %v952_v30 = vpack.c.bf16 %v944_v37, %v944_v37  ;;  %1681 = vmatmul.msk.bf16.vlgmr.msrb.gmra.mxu1 %vm636_vm11, %v1091_v38 }
 0x41c   : > { %v1031_v23 = vunpack.c.l.b16 %v952_v30 }
 0x41e   : > { %v1032_v49 = vpack.c.b16 %v1031_v23, %v1030_v39 }
 0x420   : > { %1671 = vmatmul.msk.bf16.vlgmr.msrb.gmra.mxu2 %vm636_vm11, %v1032_v49 }
 0x421   : > { %v1139_v10 = vpop.permute.xlu0 %1138 }
 0x422   : > { %1683 = vmatmul.msk.bf16.vlgmr.msrb.gmra.mxu3 %vm636_vm11, %v1139_v10 }
 0x430   : > { %1682 = vmatmul.msk.bf16.vlgmr.msra.gmra.mxu2 %vm636_vm11, %v1115_v28 }
 0x45b   : > { %v2314_v47 = vpop.f32.mrf.mxu1 }
 0x463   : > { %v2316_v32 = vpop.f32.mrf.mxu1 }
 0x464   : > { %v1055_v11 = vpack.c.bf16 %v2316_v32, %v2314_v47 }
 0x46f   : > { %v2320_v31 = vpop.f32.mrf.mxu3 }
 0x471   : > { %v2322_v48 = vpop.f32.mrf.mxu2 }
 0x477   : > { %v2324_v50 = vpop.f32.mrf.mxu3 }
 0x478   : > { %v1054_v51 = vpack.c.bf16 %v2324_v50, %v2320_v31  ;;  %v1711_v31 = vld [vmem:[%s2511_s5 + $0x8] sm:$0xff] }
 0x479   : > { %v2328_v52 = vpop.f32.mrf.mxu2 }
 0x47a   : > { %v1053_v53 = vpack.c.bf16 %v2328_v52, %v2322_v48 }
 0x47f   : > { %v1085_v59 = vpop.f32.mrf.mxu3 }
 0x480   : > { %v1086_v61 = vadd.f32 %v1672_v54, %v1085_v59 }
 0x482   : > { %v1162_v63 = vsel %vm636_vm11, %v1086_v61, -inf }
 0x483   : > { %1163 = vmax.xlane.f32.xlu1 %v1162_v63 }
 0x487   : > { %v1087_v22 = vpop.f32.mrf.mxu3 }
 0x488   : > { %v1088_v29 = vadd.f32 %v1673_v57, %v1087_v22 }
 0x48a   : > { %v1165_v4 = vsel %vm636_vm11, %v1088_v29, -inf }
 0x48b   : > { %1166 = vmax.xlane.f32.xlu2 %v1165_v4 }
 0x497   : > { %v1109_v60 = vpop.f32.mrf.mxu1 }
 0x498   : > { %v1110_v55 = vadd.f32 %v1674_v1, %v1109_v60 }
 0x49a   : > { %v1168_v3 = vsel %vm636_vm11, %v1110_v55, -inf }
 0x49b   : > { %1169 = vmax.xlane.f32.xlu0 %v1168_v3 }
 0x49f   : > { %v1111_v7 = vpop.f32.mrf.mxu1 }
 0x4a0   : > { %v1112_v46 = vadd.f32 %v1675_v43, %v1111_v7 }
 0x4a2   : > { %v1171_v5 = vsel %vm636_vm11, %v1112_v46, -inf }
 0x4a3   : > { %v2348_v56 = vpop.f32.mrf.mxu2  ;;  %1172 = vmax.xlane.f32.xlu1 %v1171_v5 }
 0x4a5   : > { %v1157_v8 = vpop.f32.mrf.mxu3 }
 0x4a6   : > { %v2353_v12 = vadd.f32 %v1678_v15, %v1157_v8 }
 0x4a8   : > { %v1180_v14 = vsel %vm636_vm11, %v2353_v12, -inf }
 0x4ab   : > { %v2357_v13 = vpop.f32.mrf.mxu2  ;;  %1181 = vmax.xlane.f32.xlu1 %v1180_v14 }
 0x4ac   : > { %v1056_v2 = vpack.c.bf16 %v2357_v13, %v2348_v56 }
 0x4ad   : > { %v1159_v6 = vpop.f32.mrf.mxu3 }
 0x4ae   : > { %v1160_v45 = vadd.f32 %v1679_v21, %v1159_v6 }
 0x4b0   : > { %v1183_v27 = vsel %vm636_vm11, %v1160_v45, -inf }
 0x4b3   : > { %v1133_v17 = vpop.f32.mrf.mxu2 }
 0x4b4   : > { %v1134_v18 = vadd.f32 %v1676_v16, %v1133_v17 }
 0x4b6   : > { %v1174_v19 = vsel %vm636_vm11, %v1134_v18, -inf }
 0x4b7   : > { %1175 = vmax.xlane.f32.xlu2 %v1174_v19 }
 0x4bb   : > { %v1135_v25 = vpop.f32.mrf.mxu2 }
 0x4bc   : > { %v1136_v0 = vadd.f32 %v1677_v24, %v1135_v25 }
 0x4be   : > { %v1177_v26 = vsel %vm636_vm11, %v1136_v0, -inf }
 0x4bf   : > { %1178 = vmax.xlane.f32.xlu0 %v1177_v26  ;;  %1184 = vmax.xlane.f32.xlu2 %v1183_v27 }
 0x4f6   : > { %v1164_v33 = vpop.xlane.xlu1 %1163 }
 0x4f7   : > { %v1186_v23 = vsub.f32 %v1086_v61, %v1164_v33 }
 0x4f9   : > { %v1194_v28 = vmul.f32 1.442695, %v1186_v23 }
 0x4fe   : > { %v1167_v44 = vpop.xlane.xlu2 %1166 }
 0x4ff   : > { %v1187_v58 = vsub.f32 %v1088_v29, %v1167_v44 }
 0x501   : > { %v1196_v20 = vmul.f32 1.442695, %v1187_v58 }
 0x503   : > { %1783 = vpow2.f32 %v1196_v20 }
 0x509   : > { %v2373_v40 = vpop.eup %1783 }
 0x50a   : > { %v1213_v34 = vsel %vm636_vm11, %v2373_v40, 0.0 }
 0x50b   : > { %1214 = vadd.xlane.f32.xlu1 %v1213_v34 }
 0x50e   : > { %v1170_v35 = vpop.xlane.xlu0 %1169 }
 0x50f   : > { %v1188_v36 = vsub.f32 %v1110_v55, %v1170_v35 }
 0x511   : > { %v1198_v37 = vmul.f32 1.442695, %v1188_v36 }
 0x513   : > { %1785 = vpow2.f32 %v1198_v37 }
 0x516   : > { %v1173_v38 = vpop.xlane.xlu1 %1172 }
 0x517   : > { %v1189_v30 = vsub.f32 %v1112_v46, %v1173_v38 }
 0x519   : > { %v2377_v39 = vpop.eup %1785  ;;  %v1200_v49 = vmul.f32 1.442695, %v1189_v30 }
 0x51a   : > { %v1216_v10 = vsel %vm636_vm11, %v2377_v39, 0.0 }
 0x51b   : > { %1787 = vpow2.f32 %v1200_v49  ;;  %1217 = vadd.xlane.f32.xlu2 %v1216_v10 }
 0x51c   : > { %1789 = vpow2.f32 %v1194_v28 }
 0x51e   : > { %v1182_v1 = vpop.xlane.xlu1 %1181 }
 0x521   : > { %v2381_v54 = vpop.eup %1787 }
 0x522   : > { %v1219_v59 = vsel %vm636_vm11, %v2381_v54, 0.0  ;;  %v2387_v63 = vpop.eup %1789 }
 0x523   : > { %1220 = vadd.xlane.f32.xlu0 %v1219_v59  ;;  %v1210_v57 = vsel %vm636_vm11, %v2387_v63, 0.0 }
 0x524   : > { %1367 = vrot.lane.b32.xlu1 %v2101_v9, %s1836_s21  ;;  %v1192_v9 = vsub.f32 %v2353_v12, %v1182_v1 }
 0x526   : > { %v1206_v7 = vmul.f32 1.442695, %v1192_v9 }
 0x52a   : > { %v1176_v61 = vpop.xlane.xlu2 %1175 }
 0x52b   : > { %v1190_v22 = vsub.f32 %v1134_v18, %v1176_v61  ;;  %1211 = vadd.xlane.f32.xlu0 %v1210_v57 }
 0x52c   : > { %1417 = vrot.lane.b32.xlu1 %v2107_v42, %s1836_s21 }
 0x52d   : > { %v1202_v29 = vmul.f32 1.442695, %v1190_v22 }
 0x52f   : > { %1791 = vpow2.f32 %v1202_v29 }
 0x532   : > { %v1179_v4 = vpop.xlane.xlu0 %1178  ;;  %v1185_v46 = vpop.xlane.xlu2 %1184 }
 0x533   : > { %v1191_v60 = vsub.f32 %v1136_v0, %v1179_v4  ;;  %v1193_v42 = vsub.f32 %v1160_v45, %v1185_v46 }
 0x535   : > { %v2393_v55 = vpop.eup %1791  ;;  %v1204_v3 = vmul.f32 1.442695, %v1191_v60  ;;  %v1208_v8 = vmul.f32 1.442695, %v1193_v42 }
 0x536   : > { %v1222_v43 = vsel %vm636_vm11, %v2393_v55, 0.0 }
 0x537   : > { %1223 = vadd.xlane.f32.xlu2 %v1222_v43  ;;  %1793 = vpow2.f32 %v1204_v3 }
 0x538   : > { %1795 = vpow2.f32 %v1206_v7 }
 0x539   : > { %1797 = vpow2.f32 %v1208_v8 }
 0x53d   : > { %v2398_v5 = vpop.eup %1793 }
 0x53e   : > { %v1225_v15 = vsel %vm636_vm11, %v2398_v5, 0.0  ;;  %v2402_v14 = vpop.eup %1795 }
 0x53f   : > { %1226 = vadd.xlane.f32.xlu0 %v1225_v15  ;;  %v1228_v12 = vsel %vm636_vm11, %v2402_v14, 0.0  ;;  %v2406_v16 = vpop.eup %1797 }
 0x540   : > { %v1231_v17 = vsel %vm636_vm11, %v2406_v16, 0.0 }
 0x547   : > { %1229 = vadd.xlane.f32.xlu0 %v1228_v12 }
 0x54f   : > { %1392 = vrot.lane.b32.xlu2 %v2109_v41, %s1836_s21  ;;  %1232 = vadd.xlane.f32.xlu0 %v1231_v17 }
 0x563   : > { %1442 = vrot.lane.b32.xlu0 %v2119_v62, %s1836_s21 }
 0x57e   : > { %v1215_v18 = vpop.xlane.xlu1 %1214 }
 0x57f   : > { %1799 = vrcp.f32 %v1215_v18  ;;  %vm1254_vm5 = vweird.f32 %v1215_v18  ;;  %v1260_v10 = vand.u32 2147483648, %v1215_v18  ;;  %v1258_v61 = vand.u32 2147483647, %v1215_v18 }
 0x581   : > { %v1261_v43 = vor.u32 1.1754944e-38, %v1260_v10  ;;  %vm1259_vm13 = vcmp.eq.f32.partialorder %v1258_v61, 8.507059e+37 }
 0x585   : > { %v1800_v21 = vpop.eup %1799 }
 0x586   : > { %v1250_v24 = vmul.f32 %v1800_v21, %v1215_v18  ;;  %vm1255_vm1 = vweird.f32 %v1800_v21 }
 0x587   : > { %vm2419_vm7 = vmor %vm1254_vm5, %vm1255_vm1 }
 0x588   : > { %v1251_v26 = vsub.f32 1.0, %v1250_v24 }
 0x58a   : > { %v1252_v58 = vmul.f32 %v1800_v21, %v1251_v26 }
 0x58c   : > { %v1253_v36 = vadd.f32 %v1800_v21, %v1252_v58 }
 0x58e   : > { %v1218_v19 = vpop.xlane.xlu2 %1217  ;;  %v1257_v4 = vsel %vm2419_vm7, %v1800_v21, %v1253_v36 }
 0x58f   : > { %1801 = vrcp.f32 %v1218_v19  ;;  %vm1269_vm3 = vweird.f32 %v1218_v19  ;;  %v1275_v37 = vand.u32 2147483648, %v1218_v19  ;;  %v1273_v30 = vand.u32 2147483647, %v1218_v19 }
 0x590   : > { %v1262_v8 = vsel %vm1259_vm13, %v1261_v43, %v1257_v4 }
 0x591   : > { %v1276_v1 = vor.u32 1.1754944e-38, %v1275_v37  ;;  %vm1274_vm10 = vcmp.eq.f32.partialorder %v1273_v30, 8.507059e+37 }
 0x595   : > { %v1802_v6 = vpop.eup %1801 }
 0x596   : > { %v1368_v45 = vpop.permute.xlu1 %1367  ;;  %v1265_v25 = vmul.f32 %v1802_v6, %v1218_v19  ;;  %v1221_v0 = vpop.xlane.xlu0 %1220  ;;  %vm1270_vm2 = vweird.f32 %v1802_v6 }
 0x597   : > { %1380 = vmatpush.bf16.msrb.mxu0 %v1368_v45  ;;  %1803 = vrcp.f32 %v1221_v0  ;;  %v1290_v38 = vand.u32 2147483648, %v1221_v0  ;;  %v1288_v49 = vand.u32 2147483647, %v1221_v0  ;;  %vm2414_vm6 = vmor %vm1269_vm3, %vm1270_vm2  ;;  %vm1284_vm8 = vweird.f32 %v1221_v0 }
 0x598   : > { %v1266_v41 = vsub.f32 1.0, %v1265_v25  ;;  %v1263_v25 = vmul.f32 %v2373_v40, %v1262_v8 }
 0x599   : > { %v1291_v60 = vor.u32 1.1754944e-38, %v1290_v38  ;;  %vm1289_vm12 = vcmp.eq.f32.partialorder %v1288_v49, 8.507059e+37 }
 0x59a   : > { %v1267_v27 = vmul.f32 %v1802_v6, %v1266_v41  ;;  %v1355_v58 = vpack.c.bf16 %v1263_v25, %v1263_v25 }
 0x59b   : > { %1491 = vmatpush.bf16.msra.mxu0 %v1711_v31 }
 0x59c   : > { %v1268_v33 = vadd.f32 %v1802_v6, %v1267_v27 }
 0x59d   : > { %v1804_v44 = vpop.eup %1803 }
 0x59e   : > { %v1418_v20 = vpop.permute.xlu1 %1417  ;;  %v1280_v34 = vmul.f32 %v1804_v44, %v1221_v0  ;;  %v1212_v62 = vpop.xlane.xlu0 %1211  ;;  %vm1285_vm4 = vweird.f32 %v1804_v44  ;;  %v1272_v57 = vsel %vm2414_vm6, %v1802_v6, %v1268_v33 }
 0x59f   : > { %1430 = vmatpush.bf16.msrb.mxu2 %v1418_v20  ;;  %1805 = vrcp.f32 %v1212_v62  ;;  %vm1286_vm9 = vmor %vm1284_vm8, %vm1285_vm4  ;;  %v1277_v7 = vsel %vm1274_vm10, %v1276_v1, %v1272_v57  ;;  %v1245_v12 = vand.u32 2147483648, %v1212_v62  ;;  %v1243_v19 = vand.u32 2147483647, %v1212_v62 }
 0x5a0   : > { %v1281_v35 = vsub.f32 1.0, %v1280_v34  ;;  %v1278_v17 = vmul.f32 %v2377_v39, %v1277_v7  ;;  %vm1239_vm15 = vweird.f32 %v1212_v62  ;;  %v2434_v39 = vld [vmem:[%s2511_s5] sm:$0xff] }
 0x5a1   : > { %v1246_v45 = vor.u32 1.1754944e-38, %v1245_v12  ;;  %vm1244_vm2 = vcmp.eq.f32.partialorder %v1243_v19, 8.507059e+37 }
 0x5a2   : > { %v1282_v23 = vmul.f32 %v1804_v44, %v1281_v35  ;;  %v1356_v0 = vpack.c.bf16 %v1278_v17, %v1278_v17 }
 0x5a4   : > { %v1283_v22 = vadd.f32 %v1804_v44, %v1282_v23  ;;  %v1389_v20 = vunpack.c.l.b16 %v1356_v0 }
 0x5a5   : > { %v1806_v29 = vpop.eup %1805 }
 0x5a6   : > { %v1287_v3 = vsel %vm1286_vm9, %v1804_v44, %v1283_v22  ;;  %v1235_v9 = vmul.f32 %v1806_v29, %v1212_v62  ;;  %vm1240_vm14 = vweird.f32 %v1806_v29 }
 0x5a7   : > { %v1292_v46 = vsel %vm1289_vm12, %v1291_v60, %v1287_v3  ;;  %vm1241_vm1 = vmor %vm1239_vm15, %vm1240_vm14 }
 0x5a8   : > { %v1293_v42 = vmul.f32 %v2381_v54, %v1292_v46  ;;  %v1236_v15 = vsub.f32 1.0, %v1235_v9 }
 0x5aa   : > { %v1237_v18 = vmul.f32 %v1806_v29, %v1236_v15  ;;  %v1224_v21 = vpop.xlane.xlu2 %1223  ;;  %v1357_v6 = vpack.c.bf16 %v1293_v42, %v1293_v42 }
 0x5ab   : > { %1807 = vrcp.f32 %v1224_v21  ;;  %v1305_v49 = vand.u32 2147483648, %v1224_v21  ;;  %vm1299_vm4 = vweird.f32 %v1224_v21  ;;  %v1303_v10 = vand.u32 2147483647, %v1224_v21 }
 0x5ac   : > { %v1238_v24 = vadd.f32 %v1806_v29, %v1237_v18  ;;  %v1390_v26 = vunpack.c.l.b16 %v1357_v6 }
 0x5ad   : > { %v1306_v22 = vor.u32 1.1754944e-38, %v1305_v49  ;;  %vm1304_vm6 = vcmp.eq.f32.partialorder %v1303_v10, 8.507059e+37 }
 0x5ae   : > { %v1242_v41 = vsel %vm1241_vm1, %v1806_v29, %v1238_v24  ;;  %v1391_v36 = vpack.c.b16 %v1390_v26, %v1389_v20 }
 0x5af   : > { %v1247_v54 = vsel %vm1244_vm2, %v1246_v45, %v1242_v41 }
 0x5b0   : > { %v1248_v27 = vmul.f32 %v2387_v63, %v1247_v54  ;;  %v1365_v63 = vunpack.c.l.b16 %v1355_v58 }
 0x5b1   : > { %v1808_v44 = vpop.eup %1807 }
 0x5b2   : > { %v1295_v34 = vmul.f32 %v1808_v44, %v1224_v21  ;;  %v1393_v62 = vpop.permute.xlu2 %1392  ;;  %v1354_v33 = vpack.c.bf16 %v1248_v27, %v1248_v27  ;;  %v1227_v35 = vpop.xlane.xlu0 %1226  ;;  %vm1300_vm3 = vweird.f32 %v1808_v44 }
 0x5b3   : > { %1405 = vmatpush.bf16.msra.mxu1 %v1393_v62  ;;  %1809 = vrcp.f32 %v1227_v35  ;;  %vm1301_vm5 = vmor %vm1299_vm4, %vm1300_vm3  ;;  %v1320_v1 = vand.u32 2147483648, %v1227_v35  ;;  %v1318_v3 = vand.u32 2147483647, %v1227_v35  ;;  %vm1314_vm8 = vweird.f32 %v1227_v35 }
 0x5b4   : > { %v1296_v40 = vsub.f32 1.0, %v1295_v34  ;;  %v1364_v37 = vunpack.c.l.b16 %v1354_v33 }
 0x5b5   : > { %v1321_v46 = vor.u32 1.1754944e-38, %v1320_v1  ;;  %vm1319_vm10 = vcmp.eq.f32.partialorder %v1318_v3, 8.507059e+37 }
 0x5b6   : > { %v1297_v38 = vmul.f32 %v1808_v44, %v1296_v40  ;;  %1685 = vmatmul.msk.bf16.vlgmr.msra.gmra.mxu1 %vm636_vm11, %v1391_v36  ;;  %v1366_v30 = vpack.c.b16 %v1365_v63, %v1364_v37 }
 0x5b7   : > { %1538 = vmatpush.bf16.msrb.mxu1 %v2434_v39 }
 0x5b8   : > { %v1298_v23 = vadd.f32 %v1808_v44, %v1297_v38  ;;  %1684 = vmatmul.msk.bf16.vlgmr.msrb.gmra.mxu0 %vm636_vm11, %v1366_v30 }
 0x5b9   : > { %v1810_v28 = vpop.eup %1809 }
 0x5ba   : > { %v1302_v59 = vsel %vm1301_vm5, %v1808_v44, %v1298_v23  ;;  %v1310_v61 = vmul.f32 %v1810_v28, %v1227_v35  ;;  %v1230_v57 = vpop.xlane.xlu0 %1229  ;;  %vm1315_vm7 = vweird.f32 %v1810_v28 }
 0x5bb   : > { %1811 = vrcp.f32 %v1230_v57  ;;  %v1307_v4 = vsel %vm1304_vm6, %v1306_v22, %v1302_v59  ;;  %vm1316_vm9 = vmor %vm1314_vm8, %vm1315_vm7  ;;  %vm1329_vm13 = vweird.f32 %v1230_v57  ;;  %v1335_v6 = vand.u32 2147483648, %v1230_v57 }
 0x5bc   : > { %v1311_v29 = vsub.f32 1.0, %v1310_v61  ;;  %v1308_v9 = vmul.f32 %v2393_v55, %v1307_v4  ;;  %v1333_v0 = vand.u32 2147483647, %v1230_v57 }
 0x5bd   : > { %v1336_v27 = vor.u32 1.1754944e-38, %v1335_v6  ;;  %v1818_v6 = vld [vmem:[%s1898_s10 + $0x18] sm:$0xff] }
 0x5be   : > { %v1312_v60 = vmul.f32 %v1810_v28, %v1311_v29  ;;  %v1358_v17 = vpack.c.bf16 %v1308_v9, %v1308_v9  ;;  %vm1334_vm15 = vcmp.eq.f32.partialorder %v1333_v0, 8.507059e+37  ;;  %v1815_v29 = vld [vmem:[%s1898_s10] sm:$0xff]  ;;  %v1816_v9 = vld [vmem:[%s1898_s10 + $0x8] sm:$0xff] }
 0x5c0   : > { %v1313_v43 = vadd.f32 %v1810_v28, %v1312_v60  ;;  %v1414_v24 = vunpack.c.l.b16 %v1358_v17 }
 0x5c1   : > { %v1812_v7 = vpop.eup %1811 }
 0x5c2   : > { %v1317_v42 = vsel %vm1316_vm9, %v1810_v28, %v1313_v43  ;;  %v1325_v15 = vmul.f32 %v1812_v7, %v1230_v57  ;;  %v1233_v8 = vpop.xlane.xlu0 %1232  ;;  %vm1330_vm12 = vweird.f32 %v1812_v7  ;;  %v1732_v28 = vld [vmem:[%s2512_s6] ss:$0 sm:$0xff] }
 0x5c3   : > { %v1322_v12 = vsel %vm1319_vm10, %v1321_v46, %v1317_v42  ;;  %1813 = vrcp.f32 %v1233_v8  ;;  %vm1331_vm14 = vmor %vm1329_vm13, %vm1330_vm12  ;;  %v1350_v52 = vand.u32 2147483648, %v1233_v8  ;;  %v1348_v58 = vand.u32 2147483647, %v1233_v8 }
 0x5c4   : > { %v1323_v18 = vmul.f32 %v2398_v5, %v1322_v12  ;;  %v1326_v19 = vsub.f32 1.0, %v1325_v15  ;;  %vm1344_vm2 = vweird.f32 %v1233_v8 }
 0x5c5   : > { %v1351_v62 = vor.u32 1.1754944e-38, %v1350_v52  ;;  %vm1349_vm4 = vcmp.eq.f32.partialorder %v1348_v58, 8.507059e+37 }
 0x5c6   : > { %1700 = vmatmul.msk.bf16.vlgmr.msrb.gmra.mxu1 %vm636_vm11, %v1053_v53  ;;  %v1359_v55 = vpack.c.bf16 %v1323_v18, %v1323_v18  ;;  %v1327_v21 = vmul.f32 %v1812_v7, %v1326_v19 }
 0x5c8   : > { %v1415_v45 = vunpack.c.l.b16 %v1359_v55  ;;  %v1328_v25 = vadd.f32 %v1812_v7, %v1327_v21 }
 0x5c9   : > { %v1814_v41 = vpop.eup %1813 }
 0x5ca   : > { %v1332_v54 = vsel %vm1331_vm14, %v1812_v7, %v1328_v25  ;;  %v1340_v26 = vmul.f32 %v1814_v41, %v1233_v8  ;;  %v1416_v5 = vpack.c.b16 %v1415_v45, %v1414_v24  ;;  %vm1345_vm1 = vweird.f32 %v1814_v41  ;;  %v1817_v8 = vld [vmem:[%s1898_s10 + $0x10] sm:$0xff] }
 0x5cb   : > { %v1337_v48 = vsel %vm1334_vm15, %v1336_v27, %v1332_v54  ;;  %vm1346_vm3 = vmor %vm1344_vm2, %vm1345_vm1  ;;  %v1819_v54 = vld [vmem:[%s1898_s10 + $0x20] sm:$0xff] }
 0x5cc   : > { %v1341_v44 = vsub.f32 1.0, %v1340_v26  ;;  %1686 = vmatmul.msk.bf16.vlgmr.msrb.gmra.mxu2 %vm636_vm11, %v1416_v5  ;;  %v1338_v20 = vmul.f32 %v2402_v14, %v1337_v48  ;;  %v1820_v48 = vld [vmem:[%s1898_s10 + $0x28] sm:$0xff] }
 0x5ce   : > { %v1342_v53 = vmul.f32 %v1814_v41, %v1341_v44  ;;  %v1360_v40 = vpack.c.bf16 %v1338_v20, %v1338_v20 }
 0x5d0   : > { %v1343_v34 = vadd.f32 %v1814_v41, %v1342_v53  ;;  %v1439_v14 = vunpack.c.l.b16 %v1360_v40 }
 0x5d2   : > { %v1347_v33 = vsel %vm1346_vm3, %v1814_v41, %v1343_v34 }
 0x5d3   : > { %v1352_v35 = vsel %vm1349_vm4, %v1351_v62, %v1347_v33  ;;  %v1821_v62 = vld [vmem:[%s1898_s10 + $0x30] sm:$0xff] }
 0x5d4   : > { %v1353_v36 = vmul.f32 %v2406_v16, %v1352_v35 }
 0x5d5   : > { %v1443_v37 = vpop.permute.xlu0 %1442 }
 0x5d6   : > { %1701 = vmatmul.msk.bf16.gmra.mxu1 %vm636_vm11, %v1054_v51  ;;  %v1361_v63 = vpack.c.bf16 %v1353_v36, %v1353_v36  ;;  %1455 = vmatpush.bf16.msra.mxu3 %v1443_v37 }
 0x5d8   : > { %v1440_v38 = vunpack.c.l.b16 %v1361_v63  ;;  %v1822_v63 = vld [vmem:[%s1898_s10 + $0x38] sm:$0xff] }
 0x5da   : > { %1714 = vmatpush.bf16.msrb.mxu3 %v2434_v39  ;;  %v1441_v30 = vpack.c.b16 %v1440_v38, %v1439_v14 }
 0x5dc   : > { %1687 = vmatmul.msk.bf16.vlgmr.msra.gmra.mxu3 %vm636_vm11, %v1441_v30 }
 0x5ec   : > { %1702 = vmatmul.msk.bf16.vlgmr.msrb.gmra.mxu3 %vm636_vm11, %v1055_v11 }
 0x5fc   : > { %1703 = vmatmul.msk.bf16.gmra.mxu3 %vm636_vm11, %v1056_v2 }
 0x633   : > { %v1407_v39 = vpop.f32.mrf.mxu1 }
 0x635   : > { %v1382_v50 = vpop.f32.mrf.mxu0 }
 0x63b   : > { %v1409_v23 = vpop.f32.mrf.mxu1 }
 0x63c   : > { %v1463_v47 = vpack.c.bf16 %v1409_v23, %v1407_v39 }
 0x63d   : > { %v1384_v51 = vpop.f32.mrf.mxu0 }
 0x63e   : > { %v1462_v16 = vpack.c.bf16 %v1384_v51, %v1382_v50 }
 0x640   : > { %1692 = vmatmul.msk.bf16.vlgmr.msra.gmra.mxu0 %vm636_vm11, %v1462_v16 }
 0x643   : > { %v1540_v10 = vpop.f32.mrf.mxu1 }
 0x64b   : > { %v1542_v22 = vpop.f32.mrf.mxu1 }
 0x64f   : > { %v1432_v32 = vpop.f32.mrf.mxu2 }
 0x650   : > { %1693 = vmatmul.msk.bf16.gmra.mxu0 %vm636_vm11, %v1463_v47 }
 0x653   : > { %v1545_v7 = vpop.f32.mrf.mxu1 }
 0x657   : > { %v1434_v11 = vpop.f32.mrf.mxu2 }
 0x658   : > { %v1464_v56 = vpack.c.bf16 %v1434_v11, %v1432_v32 }
 0x65b   : > { %v1547_v17 = vpop.f32.mrf.mxu1 }
 0x65f   : > { %v1457_v13 = vpop.f32.mrf.mxu3 }
 0x660   : > { %1694 = vmatmul.msk.bf16.gmra.mxu0 %vm636_vm11, %v1464_v56 }
 0x667   : > { %v1459_v2 = vpop.f32.mrf.mxu3 }
 0x668   : > { %v1465_v49 = vpack.c.bf16 %v1459_v2, %v1457_v13 }
 0x66f   : > { %v1550_v55 = vpop.f32.mrf.mxu3 }
 0x670   : > { %1695 = vmatmul.msk.bf16.gmra.mxu0 %vm636_vm11, %v1465_v49 }
 0x677   : > { %v1552_v41 = vpop.f32.mrf.mxu3 }
 0x67f   : > { %v1555_v53 = vpop.f32.mrf.mxu3 }
 0x687   : > { %v1557_v35 = vpop.f32.mrf.mxu3 }
 0x6bd   : > { %v1493_v59 = vpop.f32.mrf.mxu0 }
 0x6be   : > { %v1541_v61 = vadd.f32 %v1540_v10, %v1493_v59 }
 0x6c0   : > { %v1564_v57 = vadd.f32 %v1732_v28, %v1541_v61 }
 0x6c2   : > { %v1572_v4 = vadd.f32 %v1815_v29, %v1564_v57 }
 0x6c4   : > { %1580 = vst.msk [vmem:[%s2477_s12] sm:$0xff] %vm315_vm0, %v1572_v4 }
 0x6c5   : > { %v1495_v1 = vpop.f32.mrf.mxu0 }
 0x6c6   : > { %v1543_v60 = vadd.f32 %v1542_v22, %v1495_v1 }
 0x6c8   : > { %v1565_v3 = vadd.f32 %v1732_v28, %v1543_v60 }
 0x6ca   : > { %v1573_v43 = vadd.f32 %v1816_v9, %v1565_v3 }
 0x6cc   : > { %1581 = vst.msk [vmem:[%s2477_s12 + $0x8] sm:$0xff] %vm315_vm0, %v1573_v43 }
 0x6cd   : > { %v1498_v46 = vpop.f32.mrf.mxu0 }
 0x6ce   : > { %v1546_v42 = vadd.f32 %v1545_v7, %v1498_v46 }
 0x6d0   : > { %v1566_v15 = vadd.f32 %v1732_v28, %v1546_v42 }
 0x6d2   : > { %v1574_v12 = vadd.f32 %v1817_v8, %v1566_v15 }
 0x6d4   : > { %1582 = vst.msk [vmem:[%s2477_s12 + $0x10] sm:$0xff] %vm315_vm0, %v1574_v12 }
 0x6d5   : > { %v1500_v18 = vpop.f32.mrf.mxu0 }
 0x6d6   : > { %v1548_v19 = vadd.f32 %v1547_v17, %v1500_v18 }
 0x6d8   : > { %v1567_v21 = vadd.f32 %v1732_v28, %v1548_v19 }
 0x6da   : > { %v1575_v24 = vadd.f32 %v1818_v6, %v1567_v21 }
 0x6dc   : > { %1583 = vst.msk [vmem:[%s2477_s12 + $0x18] sm:$0xff] %vm315_vm0, %v1575_v24 }
 0x6dd   : > { %v1503_v45 = vpop.f32.mrf.mxu0 }
 0x6de   : > { %v1551_v25 = vadd.f32 %v1550_v55, %v1503_v45 }
 0x6e0   : > { %v1568_v0 = vadd.f32 %v1732_v28, %v1551_v25 }
 0x6e2   : > { %v1576_v26 = vadd.f32 %v1819_v54, %v1568_v0 }
 0x6e4   : > { %1584 = vst.msk [vmem:[%s2477_s12 + $0x20] sm:$0xff] %vm315_vm0, %v1576_v26 }
 0x6e5   : > { %v1505_v5 = vpop.f32.mrf.mxu0 }
 0x6e6   : > { %v1553_v27 = vadd.f32 %v1552_v41, %v1505_v5 }
 0x6e8   : > { %v1569_v44 = vadd.f32 %v1732_v28, %v1553_v27 }
 0x6ea   : > { %v1577_v52 = vadd.f32 %v1820_v48, %v1569_v44 }
 0x6ec   : > { %1585 = vst.msk [vmem:[%s2477_s12 + $0x28] sm:$0xff] %vm315_vm0, %v1577_v52 }
 0x6ed   : > { %v1508_v58 = vpop.f32.mrf.mxu0 }
 0x6ee   : > { %v1556_v20 = vadd.f32 %v1555_v53, %v1508_v58 }
 0x6f0   : > { %v1570_v34 = vadd.f32 %v1732_v28, %v1556_v20 }
 0x6f2   : > { %v1578_v33 = vadd.f32 %v1821_v62, %v1570_v34 }
 0x6f4   : > { %1586 = vst.msk [vmem:[%s2477_s12 + $0x30] sm:$0xff] %vm315_vm0, %v1578_v33 }
 0x6f5   : > { %v1510_v40 = vpop.f32.mrf.mxu0 }
 0x6f6   : > { %v1558_v36 = vadd.f32 %v1557_v35, %v1510_v40 }
 0x6f8   : > { %v1571_v37 = vadd.f32 %v1732_v28, %v1558_v36 }
 0x6fa   : > { %v1579_v14 = vadd.f32 %v1822_v63, %v1571_v37 }
 0x6fc   : > { %1587 = vst.msk [vmem:[%s2477_s12 + $0x38] sm:$0xff] %vm315_vm0, %v1579_v14 }
 0x6fd PF: > { %s18_s27 = sadd.s32 1, %s1829_s27  }
 0x6fe   : > { %p15_p4 = scmp.ge.s32.totalorder %s18_s27, 4  }
 0x700   :  { %17 = sbr.rel (!%p15_p4) target bundleno = 1 (0x1), region = 83 }

// kernel: sub.36
= control target key start
LH: loop header
LB: loop body
LE: loop exit
PB: predicated region body
PF: predicated region fallthrough
CT: control target
= control target key end

     0   :  { %s52_s14 = smov 4   ;;  %s53_s15 = smov 8   ;;  %vm19_vm0 = vcmask 31744   ;;  %vm25_vm1 = vcmask 130144   ;;  %vm31_vm2 = vcmask 97344   ;;  %vm37_vm3 = vcmask 64544   ;;  %s79_s0 = inlined_call_operand.vmem [shape: f32[2,2,4,4], index: 0, kind: input, shape index: {}]   ;;  %s80_s1 = inlined_call_operand.vmem [shape: f32[4,16], index: 1, kind: output, shape index: {}]  }
   0x1   :  { %v45_v0 = vld [vmem:[%s79_s0 + $0xc] sm:$0xf]  ;;  %v46_v1 = vld [vmem:[%s79_s0 + $0x8] sm:$0xf]  ;;  %v47_v2 = vld [vmem:[%s79_s0 + $0x4] sm:$0xf] }
   0x2   :  { %7 = vst [vmem:[#allocation1 + $0x18] sm:$0xf] %v45_v0  ;;  %v16_v3 = vld [vmem:[%s79_s0] sm:$0xf]  ;;  %s51_s0 = smov 12  }
   0x3   :  { %11 = vst [vmem:[#allocation1 + $0x10] sm:$0xf] %v46_v1 }
   0x4   :  { %15 = vst [vmem:[#allocation1 + $0x8] sm:$0xf] %v47_v2 }
   0x5   :  { %17 = vst [vmem:[#allocation1] sm:$0xf] %v16_v3 }
   0xc   :  { %v22_v4 = vld [vmem:[#allocation1 + $0x3] ss:$8 sm:$0xf]   ;;  %v34_v5 = vld [vmem:[#allocation1 + $0x1] ss:$8 sm:$0xf]  }
   0xd   :  { %23 = vrot.lane.b32.xlu0 %v22_v4, %s51_s0  ;;  %35 = vrot.lane.b32.xlu1 %v34_v5, %s52_s14  ;;  %v28_v6 = vld [vmem:[#allocation1 + $0x2] ss:$8 sm:$0xf]   ;;  %v18_v7 = vld [vmem:[#allocation1] ss:$8 sm:$0xf]  }
   0xe   :  { %20 = vst.msk [vmem:[#allocation0] sm:$0xf] %vm19_vm0, %v18_v7  }
  0x15   :  { %29 = vrot.lane.b32.xlu0 %v28_v6, %s53_s15 }
  0x7f   :  { %v24_v8 = vpop.permute.xlu0 %23   ;;  %v36_v9 = vpop.permute.xlu1 %35  }
  0x80   :  { %26 = vst.msk [vmem:[#allocation0] sm:$0xf] %vm25_vm1, %v24_v8  }
  0x87   :  { %v30_v10 = vpop.permute.xlu0 %29  }
  0x88   :  { %32 = vst.msk [vmem:[#allocation0] sm:$0xf] %vm31_vm2, %v30_v10  }
  0x89   :  { %38 = vst.msk [vmem:[#allocation0] sm:$0xf] %vm37_vm3, %v36_v9  }
  0x90   :  { %v41_v11 = vld [vmem:[#allocation0] sm:$0xf] }
  0x91   :  { %44 = vst [vmem:[%s80_s1] sm:$0xf] %v41_v11 }

</bundles_post_ra>
